<compile_context>
chip_gen: v6e
topology: v6e:2x2x1
jax: 0.10.0
libtpu: 0.0.40
codegen_flags: <defaults>
</compile_context>

<pallas_src>
import functools

import jax
import jax.numpy as jnp
from jax import lax
from jax.experimental import pallas as pl
from jax.experimental.pallas import tpu as pltpu


def _layer_norm(x, gamma, beta, eps=1e-5):
    mu = jnp.mean(x, axis=-1, keepdims=True)
    var = jnp.mean((x - mu) ** 2, axis=-1, keepdims=True)
    return (x - mu) * lax.rsqrt(var + eps) * gamma + beta


def encoder_kernel(
    x_ref, bias_ref,
    wq_ref, bq_ref, wk_ref, bk_ref, wv_ref, bv_ref, wo_ref, bo_ref,
    ln1_g_ref, ln1_b_ref,
    w1_ref, b1_ref, w2_ref, b2_ref,
    ln2_g_ref, ln2_b_ref,
    o_ref,
    *, num_heads, n_layer, head_chunk, ffn_chunk,
):
    f32 = jnp.float32
    bf16 = jnp.bfloat16

    x0 = x_ref[...].astype(f32)            # (S, D)
    bias = bias_ref[...].astype(f32)       # (S, S) additive mask bias (0 / -1e9)
    S, D = x0.shape
    H = num_heads
    dh = D // H
    F = w1_ref.shape[1]
    hc = head_chunk
    fc = ffn_chunk

    # Small f32 params loaded once; reused by every fused layer iteration.
    bo = bo_ref[...]; b2 = b2_ref[...]
    ln1_g = ln1_g_ref[...]; ln1_b = ln1_b_ref[...]
    ln2_g = ln2_g_ref[...]; ln2_b = ln2_b_ref[...]

    def layer(x):
        xb = x.astype(bf16)

        # ---------------- multi-head attention (VMEM-bounded) ----------------
        # QKV projections done `head_chunk` heads at a time (wide MXU matmuls);
        # softmax / PV done one head at a time, so only one (S, S) f32 score
        # tile is ever live.
        attn = jnp.zeros((S, D), f32)
        for hi in range(H // hc):
            c0 = hi * hc * dh
            cw = hc * dh
            qc = (jnp.dot(xb, wq_ref[:, pl.ds(c0, cw)], preferred_element_type=f32)
                  + bq_ref[:, pl.ds(c0, cw)]).astype(bf16)          # scale pre-folded
            kc = (jnp.dot(xb, wk_ref[:, pl.ds(c0, cw)], preferred_element_type=f32)
                  + bk_ref[:, pl.ds(c0, cw)]).astype(bf16)
            vc = (jnp.dot(xb, wv_ref[:, pl.ds(c0, cw)], preferred_element_type=f32)
                  + bv_ref[:, pl.ds(c0, cw)]).astype(bf16)
            for j in range(hc):
                q_h = qc[:, j * dh:(j + 1) * dh]                    # (S, dh) bf16
                k_h = kc[:, j * dh:(j + 1) * dh]
                v_h = vc[:, j * dh:(j + 1) * dh]
                # q @ k^T without materializing a transpose.
                s = lax.dot_general(q_h, k_h, (((1,), (1,)), ((), ())),
                                    preferred_element_type=f32)     # (S, S)
                s = s + bias
                m = jnp.max(s, axis=-1, keepdims=True)
                p = jnp.exp(s - m)                                  # unnormalized
                l = jnp.sum(p, axis=-1, keepdims=True)              # (S, 1)
                o = jnp.dot(p.astype(bf16), v_h, preferred_element_type=f32)
                o = (o * pl.reciprocal(l, approx=True)).astype(bf16)
                # Per-head output projection accumulated directly into (S, D).
                attn = attn + jnp.dot(o, wo_ref[pl.ds(c0 + j * dh, dh), :],
                                      preferred_element_type=f32)

        # residual + LayerNorm (post-norm), f32 elementwise
        h1 = _layer_norm(x + attn + bo, ln1_g, ln1_b)
        h1b = h1.astype(bf16)

        # ---------------- feed-forward (F-chunked) ----------------
        ff = jnp.zeros((S, D), f32)
        for ci in range(F // fc):
            f0 = ci * fc
            f = jnp.dot(h1b, w1_ref[:, pl.ds(f0, fc)], preferred_element_type=f32) \
                + b1_ref[:, pl.ds(f0, fc)]
            f = jnp.maximum(f, 0.0)
            ff = ff + jnp.dot(f.astype(bf16), w2_ref[pl.ds(f0, fc), :],
                              preferred_element_type=f32)

        return _layer_norm(h1 + ff + b2, ln2_g, ln2_b)

    out = lax.fori_loop(0, n_layer, lambda _, xc: layer(xc), x0,
                        unroll=(n_layer <= 8))
    o_ref[...] = out.astype(o_ref.dtype)


def _vmem_limit_bytes():
    """Explicit scoped-VMEM limit, tuned per TPU generation."""
    try:
        kind = jax.devices()[0].device_kind.lower()
    except Exception:
        kind = ""
    if "7" in kind:                      # v7x: 64 MiB physical/TC -> leave headroom
        return 48 * 1024 * 1024
    if "v5 lite" in kind or "v5e" in kind or "v6" in kind:
        return 100 * 1024 * 1024         # 128 MiB physical
    return 64 * 1024 * 1024


def _pick_chunk(total, bytes_per_item, budget):
    c = max(1, min(total, budget // max(1, bytes_per_item)))
    while total % c:
        c -= 1
    return c


def encoder_forward(x, mask, params, *, n_layer, num_heads,
                    head_chunk=None, ffn_chunk=None):
    """Full Encoder forward (n_layer identical layers) in one pallas_call."""
    B, S, D = x.shape
    F = params["w1"].shape[1]
    H = num_heads
    assert D % H == 0, "model dim must be divisible by num_heads"
    dh = D // H
    f32, bf16 = jnp.float32, jnp.bfloat16

    # Auto chunk sizes that bound in-kernel live temporaries (~few MiB each).
    if head_chunk is None:
        head_chunk = _pick_chunk(H, 3 * S * dh * 4, 6 << 20)
    if ffn_chunk is None:
        ffn_chunk = _pick_chunk(F, S * 4, 4 << 20)
    assert H % head_chunk == 0 and F % ffn_chunk == 0

    # ---- host-side prep: fold 1/sqrt(dh) into wq/bq, bf16 MXU weights ----
    scale = 1.0 / float(dh) ** 0.5
    wq = (params["wq"].astype(f32) * scale).astype(bf16)
    bq = (params["bq"].astype(f32) * scale)
    wk = params["wk"].astype(bf16)
    wv = params["wv"].astype(bf16)
    wo = params["wo"].astype(bf16)
    w1 = params["w1"].astype(bf16)
    w2 = params["w2"].astype(bf16)

    # Additive mask bias computed once on the host; bf16 halves DMA/VMEM.
    bias = jnp.where(mask > 0, 0.0, -1e9).astype(bf16)

    def const_spec(shape, buffered):
        kw = {}
        if buffered is not None:
            kw["pipeline_mode"] = pl.Buffered(buffered)
        return pl.BlockSpec(shape, lambda b: (0,) * len(shape), **kw)

    kernel = functools.partial(encoder_kernel, num_heads=H, n_layer=n_layer,
                               head_chunk=head_chunk, ffn_chunk=ffn_chunk)

    # Advisory cost estimate (helps XLA scheduling around the custom call).
    flops = int(B * n_layer * (8 * S * D * D + 4 * S * S * D + 4 * S * D * F))
    transc = int(B * n_layer * (H * S * S + H * S + 2 * S))
    bytes_acc = int(
        2 * B * S * D * 4                # x in + out (f32)
        + B * S * S * 2                  # mask bias (bf16)
        + (4 * D * D + 2 * D * F) * 2    # bf16 weights
        + (6 * D + F) * 4                # biases + LN params (f32)
    )
    cost = pl.CostEstimate(flops=flops, transcendentals=transc,
                           bytes_accessed=bytes_acc)

    def build_call(buffered):
        in_specs = [
            pl.BlockSpec((None, S, D), lambda b: (b, 0, 0)),   # x  (batch squeezed)
            pl.BlockSpec((None, S, S), lambda b: (b, 0, 0)),   # mask bias (bf16)
            const_spec((D, D), buffered), const_spec((1, D), buffered),   # wq, bq
            const_spec((D, D), buffered), const_spec((1, D), buffered),   # wk, bk
            const_spec((D, D), buffered), const_spec((1, D), buffered),   # wv, bv
            const_spec((D, D), buffered), const_spec((1, D), buffered),   # wo, bo
            const_spec((1, D), buffered), const_spec((1, D), buffered),   # ln1 g, b
            const_spec((D, F), buffered), const_spec((1, F), buffered),   # w1, b1
            const_spec((F, D), buffered), const_spec((1, D), buffered),   # w2, b2
            const_spec((1, D), buffered), const_spec((1, D), buffered),   # ln2 g, b
        ]
        out_specs = pl.BlockSpec((None, S, D), lambda b: (b, 0, 0))
        return pl.pallas_call(
            kernel,
            out_shape=jax.ShapeDtypeStruct((B, S, D), x.dtype),
            grid=(B,),
            in_specs=in_specs,
            out_specs=out_specs,
            input_output_aliases={0: 0},      # output reuses x's HBM buffer
            compiler_params=pltpu.CompilerParams(
                dimension_semantics=("parallel",),     # batch independent
                vmem_limit_bytes=_vmem_limit_bytes()),
            cost_estimate=cost,
        )

    args = (
        x, bias,
        wq, bq, wk, params["bk"].astype(f32), wv, params["bv"].astype(f32),
        wo, params["bo"].astype(f32),
        params["ln1_g"].astype(f32), params["ln1_b"].astype(f32),
        w1, params["b1"].astype(f32), w2, params["b2"].astype(f32),
        params["ln2_g"].astype(f32), params["ln2_b"].astype(f32),
    )

    try:
        # Constant weights: single-buffered (their block index never changes).
        return build_call(buffered=1)(*args)
    except Exception:
        # Fallback for jax versions that reject Buffered(1) on constant specs.
        return build_call(buffered=None)(*args)


# ---------------- pure-JAX reference (for correctness check) ----------------
def _ref_layer(x, mask, p, num_heads):
    B, S, D = x.shape
    dh = D // num_heads
    q = x @ p["wq"] + p["bq"]
    k = x @ p["wk"] + p["bk"]
    v = x @ p["wv"] + p["bv"]
    qh = q.reshape(B, S, num_heads, dh).transpose(0, 2, 1, 3)
    kh = k.reshape(B, S, num_heads, dh).transpose(0, 2, 1, 3)
    vh = v.reshape(B, S, num_heads, dh).transpose(0, 2, 1, 3)
    s = jnp.einsum("bhqd,bhkd->bhqk", qh, kh) / jnp.sqrt(jnp.float32(dh))
    s = jnp.where(mask[:, None, :, :] > 0, s, -1e9)
    pattn = jax.nn.softmax(s, axis=-1)
    a = jnp.einsum("bhqk,bhkd->bhqd", pattn, vh).transpose(0, 2, 1, 3).reshape(B, S, D)
    a = a @ p["wo"] + p["bo"]
    h1 = _layer_norm(x + a, p["ln1_g"], p["ln1_b"])
    f = jnp.maximum(h1 @ p["w1"] + p["b1"], 0.0) @ p["w2"] + p["b2"]
    return _layer_norm(h1 + f, p["ln2_g"], p["ln2_b"])


def _ref_encoder(x, mask, p, n_layer, num_heads):
    out = x
    for _ in range(n_layer):
        out = _ref_layer(out, mask, p, num_heads)
    return out


def init_params(key, D, F):
    ks = jax.random.split(key, 12)
    s = 0.05
    f32 = jnp.float32
    return dict(
        wq=jax.random.normal(ks[0], (D, D), f32) * s,
        bq=jax.random.normal(ks[6], (1, D), f32) * 0.02,
        wk=jax.random.normal(ks[1], (D, D), f32) * s,
        bk=jax.random.normal(ks[7], (1, D), f32) * 0.02,
        wv=jax.random.normal(ks[2], (D, D), f32) * s,
        bv=jax.random.normal(ks[8], (1, D), f32) * 0.02,
        wo=jax.random.normal(ks[3], (D, D), f32) * s,
        bo=jax.random.normal(ks[9], (1, D), f32) * 0.02,
        ln1_g=jnp.ones((1, D), f32), ln1_b=jnp.zeros((1, D), f32),
        w1=jax.random.normal(ks[4], (D, F), f32) * s,
        b1=jax.random.normal(ks[10], (1, F), f32) * 0.02,
        w2=jax.random.normal(ks[5], (F, D), f32) * s,
        b2=jax.random.normal(ks[11], (1, D), f32) * 0.02,
        ln2_g=jnp.ones((1, D), f32), ln2_b=jnp.zeros((1, D), f32),
    )


if __name__ == "__main__":
    B, S, D, H, FF, N_LAYER = 2, 8, 32, 4, 64, 2
    # NOTE: these toy shapes are for correctness only; benchmark with
    # D, FF multiples of 128/256 and S >= 256.

    key = jax.random.PRNGKey(0)
    kx, kp = jax.random.split(key)
    x = jax.random.normal(kx, (B, S, D), jnp.float32)
    # padding-style mask: batch 1 cannot attend to its last 2 positions
    mask = jnp.ones((B, S, S), jnp.float32)
    mask = mask.at[1, :, S - 2:].set(0.0)

    params = init_params(kp, D, FF)

    # Reference BEFORE the kernel (kernel aliases / may donate x's buffer).
    ref = _ref_encoder(x, mask, params, N_LAYER, H)

    # head_chunk / ffn_chunk chosen to exercise the chunked code paths.
    out = encoder_forward(x, mask, params, n_layer=N_LAYER, num_heads=H,
                          head_chunk=2, ffn_chunk=32)
    out = jax.block_until_ready(out)

    assert out.shape == (B, S, D)
    # bf16 MXU operands + approx reciprocal => looser tolerance than pure-f32.
    assert jnp.allclose(out, ref, rtol=2e-2, atol=2e-2), "mismatch vs reference"

    print("KERNEL_OK")
</pallas_src>

<mosaic_0001>
module attributes {stable_mosaic.version = 11 : i64} {
  func.func @encoder_kernel(%arg0: i32, %arg1: memref<1x8x32xf32, #tpu.memory_space<vmem>>, %arg2: memref<1x8x8xbf16, #tpu.memory_space<vmem>>, %arg3: memref<32x32xbf16, #tpu.memory_space<vmem>>, %arg4: memref<1x32xf32, #tpu.memory_space<vmem>>, %arg5: memref<32x32xbf16, #tpu.memory_space<vmem>>, %arg6: memref<1x32xf32, #tpu.memory_space<vmem>>, %arg7: memref<32x32xbf16, #tpu.memory_space<vmem>>, %arg8: memref<1x32xf32, #tpu.memory_space<vmem>>, %arg9: memref<32x32xbf16, #tpu.memory_space<vmem>>, %arg10: memref<1x32xf32, #tpu.memory_space<vmem>>, %arg11: memref<1x32xf32, #tpu.memory_space<vmem>>, %arg12: memref<1x32xf32, #tpu.memory_space<vmem>>, %arg13: memref<32x64xbf16, #tpu.memory_space<vmem>>, %arg14: memref<1x64xf32, #tpu.memory_space<vmem>>, %arg15: memref<64x32xbf16, #tpu.memory_space<vmem>>, %arg16: memref<1x32xf32, #tpu.memory_space<vmem>>, %arg17: memref<1x32xf32, #tpu.memory_space<vmem>>, %arg18: memref<1x32xf32, #tpu.memory_space<vmem>>, %arg19: memref<1x8x32xf32, #tpu.memory_space<vmem>>) attributes {dimension_semantics = [#tpu.dimension_semantics<parallel>], iteration_bounds = array<i64: 2>, scalar_prefetch = 0 : i64, scratch_operands = 0 : i64, tpu.core_type = #tpu.core_type<tc>, window_params = [{transform_indices = @transform_0, window_bounds = array<i64: 1, 8, 32>}, {transform_indices = @transform_1, window_bounds = array<i64: 1, 8, 8>}, {pipeline_mode = #tpu.pipeline_mode<synchronous>, transform_indices = @transform_2, window_bounds = array<i64: 32, 32>}, {pipeline_mode = #tpu.pipeline_mode<synchronous>, transform_indices = @transform_3, window_bounds = array<i64: 1, 32>}, {pipeline_mode = #tpu.pipeline_mode<synchronous>, transform_indices = @transform_4, window_bounds = array<i64: 32, 32>}, {pipeline_mode = #tpu.pipeline_mode<synchronous>, transform_indices = @transform_5, window_bounds = array<i64: 1, 32>}, {pipeline_mode = #tpu.pipeline_mode<synchronous>, transform_indices = @transform_6, window_bounds = array<i64: 32, 32>}, {pipeline_mode = #tpu.pipeline_mode<synchronous>, transform_indices = @transform_7, window_bounds = array<i64: 1, 32>}, {pipeline_mode = #tpu.pipeline_mode<synchronous>, transform_indices = @transform_8, window_bounds = array<i64: 32, 32>}, {pipeline_mode = #tpu.pipeline_mode<synchronous>, transform_indices = @transform_9, window_bounds = array<i64: 1, 32>}, {pipeline_mode = #tpu.pipeline_mode<synchronous>, transform_indices = @transform_10, window_bounds = array<i64: 1, 32>}, {pipeline_mode = #tpu.pipeline_mode<synchronous>, transform_indices = @transform_11, window_bounds = array<i64: 1, 32>}, {pipeline_mode = #tpu.pipeline_mode<synchronous>, transform_indices = @transform_12, window_bounds = array<i64: 32, 64>}, {pipeline_mode = #tpu.pipeline_mode<synchronous>, transform_indices = @transform_13, window_bounds = array<i64: 1, 64>}, {pipeline_mode = #tpu.pipeline_mode<synchronous>, transform_indices = @transform_14, window_bounds = array<i64: 64, 32>}, {pipeline_mode = #tpu.pipeline_mode<synchronous>, transform_indices = @transform_15, window_bounds = array<i64: 1, 32>}, {pipeline_mode = #tpu.pipeline_mode<synchronous>, transform_indices = @transform_16, window_bounds = array<i64: 1, 32>}, {pipeline_mode = #tpu.pipeline_mode<synchronous>, transform_indices = @transform_17, window_bounds = array<i64: 1, 32>}, {transform_indices = @transform_18, window_bounds = array<i64: 1, 8, 32>}]} {
    %c0 = arith.constant 0 : index
    %c0_0 = arith.constant 0 : index
    %c0_1 = arith.constant 0 : index
    %0 = vector.load %arg1[%c0, %c0_0, %c0_1] : memref<1x8x32xf32, #tpu.memory_space<vmem>>, vector<1x8x32xf32>
    %1 = vector.shape_cast %0 : vector<1x8x32xf32> to vector<8x32xf32>
    %c0_2 = arith.constant 0 : index
    %c0_3 = arith.constant 0 : index
    %c0_4 = arith.constant 0 : index
    %2 = vector.load %arg2[%c0_2, %c0_3, %c0_4] : memref<1x8x8xbf16, #tpu.memory_space<vmem>>, vector<1x8x8xbf16>
    %3 = vector.shape_cast %2 : vector<1x8x8xbf16> to vector<8x8xbf16>
    %4 = arith.extf %3 : vector<8x8xbf16> to vector<8x8xf32>
    %c0_5 = arith.constant 0 : index
    %c0_6 = arith.constant 0 : index
    %5 = vector.load %arg10[%c0_5, %c0_6] : memref<1x32xf32, #tpu.memory_space<vmem>>, vector<1x32xf32>
    %c0_7 = arith.constant 0 : index
    %c0_8 = arith.constant 0 : index
    %6 = vector.load %arg16[%c0_7, %c0_8] : memref<1x32xf32, #tpu.memory_space<vmem>>, vector<1x32xf32>
    %c0_9 = arith.constant 0 : index
    %c0_10 = arith.constant 0 : index
    %7 = vector.load %arg11[%c0_9, %c0_10] : memref<1x32xf32, #tpu.memory_space<vmem>>, vector<1x32xf32>
    %c0_11 = arith.constant 0 : index
    %c0_12 = arith.constant 0 : index
    %8 = vector.load %arg12[%c0_11, %c0_12] : memref<1x32xf32, #tpu.memory_space<vmem>>, vector<1x32xf32>
    %c0_13 = arith.constant 0 : index
    %c0_14 = arith.constant 0 : index
    %9 = vector.load %arg17[%c0_13, %c0_14] : memref<1x32xf32, #tpu.memory_space<vmem>>, vector<1x32xf32>
    %c0_15 = arith.constant 0 : index
    %c0_16 = arith.constant 0 : index
    %10 = vector.load %arg18[%c0_15, %c0_16] : memref<1x32xf32, #tpu.memory_space<vmem>>, vector<1x32xf32>
    %c0_i32 = arith.constant 0 : i32
    %11 = arith.truncf %1 : vector<8x32xf32> to vector<8x32xbf16>
    %cst = arith.constant 0.000000e+00 : f32
    %12 = vector.broadcast %cst : f32 to vector<8x32xf32>
    %c0_17 = arith.constant 0 : index
    %c0_18 = arith.constant 0 : index
    %13 = vector.load %arg3[%c0_17, %c0_18] : memref<32x32xbf16, #tpu.memory_space<vmem>>, vector<32x16xbf16>
    %cst_19 = arith.constant dense<0.000000e+00> : vector<8x16xf32>
    %14 = tpu.matmul %11, %13, %cst_19 {dimension_numbers = #tpu.dot_dimension_numbers<[1], [0], [0], [1], [0, 0, 1, 1], [], []>} : vector<8x32xbf16>, vector<32x16xbf16>, vector<8x16xf32> -> vector<8x16xf32>
    %c0_20 = arith.constant 0 : index
    %c0_21 = arith.constant 0 : index
    %15 = vector.load %arg4[%c0_20, %c0_21] : memref<1x32xf32, #tpu.memory_space<vmem>>, vector<1x16xf32>
    %16 = vector.broadcast %15 : vector<1x16xf32> to vector<8x16xf32>
    %17 = arith.addf %14, %16 : vector<8x16xf32>
    %18 = arith.truncf %17 : vector<8x16xf32> to vector<8x16xbf16>
    %c0_22 = arith.constant 0 : index
    %c0_23 = arith.constant 0 : index
    %19 = vector.load %arg5[%c0_22, %c0_23] : memref<32x32xbf16, #tpu.memory_space<vmem>>, vector<32x16xbf16>
    %cst_24 = arith.constant dense<0.000000e+00> : vector<8x16xf32>
    %20 = tpu.matmul %11, %19, %cst_24 {dimension_numbers = #tpu.dot_dimension_numbers<[1], [0], [0], [1], [0, 0, 1, 1], [], []>} : vector<8x32xbf16>, vector<32x16xbf16>, vector<8x16xf32> -> vector<8x16xf32>
    %c0_25 = arith.constant 0 : index
    %c0_26 = arith.constant 0 : index
    %21 = vector.load %arg6[%c0_25, %c0_26] : memref<1x32xf32, #tpu.memory_space<vmem>>, vector<1x16xf32>
    %22 = vector.broadcast %21 : vector<1x16xf32> to vector<8x16xf32>
    %23 = arith.addf %20, %22 : vector<8x16xf32>
    %24 = arith.truncf %23 : vector<8x16xf32> to vector<8x16xbf16>
    %c0_27 = arith.constant 0 : index
    %c0_28 = arith.constant 0 : index
    %25 = vector.load %arg7[%c0_27, %c0_28] : memref<32x32xbf16, #tpu.memory_space<vmem>>, vector<32x16xbf16>
    %cst_29 = arith.constant dense<0.000000e+00> : vector<8x16xf32>
    %26 = tpu.matmul %11, %25, %cst_29 {dimension_numbers = #tpu.dot_dimension_numbers<[1], [0], [0], [1], [0, 0, 1, 1], [], []>} : vector<8x32xbf16>, vector<32x16xbf16>, vector<8x16xf32> -> vector<8x16xf32>
    %c0_30 = arith.constant 0 : index
    %c0_31 = arith.constant 0 : index
    %27 = vector.load %arg8[%c0_30, %c0_31] : memref<1x32xf32, #tpu.memory_space<vmem>>, vector<1x16xf32>
    %28 = vector.broadcast %27 : vector<1x16xf32> to vector<8x16xf32>
    %29 = arith.addf %26, %28 : vector<8x16xf32>
    %30 = arith.truncf %29 : vector<8x16xf32> to vector<8x16xbf16>
    %31 = vector.extract_strided_slice %18 {offsets = [0, 0], sizes = [8, 8], strides = [1, 1]} : vector<8x16xbf16> to vector<8x8xbf16>
    %32 = vector.extract_strided_slice %24 {offsets = [0, 0], sizes = [8, 8], strides = [1, 1]} : vector<8x16xbf16> to vector<8x8xbf16>
    %33 = vector.extract_strided_slice %30 {offsets = [0, 0], sizes = [8, 8], strides = [1, 1]} : vector<8x16xbf16> to vector<8x8xbf16>
    %cst_32 = arith.constant dense<0.000000e+00> : vector<8x8xf32>
    %34 = tpu.matmul %31, %32, %cst_32 {dimension_numbers = #tpu.dot_dimension_numbers<[1], [1], [0], [0], [0, 0, 1, 0], [], []>} : vector<8x8xbf16>, vector<8x8xbf16>, vector<8x8xf32> -> vector<8x8xf32>
    %35 = arith.addf %34, %4 : vector<8x8xf32>
    %cst_33 = arith.constant dense<0xFF800000> : vector<8xf32>
    %36 = vector.multi_reduction <maximumf>, %35, %cst_33 [1] : vector<8x8xf32> to vector<8xf32>
    %37 = vector.shape_cast %36 : vector<8xf32> to vector<8x1xf32>
    %38 = vector.broadcast %37 : vector<8x1xf32> to vector<8x8xf32>
    %39 = arith.subf %35, %38 : vector<8x8xf32>
    %40 = math.exp %39 : vector<8x8xf32>
    %cst_34 = arith.constant dense<0.000000e+00> : vector<8xf32>
    %41 = vector.multi_reduction <add>, %40, %cst_34 [1] : vector<8x8xf32> to vector<8xf32>
    %42 = vector.shape_cast %41 : vector<8xf32> to vector<8x1xf32>
    %43 = arith.truncf %40 : vector<8x8xf32> to vector<8x8xbf16>
    %cst_35 = arith.constant dense<0.000000e+00> : vector<8x8xf32>
    %44 = tpu.matmul %43, %33, %cst_35 {dimension_numbers = #tpu.dot_dimension_numbers<[1], [0], [0], [1], [0, 0, 1, 1], [], []>} : vector<8x8xbf16>, vector<8x8xbf16>, vector<8x8xf32> -> vector<8x8xf32>
    %45 = tpu.reciprocal %42 {approx = true} : vector<8x1xf32> -> vector<8x1xf32>
    %46 = vector.broadcast %45 : vector<8x1xf32> to vector<8x8xf32>
    %47 = arith.mulf %44, %46 : vector<8x8xf32>
    %48 = arith.truncf %47 : vector<8x8xf32> to vector<8x8xbf16>
    %c0_36 = arith.constant 0 : index
    %c0_37 = arith.constant 0 : index
    %49 = vector.load %arg9[%c0_36, %c0_37] : memref<32x32xbf16, #tpu.memory_space<vmem>>, vector<8x32xbf16>
    %cst_38 = arith.constant dense<0.000000e+00> : vector<8x32xf32>
    %50 = tpu.matmul %48, %49, %cst_38 {dimension_numbers = #tpu.dot_dimension_numbers<[1], [0], [0], [1], [0, 0, 1, 1], [], []>} : vector<8x8xbf16>, vector<8x32xbf16>, vector<8x32xf32> -> vector<8x32xf32>
    %51 = arith.addf %12, %50 : vector<8x32xf32>
    %52 = vector.extract_strided_slice %18 {offsets = [0, 8], sizes = [8, 8], strides = [1, 1]} : vector<8x16xbf16> to vector<8x8xbf16>
    %53 = vector.extract_strided_slice %24 {offsets = [0, 8], sizes = [8, 8], strides = [1, 1]} : vector<8x16xbf16> to vector<8x8xbf16>
    %54 = vector.extract_strided_slice %30 {offsets = [0, 8], sizes = [8, 8], strides = [1, 1]} : vector<8x16xbf16> to vector<8x8xbf16>
    %cst_39 = arith.constant dense<0.000000e+00> : vector<8x8xf32>
    %55 = tpu.matmul %52, %53, %cst_39 {dimension_numbers = #tpu.dot_dimension_numbers<[1], [1], [0], [0], [0, 0, 1, 0], [], []>} : vector<8x8xbf16>, vector<8x8xbf16>, vector<8x8xf32> -> vector<8x8xf32>
    %56 = arith.addf %55, %4 : vector<8x8xf32>
    %cst_40 = arith.constant dense<0xFF800000> : vector<8xf32>
    %57 = vector.multi_reduction <maximumf>, %56, %cst_40 [1] : vector<8x8xf32> to vector<8xf32>
    %58 = vector.shape_cast %57 : vector<8xf32> to vector<8x1xf32>
    %59 = vector.broadcast %58 : vector<8x1xf32> to vector<8x8xf32>
    %60 = arith.subf %56, %59 : vector<8x8xf32>
    %61 = math.exp %60 : vector<8x8xf32>
    %cst_41 = arith.constant dense<0.000000e+00> : vector<8xf32>
    %62 = vector.multi_reduction <add>, %61, %cst_41 [1] : vector<8x8xf32> to vector<8xf32>
    %63 = vector.shape_cast %62 : vector<8xf32> to vector<8x1xf32>
    %64 = arith.truncf %61 : vector<8x8xf32> to vector<8x8xbf16>
    %cst_42 = arith.constant dense<0.000000e+00> : vector<8x8xf32>
    %65 = tpu.matmul %64, %54, %cst_42 {dimension_numbers = #tpu.dot_dimension_numbers<[1], [0], [0], [1], [0, 0, 1, 1], [], []>} : vector<8x8xbf16>, vector<8x8xbf16>, vector<8x8xf32> -> vector<8x8xf32>
    %66 = tpu.reciprocal %63 {approx = true} : vector<8x1xf32> -> vector<8x1xf32>
    %67 = vector.broadcast %66 : vector<8x1xf32> to vector<8x8xf32>
    %68 = arith.mulf %65, %67 : vector<8x8xf32>
    %69 = arith.truncf %68 : vector<8x8xf32> to vector<8x8xbf16>
    %c8 = arith.constant 8 : index
    %c0_43 = arith.constant 0 : index
    %70 = vector.load %arg9[%c8, %c0_43] : memref<32x32xbf16, #tpu.memory_space<vmem>>, vector<8x32xbf16>
    %cst_44 = arith.constant dense<0.000000e+00> : vector<8x32xf32>
    %71 = tpu.matmul %69, %70, %cst_44 {dimension_numbers = #tpu.dot_dimension_numbers<[1], [0], [0], [1], [0, 0, 1, 1], [], []>} : vector<8x8xbf16>, vector<8x32xbf16>, vector<8x32xf32> -> vector<8x32xf32>
    %72 = arith.addf %51, %71 : vector<8x32xf32>
    %c0_45 = arith.constant 0 : index
    %c16 = arith.constant 16 : index
    %73 = vector.load %arg3[%c0_45, %c16] : memref<32x32xbf16, #tpu.memory_space<vmem>>, vector<32x16xbf16>
    %cst_46 = arith.constant dense<0.000000e+00> : vector<8x16xf32>
    %74 = tpu.matmul %11, %73, %cst_46 {dimension_numbers = #tpu.dot_dimension_numbers<[1], [0], [0], [1], [0, 0, 1, 1], [], []>} : vector<8x32xbf16>, vector<32x16xbf16>, vector<8x16xf32> -> vector<8x16xf32>
    %c0_47 = arith.constant 0 : index
    %c16_48 = arith.constant 16 : index
    %75 = vector.load %arg4[%c0_47, %c16_48] : memref<1x32xf32, #tpu.memory_space<vmem>>, vector<1x16xf32>
    %76 = vector.broadcast %75 : vector<1x16xf32> to vector<8x16xf32>
    %77 = arith.addf %74, %76 : vector<8x16xf32>
    %78 = arith.truncf %77 : vector<8x16xf32> to vector<8x16xbf16>
    %c0_49 = arith.constant 0 : index
    %c16_50 = arith.constant 16 : index
    %79 = vector.load %arg5[%c0_49, %c16_50] : memref<32x32xbf16, #tpu.memory_space<vmem>>, vector<32x16xbf16>
    %cst_51 = arith.constant dense<0.000000e+00> : vector<8x16xf32>
    %80 = tpu.matmul %11, %79, %cst_51 {dimension_numbers = #tpu.dot_dimension_numbers<[1], [0], [0], [1], [0, 0, 1, 1], [], []>} : vector<8x32xbf16>, vector<32x16xbf16>, vector<8x16xf32> -> vector<8x16xf32>
    %c0_52 = arith.constant 0 : index
    %c16_53 = arith.constant 16 : index
    %81 = vector.load %arg6[%c0_52, %c16_53] : memref<1x32xf32, #tpu.memory_space<vmem>>, vector<1x16xf32>
    %82 = vector.broadcast %81 : vector<1x16xf32> to vector<8x16xf32>
    %83 = arith.addf %80, %82 : vector<8x16xf32>
    %84 = arith.truncf %83 : vector<8x16xf32> to vector<8x16xbf16>
    %c0_54 = arith.constant 0 : index
    %c16_55 = arith.constant 16 : index
    %85 = vector.load %arg7[%c0_54, %c16_55] : memref<32x32xbf16, #tpu.memory_space<vmem>>, vector<32x16xbf16>
    %cst_56 = arith.constant dense<0.000000e+00> : vector<8x16xf32>
    %86 = tpu.matmul %11, %85, %cst_56 {dimension_numbers = #tpu.dot_dimension_numbers<[1], [0], [0], [1], [0, 0, 1, 1], [], []>} : vector<8x32xbf16>, vector<32x16xbf16>, vector<8x16xf32> -> vector<8x16xf32>
    %c0_57 = arith.constant 0 : index
    %c16_58 = arith.constant 16 : index
    %87 = vector.load %arg8[%c0_57, %c16_58] : memref<1x32xf32, #tpu.memory_space<vmem>>, vector<1x16xf32>
    %88 = vector.broadcast %87 : vector<1x16xf32> to vector<8x16xf32>
    %89 = arith.addf %86, %88 : vector<8x16xf32>
    %90 = arith.truncf %89 : vector<8x16xf32> to vector<8x16xbf16>
    %91 = vector.extract_strided_slice %78 {offsets = [0, 0], sizes = [8, 8], strides = [1, 1]} : vector<8x16xbf16> to vector<8x8xbf16>
    %92 = vector.extract_strided_slice %84 {offsets = [0, 0], sizes = [8, 8], strides = [1, 1]} : vector<8x16xbf16> to vector<8x8xbf16>
    %93 = vector.extract_strided_slice %90 {offsets = [0, 0], sizes = [8, 8], strides = [1, 1]} : vector<8x16xbf16> to vector<8x8xbf16>
    %cst_59 = arith.constant dense<0.000000e+00> : vector<8x8xf32>
    %94 = tpu.matmul %91, %92, %cst_59 {dimension_numbers = #tpu.dot_dimension_numbers<[1], [1], [0], [0], [0, 0, 1, 0], [], []>} : vector<8x8xbf16>, vector<8x8xbf16>, vector<8x8xf32> -> vector<8x8xf32>
    %95 = arith.addf %94, %4 : vector<8x8xf32>
    %cst_60 = arith.constant dense<0xFF800000> : vector<8xf32>
    %96 = vector.multi_reduction <maximumf>, %95, %cst_60 [1] : vector<8x8xf32> to vector<8xf32>
    %97 = vector.shape_cast %96 : vector<8xf32> to vector<8x1xf32>
    %98 = vector.broadcast %97 : vector<8x1xf32> to vector<8x8xf32>
    %99 = arith.subf %95, %98 : vector<8x8xf32>
    %100 = math.exp %99 : vector<8x8xf32>
    %cst_61 = arith.constant dense<0.000000e+00> : vector<8xf32>
    %101 = vector.multi_reduction <add>, %100, %cst_61 [1] : vector<8x8xf32> to vector<8xf32>
    %102 = vector.shape_cast %101 : vector<8xf32> to vector<8x1xf32>
    %103 = arith.truncf %100 : vector<8x8xf32> to vector<8x8xbf16>
    %cst_62 = arith.constant dense<0.000000e+00> : vector<8x8xf32>
    %104 = tpu.matmul %103, %93, %cst_62 {dimension_numbers = #tpu.dot_dimension_numbers<[1], [0], [0], [1], [0, 0, 1, 1], [], []>} : vector<8x8xbf16>, vector<8x8xbf16>, vector<8x8xf32> -> vector<8x8xf32>
    %105 = tpu.reciprocal %102 {approx = true} : vector<8x1xf32> -> vector<8x1xf32>
    %106 = vector.broadcast %105 : vector<8x1xf32> to vector<8x8xf32>
    %107 = arith.mulf %104, %106 : vector<8x8xf32>
    %108 = arith.truncf %107 : vector<8x8xf32> to vector<8x8xbf16>
    %c16_63 = arith.constant 16 : index
    %c0_64 = arith.constant 0 : index
    %109 = vector.load %arg9[%c16_63, %c0_64] : memref<32x32xbf16, #tpu.memory_space<vmem>>, vector<8x32xbf16>
    %cst_65 = arith.constant dense<0.000000e+00> : vector<8x32xf32>
    %110 = tpu.matmul %108, %109, %cst_65 {dimension_numbers = #tpu.dot_dimension_numbers<[1], [0], [0], [1], [0, 0, 1, 1], [], []>} : vector<8x8xbf16>, vector<8x32xbf16>, vector<8x32xf32> -> vector<8x32xf32>
    %111 = arith.addf %72, %110 : vector<8x32xf32>
    %112 = vector.extract_strided_slice %78 {offsets = [0, 8], sizes = [8, 8], strides = [1, 1]} : vector<8x16xbf16> to vector<8x8xbf16>
    %113 = vector.extract_strided_slice %84 {offsets = [0, 8], sizes = [8, 8], strides = [1, 1]} : vector<8x16xbf16> to vector<8x8xbf16>
    %114 = vector.extract_strided_slice %90 {offsets = [0, 8], sizes = [8, 8], strides = [1, 1]} : vector<8x16xbf16> to vector<8x8xbf16>
    %cst_66 = arith.constant dense<0.000000e+00> : vector<8x8xf32>
    %115 = tpu.matmul %112, %113, %cst_66 {dimension_numbers = #tpu.dot_dimension_numbers<[1], [1], [0], [0], [0, 0, 1, 0], [], []>} : vector<8x8xbf16>, vector<8x8xbf16>, vector<8x8xf32> -> vector<8x8xf32>
    %116 = arith.addf %115, %4 : vector<8x8xf32>
    %cst_67 = arith.constant dense<0xFF800000> : vector<8xf32>
    %117 = vector.multi_reduction <maximumf>, %116, %cst_67 [1] : vector<8x8xf32> to vector<8xf32>
    %118 = vector.shape_cast %117 : vector<8xf32> to vector<8x1xf32>
    %119 = vector.broadcast %118 : vector<8x1xf32> to vector<8x8xf32>
    %120 = arith.subf %116, %119 : vector<8x8xf32>
    %121 = math.exp %120 : vector<8x8xf32>
    %cst_68 = arith.constant dense<0.000000e+00> : vector<8xf32>
    %122 = vector.multi_reduction <add>, %121, %cst_68 [1] : vector<8x8xf32> to vector<8xf32>
    %123 = vector.shape_cast %122 : vector<8xf32> to vector<8x1xf32>
    %124 = arith.truncf %121 : vector<8x8xf32> to vector<8x8xbf16>
    %cst_69 = arith.constant dense<0.000000e+00> : vector<8x8xf32>
    %125 = tpu.matmul %124, %114, %cst_69 {dimension_numbers = #tpu.dot_dimension_numbers<[1], [0], [0], [1], [0, 0, 1, 1], [], []>} : vector<8x8xbf16>, vector<8x8xbf16>, vector<8x8xf32> -> vector<8x8xf32>
    %126 = tpu.reciprocal %123 {approx = true} : vector<8x1xf32> -> vector<8x1xf32>
    %127 = vector.broadcast %126 : vector<8x1xf32> to vector<8x8xf32>
    %128 = arith.mulf %125, %127 : vector<8x8xf32>
    %129 = arith.truncf %128 : vector<8x8xf32> to vector<8x8xbf16>
    %c24 = arith.constant 24 : index
    %c0_70 = arith.constant 0 : index
    %130 = vector.load %arg9[%c24, %c0_70] : memref<32x32xbf16, #tpu.memory_space<vmem>>, vector<8x32xbf16>
    %cst_71 = arith.constant dense<0.000000e+00> : vector<8x32xf32>
    %131 = tpu.matmul %129, %130, %cst_71 {dimension_numbers = #tpu.dot_dimension_numbers<[1], [0], [0], [1], [0, 0, 1, 1], [], []>} : vector<8x8xbf16>, vector<8x32xbf16>, vector<8x32xf32> -> vector<8x32xf32>
    %132 = arith.addf %111, %131 : vector<8x32xf32>
    %133 = arith.addf %1, %132 : vector<8x32xf32>
    %134 = vector.broadcast %5 : vector<1x32xf32> to vector<8x32xf32>
    %135 = arith.addf %133, %134 : vector<8x32xf32>
    %cst_72 = arith.constant dense<0.000000e+00> : vector<8xf32>
    %136 = vector.multi_reduction <add>, %135, %cst_72 [1] : vector<8x32xf32> to vector<8xf32>
    %137 = vector.shape_cast %136 : vector<8xf32> to vector<8x1xf32>
    %cst_73 = arith.constant 3.200000e+01 : f32
    %138 = vector.broadcast %cst_73 : f32 to vector<8x1xf32>
    %139 = arith.divf %137, %138 : vector<8x1xf32>
    %140 = vector.broadcast %139 : vector<8x1xf32> to vector<8x32xf32>
    %141 = arith.subf %135, %140 : vector<8x32xf32>
    %142 = arith.mulf %141, %141 : vector<8x32xf32>
    %cst_74 = arith.constant dense<0.000000e+00> : vector<8xf32>
    %143 = vector.multi_reduction <add>, %142, %cst_74 [1] : vector<8x32xf32> to vector<8xf32>
    %144 = vector.shape_cast %143 : vector<8xf32> to vector<8x1xf32>
    %cst_75 = arith.constant 3.200000e+01 : f32
    %145 = vector.broadcast %cst_75 : f32 to vector<8x1xf32>
    %146 = arith.divf %144, %145 : vector<8x1xf32>
    %147 = vector.broadcast %139 : vector<8x1xf32> to vector<8x32xf32>
    %148 = arith.subf %135, %147 : vector<8x32xf32>
    %cst_76 = arith.constant 9.99999974E-6 : f32
    %149 = vector.broadcast %cst_76 : f32 to vector<8x1xf32>
    %150 = arith.addf %146, %149 : vector<8x1xf32>
    %151 = math.rsqrt %150 : vector<8x1xf32>
    %152 = vector.broadcast %151 : vector<8x1xf32> to vector<8x32xf32>
    %153 = arith.mulf %148, %152 : vector<8x32xf32>
    %154 = vector.broadcast %7 : vector<1x32xf32> to vector<8x32xf32>
    %155 = arith.mulf %153, %154 : vector<8x32xf32>
    %156 = vector.broadcast %8 : vector<1x32xf32> to vector<8x32xf32>
    %157 = arith.addf %155, %156 : vector<8x32xf32>
    %158 = arith.truncf %157 : vector<8x32xf32> to vector<8x32xbf16>
    %cst_77 = arith.constant 0.000000e+00 : f32
    %159 = vector.broadcast %cst_77 : f32 to vector<8x32xf32>
    %c0_78 = arith.constant 0 : index
    %c0_79 = arith.constant 0 : index
    %160 = vector.load %arg13[%c0_78, %c0_79] : memref<32x64xbf16, #tpu.memory_space<vmem>>, vector<32x32xbf16>
    %cst_80 = arith.constant dense<0.000000e+00> : vector<8x32xf32>
    %161 = tpu.matmul %158, %160, %cst_80 {dimension_numbers = #tpu.dot_dimension_numbers<[1], [0], [0], [1], [0, 0, 1, 1], [], []>} : vector<8x32xbf16>, vector<32x32xbf16>, vector<8x32xf32> -> vector<8x32xf32>
    %c0_81 = arith.constant 0 : index
    %c0_82 = arith.constant 0 : index
    %162 = vector.load %arg14[%c0_81, %c0_82] : memref<1x64xf32, #tpu.memory_space<vmem>>, vector<1x32xf32>
    %163 = vector.broadcast %162 : vector<1x32xf32> to vector<8x32xf32>
    %164 = arith.addf %161, %163 : vector<8x32xf32>
    %cst_83 = arith.constant 0.000000e+00 : f32
    %165 = vector.broadcast %cst_83 : f32 to vector<8x32xf32>
    %166 = arith.maximumf %164, %165 : vector<8x32xf32>
    %167 = arith.truncf %166 : vector<8x32xf32> to vector<8x32xbf16>
    %c0_84 = arith.constant 0 : index
    %c0_85 = arith.constant 0 : index
    %168 = vector.load %arg15[%c0_84, %c0_85] : memref<64x32xbf16, #tpu.memory_space<vmem>>, vector<32x32xbf16>
    %cst_86 = arith.constant dense<0.000000e+00> : vector<8x32xf32>
    %169 = tpu.matmul %167, %168, %cst_86 {dimension_numbers = #tpu.dot_dimension_numbers<[1], [0], [0], [1], [0, 0, 1, 1], [], []>} : vector<8x32xbf16>, vector<32x32xbf16>, vector<8x32xf32> -> vector<8x32xf32>
    %170 = arith.addf %159, %169 : vector<8x32xf32>
    %c0_87 = arith.constant 0 : index
    %c32 = arith.constant 32 : index
    %171 = vector.load %arg13[%c0_87, %c32] : memref<32x64xbf16, #tpu.memory_space<vmem>>, vector<32x32xbf16>
    %cst_88 = arith.constant dense<0.000000e+00> : vector<8x32xf32>
    %172 = tpu.matmul %158, %171, %cst_88 {dimension_numbers = #tpu.dot_dimension_numbers<[1], [0], [0], [1], [0, 0, 1, 1], [], []>} : vector<8x32xbf16>, vector<32x32xbf16>, vector<8x32xf32> -> vector<8x32xf32>
    %c0_89 = arith.constant 0 : index
    %c32_90 = arith.constant 32 : index
    %173 = vector.load %arg14[%c0_89, %c32_90] : memref<1x64xf32, #tpu.memory_space<vmem>>, vector<1x32xf32>
    %174 = vector.broadcast %173 : vector<1x32xf32> to vector<8x32xf32>
    %175 = arith.addf %172, %174 : vector<8x32xf32>
    %cst_91 = arith.constant 0.000000e+00 : f32
    %176 = vector.broadcast %cst_91 : f32 to vector<8x32xf32>
    %177 = arith.maximumf %175, %176 : vector<8x32xf32>
    %178 = arith.truncf %177 : vector<8x32xf32> to vector<8x32xbf16>
    %c32_92 = arith.constant 32 : index
    %c0_93 = arith.constant 0 : index
    %179 = vector.load %arg15[%c32_92, %c0_93] : memref<64x32xbf16, #tpu.memory_space<vmem>>, vector<32x32xbf16>
    %cst_94 = arith.constant dense<0.000000e+00> : vector<8x32xf32>
    %180 = tpu.matmul %178, %179, %cst_94 {dimension_numbers = #tpu.dot_dimension_numbers<[1], [0], [0], [1], [0, 0, 1, 1], [], []>} : vector<8x32xbf16>, vector<32x32xbf16>, vector<8x32xf32> -> vector<8x32xf32>
    %181 = arith.addf %170, %180 : vector<8x32xf32>
    %182 = arith.addf %157, %181 : vector<8x32xf32>
    %183 = vector.broadcast %6 : vector<1x32xf32> to vector<8x32xf32>
    %184 = arith.addf %182, %183 : vector<8x32xf32>
    %cst_95 = arith.constant dense<0.000000e+00> : vector<8xf32>
    %185 = vector.multi_reduction <add>, %184, %cst_95 [1] : vector<8x32xf32> to vector<8xf32>
    %186 = vector.shape_cast %185 : vector<8xf32> to vector<8x1xf32>
    %cst_96 = arith.constant 3.200000e+01 : f32
    %187 = vector.broadcast %cst_96 : f32 to vector<8x1xf32>
    %188 = arith.divf %186, %187 : vector<8x1xf32>
    %189 = vector.broadcast %188 : vector<8x1xf32> to vector<8x32xf32>
    %190 = arith.subf %184, %189 : vector<8x32xf32>
    %191 = arith.mulf %190, %190 : vector<8x32xf32>
    %cst_97 = arith.constant dense<0.000000e+00> : vector<8xf32>
    %192 = vector.multi_reduction <add>, %191, %cst_97 [1] : vector<8x32xf32> to vector<8xf32>
    %193 = vector.shape_cast %192 : vector<8xf32> to vector<8x1xf32>
    %cst_98 = arith.constant 3.200000e+01 : f32
    %194 = vector.broadcast %cst_98 : f32 to vector<8x1xf32>
    %195 = arith.divf %193, %194 : vector<8x1xf32>
    %196 = vector.broadcast %188 : vector<8x1xf32> to vector<8x32xf32>
    %197 = arith.subf %184, %196 : vector<8x32xf32>
    %cst_99 = arith.constant 9.99999974E-6 : f32
    %198 = vector.broadcast %cst_99 : f32 to vector<8x1xf32>
    %199 = arith.addf %195, %198 : vector<8x1xf32>
    %200 = math.rsqrt %199 : vector<8x1xf32>
    %201 = vector.broadcast %200 : vector<8x1xf32> to vector<8x32xf32>
    %202 = arith.mulf %197, %201 : vector<8x32xf32>
    %203 = vector.broadcast %9 : vector<1x32xf32> to vector<8x32xf32>
    %204 = arith.mulf %202, %203 : vector<8x32xf32>
    %205 = vector.broadcast %10 : vector<1x32xf32> to vector<8x32xf32>
    %206 = arith.addf %204, %205 : vector<8x32xf32>
    %c1_i32 = arith.constant 1 : i32
    %207 = arith.truncf %206 : vector<8x32xf32> to vector<8x32xbf16>
    %cst_100 = arith.constant 0.000000e+00 : f32
    %208 = vector.broadcast %cst_100 : f32 to vector<8x32xf32>
    %c0_101 = arith.constant 0 : index
    %c0_102 = arith.constant 0 : index
    %209 = vector.load %arg3[%c0_101, %c0_102] : memref<32x32xbf16, #tpu.memory_space<vmem>>, vector<32x16xbf16>
    %cst_103 = arith.constant dense<0.000000e+00> : vector<8x16xf32>
    %210 = tpu.matmul %207, %209, %cst_103 {dimension_numbers = #tpu.dot_dimension_numbers<[1], [0], [0], [1], [0, 0, 1, 1], [], []>} : vector<8x32xbf16>, vector<32x16xbf16>, vector<8x16xf32> -> vector<8x16xf32>
    %c0_104 = arith.constant 0 : index
    %c0_105 = arith.constant 0 : index
    %211 = vector.load %arg4[%c0_104, %c0_105] : memref<1x32xf32, #tpu.memory_space<vmem>>, vector<1x16xf32>
    %212 = vector.broadcast %211 : vector<1x16xf32> to vector<8x16xf32>
    %213 = arith.addf %210, %212 : vector<8x16xf32>
    %214 = arith.truncf %213 : vector<8x16xf32> to vector<8x16xbf16>
    %c0_106 = arith.constant 0 : index
    %c0_107 = arith.constant 0 : index
    %215 = vector.load %arg5[%c0_106, %c0_107] : memref<32x32xbf16, #tpu.memory_space<vmem>>, vector<32x16xbf16>
    %cst_108 = arith.constant dense<0.000000e+00> : vector<8x16xf32>
    %216 = tpu.matmul %207, %215, %cst_108 {dimension_numbers = #tpu.dot_dimension_numbers<[1], [0], [0], [1], [0, 0, 1, 1], [], []>} : vector<8x32xbf16>, vector<32x16xbf16>, vector<8x16xf32> -> vector<8x16xf32>
    %c0_109 = arith.constant 0 : index
    %c0_110 = arith.constant 0 : index
    %217 = vector.load %arg6[%c0_109, %c0_110] : memref<1x32xf32, #tpu.memory_space<vmem>>, vector<1x16xf32>
    %218 = vector.broadcast %217 : vector<1x16xf32> to vector<8x16xf32>
    %219 = arith.addf %216, %218 : vector<8x16xf32>
    %220 = arith.truncf %219 : vector<8x16xf32> to vector<8x16xbf16>
    %c0_111 = arith.constant 0 : index
    %c0_112 = arith.constant 0 : index
    %221 = vector.load %arg7[%c0_111, %c0_112] : memref<32x32xbf16, #tpu.memory_space<vmem>>, vector<32x16xbf16>
    %cst_113 = arith.constant dense<0.000000e+00> : vector<8x16xf32>
    %222 = tpu.matmul %207, %221, %cst_113 {dimension_numbers = #tpu.dot_dimension_numbers<[1], [0], [0], [1], [0, 0, 1, 1], [], []>} : vector<8x32xbf16>, vector<32x16xbf16>, vector<8x16xf32> -> vector<8x16xf32>
    %c0_114 = arith.constant 0 : index
    %c0_115 = arith.constant 0 : index
    %223 = vector.load %arg8[%c0_114, %c0_115] : memref<1x32xf32, #tpu.memory_space<vmem>>, vector<1x16xf32>
    %224 = vector.broadcast %223 : vector<1x16xf32> to vector<8x16xf32>
    %225 = arith.addf %222, %224 : vector<8x16xf32>
    %226 = arith.truncf %225 : vector<8x16xf32> to vector<8x16xbf16>
    %227 = vector.extract_strided_slice %214 {offsets = [0, 0], sizes = [8, 8], strides = [1, 1]} : vector<8x16xbf16> to vector<8x8xbf16>
    %228 = vector.extract_strided_slice %220 {offsets = [0, 0], sizes = [8, 8], strides = [1, 1]} : vector<8x16xbf16> to vector<8x8xbf16>
    %229 = vector.extract_strided_slice %226 {offsets = [0, 0], sizes = [8, 8], strides = [1, 1]} : vector<8x16xbf16> to vector<8x8xbf16>
    %cst_116 = arith.constant dense<0.000000e+00> : vector<8x8xf32>
    %230 = tpu.matmul %227, %228, %cst_116 {dimension_numbers = #tpu.dot_dimension_numbers<[1], [1], [0], [0], [0, 0, 1, 0], [], []>} : vector<8x8xbf16>, vector<8x8xbf16>, vector<8x8xf32> -> vector<8x8xf32>
    %231 = arith.addf %230, %4 : vector<8x8xf32>
    %cst_117 = arith.constant dense<0xFF800000> : vector<8xf32>
    %232 = vector.multi_reduction <maximumf>, %231, %cst_117 [1] : vector<8x8xf32> to vector<8xf32>
    %233 = vector.shape_cast %232 : vector<8xf32> to vector<8x1xf32>
    %234 = vector.broadcast %233 : vector<8x1xf32> to vector<8x8xf32>
    %235 = arith.subf %231, %234 : vector<8x8xf32>
    %236 = math.exp %235 : vector<8x8xf32>
    %cst_118 = arith.constant dense<0.000000e+00> : vector<8xf32>
    %237 = vector.multi_reduction <add>, %236, %cst_118 [1] : vector<8x8xf32> to vector<8xf32>
    %238 = vector.shape_cast %237 : vector<8xf32> to vector<8x1xf32>
    %239 = arith.truncf %236 : vector<8x8xf32> to vector<8x8xbf16>
    %cst_119 = arith.constant dense<0.000000e+00> : vector<8x8xf32>
    %240 = tpu.matmul %239, %229, %cst_119 {dimension_numbers = #tpu.dot_dimension_numbers<[1], [0], [0], [1], [0, 0, 1, 1], [], []>} : vector<8x8xbf16>, vector<8x8xbf16>, vector<8x8xf32> -> vector<8x8xf32>
    %241 = tpu.reciprocal %238 {approx = true} : vector<8x1xf32> -> vector<8x1xf32>
    %242 = vector.broadcast %241 : vector<8x1xf32> to vector<8x8xf32>
    %243 = arith.mulf %240, %242 : vector<8x8xf32>
    %244 = arith.truncf %243 : vector<8x8xf32> to vector<8x8xbf16>
    %c0_120 = arith.constant 0 : index
    %c0_121 = arith.constant 0 : index
    %245 = vector.load %arg9[%c0_120, %c0_121] : memref<32x32xbf16, #tpu.memory_space<vmem>>, vector<8x32xbf16>
    %cst_122 = arith.constant dense<0.000000e+00> : vector<8x32xf32>
    %246 = tpu.matmul %244, %245, %cst_122 {dimension_numbers = #tpu.dot_dimension_numbers<[1], [0], [0], [1], [0, 0, 1, 1], [], []>} : vector<8x8xbf16>, vector<8x32xbf16>, vector<8x32xf32> -> vector<8x32xf32>
    %247 = arith.addf %208, %246 : vector<8x32xf32>
    %248 = vector.extract_strided_slice %214 {offsets = [0, 8], sizes = [8, 8], strides = [1, 1]} : vector<8x16xbf16> to vector<8x8xbf16>
    %249 = vector.extract_strided_slice %220 {offsets = [0, 8], sizes = [8, 8], strides = [1, 1]} : vector<8x16xbf16> to vector<8x8xbf16>
    %250 = vector.extract_strided_slice %226 {offsets = [0, 8], sizes = [8, 8], strides = [1, 1]} : vector<8x16xbf16> to vector<8x8xbf16>
    %cst_123 = arith.constant dense<0.000000e+00> : vector<8x8xf32>
    %251 = tpu.matmul %248, %249, %cst_123 {dimension_numbers = #tpu.dot_dimension_numbers<[1], [1], [0], [0], [0, 0, 1, 0], [], []>} : vector<8x8xbf16>, vector<8x8xbf16>, vector<8x8xf32> -> vector<8x8xf32>
    %252 = arith.addf %251, %4 : vector<8x8xf32>
    %cst_124 = arith.constant dense<0xFF800000> : vector<8xf32>
    %253 = vector.multi_reduction <maximumf>, %252, %cst_124 [1] : vector<8x8xf32> to vector<8xf32>
    %254 = vector.shape_cast %253 : vector<8xf32> to vector<8x1xf32>
    %255 = vector.broadcast %254 : vector<8x1xf32> to vector<8x8xf32>
    %256 = arith.subf %252, %255 : vector<8x8xf32>
    %257 = math.exp %256 : vector<8x8xf32>
    %cst_125 = arith.constant dense<0.000000e+00> : vector<8xf32>
    %258 = vector.multi_reduction <add>, %257, %cst_125 [1] : vector<8x8xf32> to vector<8xf32>
    %259 = vector.shape_cast %258 : vector<8xf32> to vector<8x1xf32>
    %260 = arith.truncf %257 : vector<8x8xf32> to vector<8x8xbf16>
    %cst_126 = arith.constant dense<0.000000e+00> : vector<8x8xf32>
    %261 = tpu.matmul %260, %250, %cst_126 {dimension_numbers = #tpu.dot_dimension_numbers<[1], [0], [0], [1], [0, 0, 1, 1], [], []>} : vector<8x8xbf16>, vector<8x8xbf16>, vector<8x8xf32> -> vector<8x8xf32>
    %262 = tpu.reciprocal %259 {approx = true} : vector<8x1xf32> -> vector<8x1xf32>
    %263 = vector.broadcast %262 : vector<8x1xf32> to vector<8x8xf32>
    %264 = arith.mulf %261, %263 : vector<8x8xf32>
    %265 = arith.truncf %264 : vector<8x8xf32> to vector<8x8xbf16>
    %c8_127 = arith.constant 8 : index
    %c0_128 = arith.constant 0 : index
    %266 = vector.load %arg9[%c8_127, %c0_128] : memref<32x32xbf16, #tpu.memory_space<vmem>>, vector<8x32xbf16>
    %cst_129 = arith.constant dense<0.000000e+00> : vector<8x32xf32>
    %267 = tpu.matmul %265, %266, %cst_129 {dimension_numbers = #tpu.dot_dimension_numbers<[1], [0], [0], [1], [0, 0, 1, 1], [], []>} : vector<8x8xbf16>, vector<8x32xbf16>, vector<8x32xf32> -> vector<8x32xf32>
    %268 = arith.addf %247, %267 : vector<8x32xf32>
    %c0_130 = arith.constant 0 : index
    %c16_131 = arith.constant 16 : index
    %269 = vector.load %arg3[%c0_130, %c16_131] : memref<32x32xbf16, #tpu.memory_space<vmem>>, vector<32x16xbf16>
    %cst_132 = arith.constant dense<0.000000e+00> : vector<8x16xf32>
    %270 = tpu.matmul %207, %269, %cst_132 {dimension_numbers = #tpu.dot_dimension_numbers<[1], [0], [0], [1], [0, 0, 1, 1], [], []>} : vector<8x32xbf16>, vector<32x16xbf16>, vector<8x16xf32> -> vector<8x16xf32>
    %c0_133 = arith.constant 0 : index
    %c16_134 = arith.constant 16 : index
    %271 = vector.load %arg4[%c0_133, %c16_134] : memref<1x32xf32, #tpu.memory_space<vmem>>, vector<1x16xf32>
    %272 = vector.broadcast %271 : vector<1x16xf32> to vector<8x16xf32>
    %273 = arith.addf %270, %272 : vector<8x16xf32>
    %274 = arith.truncf %273 : vector<8x16xf32> to vector<8x16xbf16>
    %c0_135 = arith.constant 0 : index
    %c16_136 = arith.constant 16 : index
    %275 = vector.load %arg5[%c0_135, %c16_136] : memref<32x32xbf16, #tpu.memory_space<vmem>>, vector<32x16xbf16>
    %cst_137 = arith.constant dense<0.000000e+00> : vector<8x16xf32>
    %276 = tpu.matmul %207, %275, %cst_137 {dimension_numbers = #tpu.dot_dimension_numbers<[1], [0], [0], [1], [0, 0, 1, 1], [], []>} : vector<8x32xbf16>, vector<32x16xbf16>, vector<8x16xf32> -> vector<8x16xf32>
    %c0_138 = arith.constant 0 : index
    %c16_139 = arith.constant 16 : index
    %277 = vector.load %arg6[%c0_138, %c16_139] : memref<1x32xf32, #tpu.memory_space<vmem>>, vector<1x16xf32>
    %278 = vector.broadcast %277 : vector<1x16xf32> to vector<8x16xf32>
    %279 = arith.addf %276, %278 : vector<8x16xf32>
    %280 = arith.truncf %279 : vector<8x16xf32> to vector<8x16xbf16>
    %c0_140 = arith.constant 0 : index
    %c16_141 = arith.constant 16 : index
    %281 = vector.load %arg7[%c0_140, %c16_141] : memref<32x32xbf16, #tpu.memory_space<vmem>>, vector<32x16xbf16>
    %cst_142 = arith.constant dense<0.000000e+00> : vector<8x16xf32>
    %282 = tpu.matmul %207, %281, %cst_142 {dimension_numbers = #tpu.dot_dimension_numbers<[1], [0], [0], [1], [0, 0, 1, 1], [], []>} : vector<8x32xbf16>, vector<32x16xbf16>, vector<8x16xf32> -> vector<8x16xf32>
    %c0_143 = arith.constant 0 : index
    %c16_144 = arith.constant 16 : index
    %283 = vector.load %arg8[%c0_143, %c16_144] : memref<1x32xf32, #tpu.memory_space<vmem>>, vector<1x16xf32>
    %284 = vector.broadcast %283 : vector<1x16xf32> to vector<8x16xf32>
    %285 = arith.addf %282, %284 : vector<8x16xf32>
    %286 = arith.truncf %285 : vector<8x16xf32> to vector<8x16xbf16>
    %287 = vector.extract_strided_slice %274 {offsets = [0, 0], sizes = [8, 8], strides = [1, 1]} : vector<8x16xbf16> to vector<8x8xbf16>
    %288 = vector.extract_strided_slice %280 {offsets = [0, 0], sizes = [8, 8], strides = [1, 1]} : vector<8x16xbf16> to vector<8x8xbf16>
    %289 = vector.extract_strided_slice %286 {offsets = [0, 0], sizes = [8, 8], strides = [1, 1]} : vector<8x16xbf16> to vector<8x8xbf16>
    %cst_145 = arith.constant dense<0.000000e+00> : vector<8x8xf32>
    %290 = tpu.matmul %287, %288, %cst_145 {dimension_numbers = #tpu.dot_dimension_numbers<[1], [1], [0], [0], [0, 0, 1, 0], [], []>} : vector<8x8xbf16>, vector<8x8xbf16>, vector<8x8xf32> -> vector<8x8xf32>
    %291 = arith.addf %290, %4 : vector<8x8xf32>
    %cst_146 = arith.constant dense<0xFF800000> : vector<8xf32>
    %292 = vector.multi_reduction <maximumf>, %291, %cst_146 [1] : vector<8x8xf32> to vector<8xf32>
    %293 = vector.shape_cast %292 : vector<8xf32> to vector<8x1xf32>
    %294 = vector.broadcast %293 : vector<8x1xf32> to vector<8x8xf32>
    %295 = arith.subf %291, %294 : vector<8x8xf32>
    %296 = math.exp %295 : vector<8x8xf32>
    %cst_147 = arith.constant dense<0.000000e+00> : vector<8xf32>
    %297 = vector.multi_reduction <add>, %296, %cst_147 [1] : vector<8x8xf32> to vector<8xf32>
    %298 = vector.shape_cast %297 : vector<8xf32> to vector<8x1xf32>
    %299 = arith.truncf %296 : vector<8x8xf32> to vector<8x8xbf16>
    %cst_148 = arith.constant dense<0.000000e+00> : vector<8x8xf32>
    %300 = tpu.matmul %299, %289, %cst_148 {dimension_numbers = #tpu.dot_dimension_numbers<[1], [0], [0], [1], [0, 0, 1, 1], [], []>} : vector<8x8xbf16>, vector<8x8xbf16>, vector<8x8xf32> -> vector<8x8xf32>
    %301 = tpu.reciprocal %298 {approx = true} : vector<8x1xf32> -> vector<8x1xf32>
    %302 = vector.broadcast %301 : vector<8x1xf32> to vector<8x8xf32>
    %303 = arith.mulf %300, %302 : vector<8x8xf32>
    %304 = arith.truncf %303 : vector<8x8xf32> to vector<8x8xbf16>
    %c16_149 = arith.constant 16 : index
    %c0_150 = arith.constant 0 : index
    %305 = vector.load %arg9[%c16_149, %c0_150] : memref<32x32xbf16, #tpu.memory_space<vmem>>, vector<8x32xbf16>
    %cst_151 = arith.constant dense<0.000000e+00> : vector<8x32xf32>
    %306 = tpu.matmul %304, %305, %cst_151 {dimension_numbers = #tpu.dot_dimension_numbers<[1], [0], [0], [1], [0, 0, 1, 1], [], []>} : vector<8x8xbf16>, vector<8x32xbf16>, vector<8x32xf32> -> vector<8x32xf32>
    %307 = arith.addf %268, %306 : vector<8x32xf32>
    %308 = vector.extract_strided_slice %274 {offsets = [0, 8], sizes = [8, 8], strides = [1, 1]} : vector<8x16xbf16> to vector<8x8xbf16>
    %309 = vector.extract_strided_slice %280 {offsets = [0, 8], sizes = [8, 8], strides = [1, 1]} : vector<8x16xbf16> to vector<8x8xbf16>
    %310 = vector.extract_strided_slice %286 {offsets = [0, 8], sizes = [8, 8], strides = [1, 1]} : vector<8x16xbf16> to vector<8x8xbf16>
    %cst_152 = arith.constant dense<0.000000e+00> : vector<8x8xf32>
    %311 = tpu.matmul %308, %309, %cst_152 {dimension_numbers = #tpu.dot_dimension_numbers<[1], [1], [0], [0], [0, 0, 1, 0], [], []>} : vector<8x8xbf16>, vector<8x8xbf16>, vector<8x8xf32> -> vector<8x8xf32>
    %312 = arith.addf %311, %4 : vector<8x8xf32>
    %cst_153 = arith.constant dense<0xFF800000> : vector<8xf32>
    %313 = vector.multi_reduction <maximumf>, %312, %cst_153 [1] : vector<8x8xf32> to vector<8xf32>
    %314 = vector.shape_cast %313 : vector<8xf32> to vector<8x1xf32>
    %315 = vector.broadcast %314 : vector<8x1xf32> to vector<8x8xf32>
    %316 = arith.subf %312, %315 : vector<8x8xf32>
    %317 = math.exp %316 : vector<8x8xf32>
    %cst_154 = arith.constant dense<0.000000e+00> : vector<8xf32>
    %318 = vector.multi_reduction <add>, %317, %cst_154 [1] : vector<8x8xf32> to vector<8xf32>
    %319 = vector.shape_cast %318 : vector<8xf32> to vector<8x1xf32>
    %320 = arith.truncf %317 : vector<8x8xf32> to vector<8x8xbf16>
    %cst_155 = arith.constant dense<0.000000e+00> : vector<8x8xf32>
    %321 = tpu.matmul %320, %310, %cst_155 {dimension_numbers = #tpu.dot_dimension_numbers<[1], [0], [0], [1], [0, 0, 1, 1], [], []>} : vector<8x8xbf16>, vector<8x8xbf16>, vector<8x8xf32> -> vector<8x8xf32>
    %322 = tpu.reciprocal %319 {approx = true} : vector<8x1xf32> -> vector<8x1xf32>
    %323 = vector.broadcast %322 : vector<8x1xf32> to vector<8x8xf32>
    %324 = arith.mulf %321, %323 : vector<8x8xf32>
    %325 = arith.truncf %324 : vector<8x8xf32> to vector<8x8xbf16>
    %c24_156 = arith.constant 24 : index
    %c0_157 = arith.constant 0 : index
    %326 = vector.load %arg9[%c24_156, %c0_157] : memref<32x32xbf16, #tpu.memory_space<vmem>>, vector<8x32xbf16>
    %cst_158 = arith.constant dense<0.000000e+00> : vector<8x32xf32>
    %327 = tpu.matmul %325, %326, %cst_158 {dimension_numbers = #tpu.dot_dimension_numbers<[1], [0], [0], [1], [0, 0, 1, 1], [], []>} : vector<8x8xbf16>, vector<8x32xbf16>, vector<8x32xf32> -> vector<8x32xf32>
    %328 = arith.addf %307, %327 : vector<8x32xf32>
    %329 = arith.addf %206, %328 : vector<8x32xf32>
    %330 = vector.broadcast %5 : vector<1x32xf32> to vector<8x32xf32>
    %331 = arith.addf %329, %330 : vector<8x32xf32>
    %cst_159 = arith.constant dense<0.000000e+00> : vector<8xf32>
    %332 = vector.multi_reduction <add>, %331, %cst_159 [1] : vector<8x32xf32> to vector<8xf32>
    %333 = vector.shape_cast %332 : vector<8xf32> to vector<8x1xf32>
    %cst_160 = arith.constant 3.200000e+01 : f32
    %334 = vector.broadcast %cst_160 : f32 to vector<8x1xf32>
    %335 = arith.divf %333, %334 : vector<8x1xf32>
    %336 = vector.broadcast %335 : vector<8x1xf32> to vector<8x32xf32>
    %337 = arith.subf %331, %336 : vector<8x32xf32>
    %338 = arith.mulf %337, %337 : vector<8x32xf32>
    %cst_161 = arith.constant dense<0.000000e+00> : vector<8xf32>
    %339 = vector.multi_reduction <add>, %338, %cst_161 [1] : vector<8x32xf32> to vector<8xf32>
    %340 = vector.shape_cast %339 : vector<8xf32> to vector<8x1xf32>
    %cst_162 = arith.constant 3.200000e+01 : f32
    %341 = vector.broadcast %cst_162 : f32 to vector<8x1xf32>
    %342 = arith.divf %340, %341 : vector<8x1xf32>
    %343 = vector.broadcast %335 : vector<8x1xf32> to vector<8x32xf32>
    %344 = arith.subf %331, %343 : vector<8x32xf32>
    %cst_163 = arith.constant 9.99999974E-6 : f32
    %345 = vector.broadcast %cst_163 : f32 to vector<8x1xf32>
    %346 = arith.addf %342, %345 : vector<8x1xf32>
    %347 = math.rsqrt %346 : vector<8x1xf32>
    %348 = vector.broadcast %347 : vector<8x1xf32> to vector<8x32xf32>
    %349 = arith.mulf %344, %348 : vector<8x32xf32>
    %350 = vector.broadcast %7 : vector<1x32xf32> to vector<8x32xf32>
    %351 = arith.mulf %349, %350 : vector<8x32xf32>
    %352 = vector.broadcast %8 : vector<1x32xf32> to vector<8x32xf32>
    %353 = arith.addf %351, %352 : vector<8x32xf32>
    %354 = arith.truncf %353 : vector<8x32xf32> to vector<8x32xbf16>
    %cst_164 = arith.constant 0.000000e+00 : f32
    %355 = vector.broadcast %cst_164 : f32 to vector<8x32xf32>
    %c0_165 = arith.constant 0 : index
    %c0_166 = arith.constant 0 : index
    %356 = vector.load %arg13[%c0_165, %c0_166] : memref<32x64xbf16, #tpu.memory_space<vmem>>, vector<32x32xbf16>
    %cst_167 = arith.constant dense<0.000000e+00> : vector<8x32xf32>
    %357 = tpu.matmul %354, %356, %cst_167 {dimension_numbers = #tpu.dot_dimension_numbers<[1], [0], [0], [1], [0, 0, 1, 1], [], []>} : vector<8x32xbf16>, vector<32x32xbf16>, vector<8x32xf32> -> vector<8x32xf32>
    %c0_168 = arith.constant 0 : index
    %c0_169 = arith.constant 0 : index
    %358 = vector.load %arg14[%c0_168, %c0_169] : memref<1x64xf32, #tpu.memory_space<vmem>>, vector<1x32xf32>
    %359 = vector.broadcast %358 : vector<1x32xf32> to vector<8x32xf32>
    %360 = arith.addf %357, %359 : vector<8x32xf32>
    %cst_170 = arith.constant 0.000000e+00 : f32
    %361 = vector.broadcast %cst_170 : f32 to vector<8x32xf32>
    %362 = arith.maximumf %360, %361 : vector<8x32xf32>
    %363 = arith.truncf %362 : vector<8x32xf32> to vector<8x32xbf16>
    %c0_171 = arith.constant 0 : index
    %c0_172 = arith.constant 0 : index
    %364 = vector.load %arg15[%c0_171, %c0_172] : memref<64x32xbf16, #tpu.memory_space<vmem>>, vector<32x32xbf16>
    %cst_173 = arith.constant dense<0.000000e+00> : vector<8x32xf32>
    %365 = tpu.matmul %363, %364, %cst_173 {dimension_numbers = #tpu.dot_dimension_numbers<[1], [0], [0], [1], [0, 0, 1, 1], [], []>} : vector<8x32xbf16>, vector<32x32xbf16>, vector<8x32xf32> -> vector<8x32xf32>
    %366 = arith.addf %355, %365 : vector<8x32xf32>
    %c0_174 = arith.constant 0 : index
    %c32_175 = arith.constant 32 : index
    %367 = vector.load %arg13[%c0_174, %c32_175] : memref<32x64xbf16, #tpu.memory_space<vmem>>, vector<32x32xbf16>
    %cst_176 = arith.constant dense<0.000000e+00> : vector<8x32xf32>
    %368 = tpu.matmul %354, %367, %cst_176 {dimension_numbers = #tpu.dot_dimension_numbers<[1], [0], [0], [1], [0, 0, 1, 1], [], []>} : vector<8x32xbf16>, vector<32x32xbf16>, vector<8x32xf32> -> vector<8x32xf32>
    %c0_177 = arith.constant 0 : index
    %c32_178 = arith.constant 32 : index
    %369 = vector.load %arg14[%c0_177, %c32_178] : memref<1x64xf32, #tpu.memory_space<vmem>>, vector<1x32xf32>
    %370 = vector.broadcast %369 : vector<1x32xf32> to vector<8x32xf32>
    %371 = arith.addf %368, %370 : vector<8x32xf32>
    %cst_179 = arith.constant 0.000000e+00 : f32
    %372 = vector.broadcast %cst_179 : f32 to vector<8x32xf32>
    %373 = arith.maximumf %371, %372 : vector<8x32xf32>
    %374 = arith.truncf %373 : vector<8x32xf32> to vector<8x32xbf16>
    %c32_180 = arith.constant 32 : index
    %c0_181 = arith.constant 0 : index
    %375 = vector.load %arg15[%c32_180, %c0_181] : memref<64x32xbf16, #tpu.memory_space<vmem>>, vector<32x32xbf16>
    %cst_182 = arith.constant dense<0.000000e+00> : vector<8x32xf32>
    %376 = tpu.matmul %374, %375, %cst_182 {dimension_numbers = #tpu.dot_dimension_numbers<[1], [0], [0], [1], [0, 0, 1, 1], [], []>} : vector<8x32xbf16>, vector<32x32xbf16>, vector<8x32xf32> -> vector<8x32xf32>
    %377 = arith.addf %366, %376 : vector<8x32xf32>
    %378 = arith.addf %353, %377 : vector<8x32xf32>
    %379 = vector.broadcast %6 : vector<1x32xf32> to vector<8x32xf32>
    %380 = arith.addf %378, %379 : vector<8x32xf32>
    %cst_183 = arith.constant dense<0.000000e+00> : vector<8xf32>
    %381 = vector.multi_reduction <add>, %380, %cst_183 [1] : vector<8x32xf32> to vector<8xf32>
    %382 = vector.shape_cast %381 : vector<8xf32> to vector<8x1xf32>
    %cst_184 = arith.constant 3.200000e+01 : f32
    %383 = vector.broadcast %cst_184 : f32 to vector<8x1xf32>
    %384 = arith.divf %382, %383 : vector<8x1xf32>
    %385 = vector.broadcast %384 : vector<8x1xf32> to vector<8x32xf32>
    %386 = arith.subf %380, %385 : vector<8x32xf32>
    %387 = arith.mulf %386, %386 : vector<8x32xf32>
    %cst_185 = arith.constant dense<0.000000e+00> : vector<8xf32>
    %388 = vector.multi_reduction <add>, %387, %cst_185 [1] : vector<8x32xf32> to vector<8xf32>
    %389 = vector.shape_cast %388 : vector<8xf32> to vector<8x1xf32>
    %cst_186 = arith.constant 3.200000e+01 : f32
    %390 = vector.broadcast %cst_186 : f32 to vector<8x1xf32>
    %391 = arith.divf %389, %390 : vector<8x1xf32>
    %392 = vector.broadcast %384 : vector<8x1xf32> to vector<8x32xf32>
    %393 = arith.subf %380, %392 : vector<8x32xf32>
    %cst_187 = arith.constant 9.99999974E-6 : f32
    %394 = vector.broadcast %cst_187 : f32 to vector<8x1xf32>
    %395 = arith.addf %391, %394 : vector<8x1xf32>
    %396 = math.rsqrt %395 : vector<8x1xf32>
    %397 = vector.broadcast %396 : vector<8x1xf32> to vector<8x32xf32>
    %398 = arith.mulf %393, %397 : vector<8x32xf32>
    %399 = vector.broadcast %9 : vector<1x32xf32> to vector<8x32xf32>
    %400 = arith.mulf %398, %399 : vector<8x32xf32>
    %401 = vector.broadcast %10 : vector<1x32xf32> to vector<8x32xf32>
    %402 = arith.addf %400, %401 : vector<8x32xf32>
    %c0_188 = arith.constant 0 : index
    %c0_189 = arith.constant 0 : index
    %c0_190 = arith.constant 0 : index
    %403 = vector.load %arg19[%c0_188, %c0_189, %c0_190] : memref<1x8x32xf32, #tpu.memory_space<vmem>>, vector<1x8x32xf32>
    %404 = vector.shape_cast %403 : vector<1x8x32xf32> to vector<8x32xf32>
    %405 = vector.shape_cast %402 : vector<8x32xf32> to vector<1x8x32xf32>
    tpu.vector_store %arg19[%c0_188, %c0_189, %c0_190], %405 {strides = array<i32>} : memref<1x8x32xf32, #tpu.memory_space<vmem>>, vector<1x8x32xf32>,
    return
  }
  func.func @transform_0(%arg0: i32) -> (i32, i32, i32) {
    %c0_i32 = arith.constant 0 : i32
    %c0_i32_0 = arith.constant 0 : i32
    %c0_i32_1 = arith.constant 0 : i32
    return %arg0, %c0_i32, %c0_i32_0 : i32, i32, i32
  }
  func.func @transform_1(%arg0: i32) -> (i32, i32, i32) {
    %c0_i32 = arith.constant 0 : i32
    %c0_i32_0 = arith.constant 0 : i32
    %c0_i32_1 = arith.constant 0 : i32
    return %arg0, %c0_i32, %c0_i32_0 : i32, i32, i32
  }
  func.func @transform_2(%arg0: i32) -> (i32, i32) {
    %c0_i32 = arith.constant 0 : i32
    %c0_i32_0 = arith.constant 0 : i32
    %c0_i32_1 = arith.constant 0 : i32
    return %c0_i32, %c0_i32_0 : i32, i32
  }
  func.func @transform_3(%arg0: i32) -> (i32, i32) {
    %c0_i32 = arith.constant 0 : i32
    %c0_i32_0 = arith.constant 0 : i32
    %c0_i32_1 = arith.constant 0 : i32
    return %c0_i32, %c0_i32_0 : i32, i32
  }
  func.func @transform_4(%arg0: i32) -> (i32, i32) {
    %c0_i32 = arith.constant 0 : i32
    %c0_i32_0 = arith.constant 0 : i32
    %c0_i32_1 = arith.constant 0 : i32
    return %c0_i32, %c0_i32_0 : i32, i32
  }
  func.func @transform_5(%arg0: i32) -> (i32, i32) {
    %c0_i32 = arith.constant 0 : i32
    %c0_i32_0 = arith.constant 0 : i32
    %c0_i32_1 = arith.constant 0 : i32
    return %c0_i32, %c0_i32_0 : i32, i32
  }
  func.func @transform_6(%arg0: i32) -> (i32, i32) {
    %c0_i32 = arith.constant 0 : i32
    %c0_i32_0 = arith.constant 0 : i32
    %c0_i32_1 = arith.constant 0 : i32
    return %c0_i32, %c0_i32_0 : i32, i32
  }
  func.func @transform_7(%arg0: i32) -> (i32, i32) {
    %c0_i32 = arith.constant 0 : i32
    %c0_i32_0 = arith.constant 0 : i32
    %c0_i32_1 = arith.constant 0 : i32
    return %c0_i32, %c0_i32_0 : i32, i32
  }
  func.func @transform_8(%arg0: i32) -> (i32, i32) {
    %c0_i32 = arith.constant 0 : i32
    %c0_i32_0 = arith.constant 0 : i32
    %c0_i32_1 = arith.constant 0 : i32
    return %c0_i32, %c0_i32_0 : i32, i32
  }
  func.func @transform_9(%arg0: i32) -> (i32, i32) {
    %c0_i32 = arith.constant 0 : i32
    %c0_i32_0 = arith.constant 0 : i32
    %c0_i32_1 = arith.constant 0 : i32
    return %c0_i32, %c0_i32_0 : i32, i32
  }
  func.func @transform_10(%arg0: i32) -> (i32, i32) {
    %c0_i32 = arith.constant 0 : i32
    %c0_i32_0 = arith.constant 0 : i32
    %c0_i32_1 = arith.constant 0 : i32
    return %c0_i32, %c0_i32_0 : i32, i32
  }
  func.func @transform_11(%arg0: i32) -> (i32, i32) {
    %c0_i32 = arith.constant 0 : i32
    %c0_i32_0 = arith.constant 0 : i32
    %c0_i32_1 = arith.constant 0 : i32
    return %c0_i32, %c0_i32_0 : i32, i32
  }
  func.func @transform_12(%arg0: i32) -> (i32, i32) {
    %c0_i32 = arith.constant 0 : i32
    %c0_i32_0 = arith.constant 0 : i32
    %c0_i32_1 = arith.constant 0 : i32
    return %c0_i32, %c0_i32_0 : i32, i32
  }
  func.func @transform_13(%arg0: i32) -> (i32, i32) {
    %c0_i32 = arith.constant 0 : i32
    %c0_i32_0 = arith.constant 0 : i32
    %c0_i32_1 = arith.constant 0 : i32
    return %c0_i32, %c0_i32_0 : i32, i32
  }
  func.func @transform_14(%arg0: i32) -> (i32, i32) {
    %c0_i32 = arith.constant 0 : i32
    %c0_i32_0 = arith.constant 0 : i32
    %c0_i32_1 = arith.constant 0 : i32
    return %c0_i32, %c0_i32_0 : i32, i32
  }
  func.func @transform_15(%arg0: i32) -> (i32, i32) {
    %c0_i32 = arith.constant 0 : i32
    %c0_i32_0 = arith.constant 0 : i32
    %c0_i32_1 = arith.constant 0 : i32
    return %c0_i32, %c0_i32_0 : i32, i32
  }
  func.func @transform_16(%arg0: i32) -> (i32, i32) {
    %c0_i32 = arith.constant 0 : i32
    %c0_i32_0 = arith.constant 0 : i32
    %c0_i32_1 = arith.constant 0 : i32
    return %c0_i32, %c0_i32_0 : i32, i32
  }
  func.func @transform_17(%arg0: i32) -> (i32, i32) {
    %c0_i32 = arith.constant 0 : i32
    %c0_i32_0 = arith.constant 0 : i32
    %c0_i32_1 = arith.constant 0 : i32
    return %c0_i32, %c0_i32_0 : i32, i32
  }
  func.func @transform_18(%arg0: i32) -> (i32, i32, i32) {
    %c0_i32 = arith.constant 0 : i32
    %c0_i32_0 = arith.constant 0 : i32
    %c0_i32_1 = arith.constant 0 : i32
    return %arg0, %c0_i32, %c0_i32_0 : i32, i32, i32
  }
}

module attributes {stable_mosaic.version = 11 : i64} {
  func.func @encoder_kernel(%arg0: i32, %arg1: memref<1x8x32xf32, #tpu.memory_space<vmem>>, %arg2: memref<1x8x8xbf16, #tpu.memory_space<vmem>>, %arg3: memref<32x32xbf16, #tpu.memory_space<vmem>>, %arg4: memref<1x32xf32, #tpu.memory_space<vmem>>, %arg5: memref<32x32xbf16, #tpu.memory_space<vmem>>, %arg6: memref<1x32xf32, #tpu.memory_space<vmem>>, %arg7: memref<32x32xbf16, #tpu.memory_space<vmem>>, %arg8: memref<1x32xf32, #tpu.memory_space<vmem>>, %arg9: memref<32x32xbf16, #tpu.memory_space<vmem>>, %arg10: memref<1x32xf32, #tpu.memory_space<vmem>>, %arg11: memref<1x32xf32, #tpu.memory_space<vmem>>, %arg12: memref<1x32xf32, #tpu.memory_space<vmem>>, %arg13: memref<32x64xbf16, #tpu.memory_space<vmem>>, %arg14: memref<1x64xf32, #tpu.memory_space<vmem>>, %arg15: memref<64x32xbf16, #tpu.memory_space<vmem>>, %arg16: memref<1x32xf32, #tpu.memory_space<vmem>>, %arg17: memref<1x32xf32, #tpu.memory_space<vmem>>, %arg18: memref<1x32xf32, #tpu.memory_space<vmem>>, %arg19: memref<1x8x32xf32, #tpu.memory_space<vmem>>) attributes {dimension_semantics = [#tpu.dimension_semantics<parallel>], iteration_bounds = array<i64: 2>, scalar_prefetch = 0 : i64, scratch_operands = 0 : i64, tpu.core_type = #tpu.core_type<tc>, window_params = [{transform_indices = @transform_0, window_bounds = array<i64: 1, 8, 32>}, {transform_indices = @transform_1, window_bounds = array<i64: 1, 8, 8>}, {pipeline_mode = #tpu.pipeline_mode<synchronous>, transform_indices = @transform_2, window_bounds = array<i64: 32, 32>}, {pipeline_mode = #tpu.pipeline_mode<synchronous>, transform_indices = @transform_3, window_bounds = array<i64: 1, 32>}, {pipeline_mode = #tpu.pipeline_mode<synchronous>, transform_indices = @transform_4, window_bounds = array<i64: 32, 32>}, {pipeline_mode = #tpu.pipeline_mode<synchronous>, transform_indices = @transform_5, window_bounds = array<i64: 1, 32>}, {pipeline_mode = #tpu.pipeline_mode<synchronous>, transform_indices = @transform_6, window_bounds = array<i64: 32, 32>}, {pipeline_mode = #tpu.pipeline_mode<synchronous>, transform_indices = @transform_7, window_bounds = array<i64: 1, 32>}, {pipeline_mode = #tpu.pipeline_mode<synchronous>, transform_indices = @transform_8, window_bounds = array<i64: 32, 32>}, {pipeline_mode = #tpu.pipeline_mode<synchronous>, transform_indices = @transform_9, window_bounds = array<i64: 1, 32>}, {pipeline_mode = #tpu.pipeline_mode<synchronous>, transform_indices = @transform_10, window_bounds = array<i64: 1, 32>}, {pipeline_mode = #tpu.pipeline_mode<synchronous>, transform_indices = @transform_11, window_bounds = array<i64: 1, 32>}, {pipeline_mode = #tpu.pipeline_mode<synchronous>, transform_indices = @transform_12, window_bounds = array<i64: 32, 64>}, {pipeline_mode = #tpu.pipeline_mode<synchronous>, transform_indices = @transform_13, window_bounds = array<i64: 1, 64>}, {pipeline_mode = #tpu.pipeline_mode<synchronous>, transform_indices = @transform_14, window_bounds = array<i64: 64, 32>}, {pipeline_mode = #tpu.pipeline_mode<synchronous>, transform_indices = @transform_15, window_bounds = array<i64: 1, 32>}, {pipeline_mode = #tpu.pipeline_mode<synchronous>, transform_indices = @transform_16, window_bounds = array<i64: 1, 32>}, {pipeline_mode = #tpu.pipeline_mode<synchronous>, transform_indices = @transform_17, window_bounds = array<i64: 1, 32>}, {transform_indices = @transform_18, window_bounds = array<i64: 1, 8, 32>}]} {
    %c0 = arith.constant 0 : index
    %c0_0 = arith.constant 0 : index
    %c0_1 = arith.constant 0 : index
    %0 = vector.load %arg1[%c0, %c0_0, %c0_1] : memref<1x8x32xf32, #tpu.memory_space<vmem>>, vector<1x8x32xf32>
    %1 = vector.shape_cast %0 : vector<1x8x32xf32> to vector<8x32xf32>
    %c0_2 = arith.constant 0 : index
    %c0_3 = arith.constant 0 : index
    %c0_4 = arith.constant 0 : index
    %2 = vector.load %arg2[%c0_2, %c0_3, %c0_4] : memref<1x8x8xbf16, #tpu.memory_space<vmem>>, vector<1x8x8xbf16>
    %3 = vector.shape_cast %2 : vector<1x8x8xbf16> to vector<8x8xbf16>
    %4 = arith.extf %3 : vector<8x8xbf16> to vector<8x8xf32>
    %c0_5 = arith.constant 0 : index
    %c0_6 = arith.constant 0 : index
    %5 = vector.load %arg10[%c0_5, %c0_6] : memref<1x32xf32, #tpu.memory_space<vmem>>, vector<1x32xf32>
    %c0_7 = arith.constant 0 : index
    %c0_8 = arith.constant 0 : index
    %6 = vector.load %arg16[%c0_7, %c0_8] : memref<1x32xf32, #tpu.memory_space<vmem>>, vector<1x32xf32>
    %c0_9 = arith.constant 0 : index
    %c0_10 = arith.constant 0 : index
    %7 = vector.load %arg11[%c0_9, %c0_10] : memref<1x32xf32, #tpu.memory_space<vmem>>, vector<1x32xf32>
    %c0_11 = arith.constant 0 : index
    %c0_12 = arith.constant 0 : index
    %8 = vector.load %arg12[%c0_11, %c0_12] : memref<1x32xf32, #tpu.memory_space<vmem>>, vector<1x32xf32>
    %c0_13 = arith.constant 0 : index
    %c0_14 = arith.constant 0 : index
    %9 = vector.load %arg17[%c0_13, %c0_14] : memref<1x32xf32, #tpu.memory_space<vmem>>, vector<1x32xf32>
    %c0_15 = arith.constant 0 : index
    %c0_16 = arith.constant 0 : index
    %10 = vector.load %arg18[%c0_15, %c0_16] : memref<1x32xf32, #tpu.memory_space<vmem>>, vector<1x32xf32>
    %c0_i32 = arith.constant 0 : i32
    %11 = arith.truncf %1 : vector<8x32xf32> to vector<8x32xbf16>
    %cst = arith.constant 0.000000e+00 : f32
    %12 = vector.broadcast %cst : f32 to vector<8x32xf32>
    %c0_17 = arith.constant 0 : index
    %c0_18 = arith.constant 0 : index
    %13 = vector.load %arg3[%c0_17, %c0_18] : memref<32x32xbf16, #tpu.memory_space<vmem>>, vector<32x16xbf16>
    %cst_19 = arith.constant dense<0.000000e+00> : vector<8x16xf32>
    %14 = tpu.matmul %11, %13, %cst_19 {dimension_numbers = #tpu.dot_dimension_numbers<[1], [0], [0], [1], [0, 0, 1, 1], [], []>} : vector<8x32xbf16>, vector<32x16xbf16>, vector<8x16xf32> -> vector<8x16xf32>
    %c0_20 = arith.constant 0 : index
    %c0_21 = arith.constant 0 : index
    %15 = vector.load %arg4[%c0_20, %c0_21] : memref<1x32xf32, #tpu.memory_space<vmem>>, vector<1x16xf32>
    %16 = vector.broadcast %15 : vector<1x16xf32> to vector<8x16xf32>
    %17 = arith.addf %14, %16 : vector<8x16xf32>
    %18 = arith.truncf %17 : vector<8x16xf32> to vector<8x16xbf16>
    %c0_22 = arith.constant 0 : index
    %c0_23 = arith.constant 0 : index
    %19 = vector.load %arg5[%c0_22, %c0_23] : memref<32x32xbf16, #tpu.memory_space<vmem>>, vector<32x16xbf16>
    %cst_24 = arith.constant dense<0.000000e+00> : vector<8x16xf32>
    %20 = tpu.matmul %11, %19, %cst_24 {dimension_numbers = #tpu.dot_dimension_numbers<[1], [0], [0], [1], [0, 0, 1, 1], [], []>} : vector<8x32xbf16>, vector<32x16xbf16>, vector<8x16xf32> -> vector<8x16xf32>
    %c0_25 = arith.constant 0 : index
    %c0_26 = arith.constant 0 : index
    %21 = vector.load %arg6[%c0_25, %c0_26] : memref<1x32xf32, #tpu.memory_space<vmem>>, vector<1x16xf32>
    %22 = vector.broadcast %21 : vector<1x16xf32> to vector<8x16xf32>
    %23 = arith.addf %20, %22 : vector<8x16xf32>
    %24 = arith.truncf %23 : vector<8x16xf32> to vector<8x16xbf16>
    %c0_27 = arith.constant 0 : index
    %c0_28 = arith.constant 0 : index
    %25 = vector.load %arg7[%c0_27, %c0_28] : memref<32x32xbf16, #tpu.memory_space<vmem>>, vector<32x16xbf16>
    %cst_29 = arith.constant dense<0.000000e+00> : vector<8x16xf32>
    %26 = tpu.matmul %11, %25, %cst_29 {dimension_numbers = #tpu.dot_dimension_numbers<[1], [0], [0], [1], [0, 0, 1, 1], [], []>} : vector<8x32xbf16>, vector<32x16xbf16>, vector<8x16xf32> -> vector<8x16xf32>
    %c0_30 = arith.constant 0 : index
    %c0_31 = arith.constant 0 : index
    %27 = vector.load %arg8[%c0_30, %c0_31] : memref<1x32xf32, #tpu.memory_space<vmem>>, vector<1x16xf32>
    %28 = vector.broadcast %27 : vector<1x16xf32> to vector<8x16xf32>
    %29 = arith.addf %26, %28 : vector<8x16xf32>
    %30 = arith.truncf %29 : vector<8x16xf32> to vector<8x16xbf16>
    %31 = vector.extract_strided_slice %18 {offsets = [0, 0], sizes = [8, 8], strides = [1, 1]} : vector<8x16xbf16> to vector<8x8xbf16>
    %32 = vector.extract_strided_slice %24 {offsets = [0, 0], sizes = [8, 8], strides = [1, 1]} : vector<8x16xbf16> to vector<8x8xbf16>
    %33 = vector.extract_strided_slice %30 {offsets = [0, 0], sizes = [8, 8], strides = [1, 1]} : vector<8x16xbf16> to vector<8x8xbf16>
    %cst_32 = arith.constant dense<0.000000e+00> : vector<8x8xf32>
    %34 = tpu.matmul %31, %32, %cst_32 {dimension_numbers = #tpu.dot_dimension_numbers<[1], [1], [0], [0], [0, 0, 1, 0], [], []>} : vector<8x8xbf16>, vector<8x8xbf16>, vector<8x8xf32> -> vector<8x8xf32>
    %35 = arith.addf %34, %4 : vector<8x8xf32>
    %cst_33 = arith.constant dense<0xFF800000> : vector<8xf32>
    %36 = vector.multi_reduction <maximumf>, %35, %cst_33 [1] : vector<8x8xf32> to vector<8xf32>
    %37 = vector.shape_cast %36 : vector<8xf32> to vector<8x1xf32>
    %38 = vector.broadcast %37 : vector<8x1xf32> to vector<8x8xf32>
    %39 = arith.subf %35, %38 : vector<8x8xf32>
    %40 = math.exp %39 : vector<8x8xf32>
    %cst_34 = arith.constant dense<0.000000e+00> : vector<8xf32>
    %41 = vector.multi_reduction <add>, %40, %cst_34 [1] : vector<8x8xf32> to vector<8xf32>
    %42 = vector.shape_cast %41 : vector<8xf32> to vector<8x1xf32>
    %43 = arith.truncf %40 : vector<8x8xf32> to vector<8x8xbf16>
    %cst_35 = arith.constant dense<0.000000e+00> : vector<8x8xf32>
    %44 = tpu.matmul %43, %33, %cst_35 {dimension_numbers = #tpu.dot_dimension_numbers<[1], [0], [0], [1], [0, 0, 1, 1], [], []>} : vector<8x8xbf16>, vector<8x8xbf16>, vector<8x8xf32> -> vector<8x8xf32>
    %45 = tpu.reciprocal %42 {approx = true} : vector<8x1xf32> -> vector<8x1xf32>
    %46 = vector.broadcast %45 : vector<8x1xf32> to vector<8x8xf32>
    %47 = arith.mulf %44, %46 : vector<8x8xf32>
    %48 = arith.truncf %47 : vector<8x8xf32> to vector<8x8xbf16>
    %c0_36 = arith.constant 0 : index
    %c0_37 = arith.constant 0 : index
    %49 = vector.load %arg9[%c0_36, %c0_37] : memref<32x32xbf16, #tpu.memory_space<vmem>>, vector<8x32xbf16>
    %cst_38 = arith.constant dense<0.000000e+00> : vector<8x32xf32>
    %50 = tpu.matmul %48, %49, %cst_38 {dimension_numbers = #tpu.dot_dimension_numbers<[1], [0], [0], [1], [0, 0, 1, 1], [], []>} : vector<8x8xbf16>, vector<8x32xbf16>, vector<8x32xf32> -> vector<8x32xf32>
    %51 = arith.addf %12, %50 : vector<8x32xf32>
    %52 = vector.extract_strided_slice %18 {offsets = [0, 8], sizes = [8, 8], strides = [1, 1]} : vector<8x16xbf16> to vector<8x8xbf16>
    %53 = vector.extract_strided_slice %24 {offsets = [0, 8], sizes = [8, 8], strides = [1, 1]} : vector<8x16xbf16> to vector<8x8xbf16>
    %54 = vector.extract_strided_slice %30 {offsets = [0, 8], sizes = [8, 8], strides = [1, 1]} : vector<8x16xbf16> to vector<8x8xbf16>
    %cst_39 = arith.constant dense<0.000000e+00> : vector<8x8xf32>
    %55 = tpu.matmul %52, %53, %cst_39 {dimension_numbers = #tpu.dot_dimension_numbers<[1], [1], [0], [0], [0, 0, 1, 0], [], []>} : vector<8x8xbf16>, vector<8x8xbf16>, vector<8x8xf32> -> vector<8x8xf32>
    %56 = arith.addf %55, %4 : vector<8x8xf32>
    %cst_40 = arith.constant dense<0xFF800000> : vector<8xf32>
    %57 = vector.multi_reduction <maximumf>, %56, %cst_40 [1] : vector<8x8xf32> to vector<8xf32>
    %58 = vector.shape_cast %57 : vector<8xf32> to vector<8x1xf32>
    %59 = vector.broadcast %58 : vector<8x1xf32> to vector<8x8xf32>
    %60 = arith.subf %56, %59 : vector<8x8xf32>
    %61 = math.exp %60 : vector<8x8xf32>
    %cst_41 = arith.constant dense<0.000000e+00> : vector<8xf32>
    %62 = vector.multi_reduction <add>, %61, %cst_41 [1] : vector<8x8xf32> to vector<8xf32>
    %63 = vector.shape_cast %62 : vector<8xf32> to vector<8x1xf32>
    %64 = arith.truncf %61 : vector<8x8xf32> to vector<8x8xbf16>
    %cst_42 = arith.constant dense<0.000000e+00> : vector<8x8xf32>
    %65 = tpu.matmul %64, %54, %cst_42 {dimension_numbers = #tpu.dot_dimension_numbers<[1], [0], [0], [1], [0, 0, 1, 1], [], []>} : vector<8x8xbf16>, vector<8x8xbf16>, vector<8x8xf32> -> vector<8x8xf32>
    %66 = tpu.reciprocal %63 {approx = true} : vector<8x1xf32> -> vector<8x1xf32>
    %67 = vector.broadcast %66 : vector<8x1xf32> to vector<8x8xf32>
    %68 = arith.mulf %65, %67 : vector<8x8xf32>
    %69 = arith.truncf %68 : vector<8x8xf32> to vector<8x8xbf16>
    %c8 = arith.constant 8 : index
    %c0_43 = arith.constant 0 : index
    %70 = vector.load %arg9[%c8, %c0_43] : memref<32x32xbf16, #tpu.memory_space<vmem>>, vector<8x32xbf16>
    %cst_44 = arith.constant dense<0.000000e+00> : vector<8x32xf32>
    %71 = tpu.matmul %69, %70, %cst_44 {dimension_numbers = #tpu.dot_dimension_numbers<[1], [0], [0], [1], [0, 0, 1, 1], [], []>} : vector<8x8xbf16>, vector<8x32xbf16>, vector<8x32xf32> -> vector<8x32xf32>
    %72 = arith.addf %51, %71 : vector<8x32xf32>
    %c0_45 = arith.constant 0 : index
    %c16 = arith.constant 16 : index
    %73 = vector.load %arg3[%c0_45, %c16] : memref<32x32xbf16, #tpu.memory_space<vmem>>, vector<32x16xbf16>
    %cst_46 = arith.constant dense<0.000000e+00> : vector<8x16xf32>
    %74 = tpu.matmul %11, %73, %cst_46 {dimension_numbers = #tpu.dot_dimension_numbers<[1], [0], [0], [1], [0, 0, 1, 1], [], []>} : vector<8x32xbf16>, vector<32x16xbf16>, vector<8x16xf32> -> vector<8x16xf32>
    %c0_47 = arith.constant 0 : index
    %c16_48 = arith.constant 16 : index
    %75 = vector.load %arg4[%c0_47, %c16_48] : memref<1x32xf32, #tpu.memory_space<vmem>>, vector<1x16xf32>
    %76 = vector.broadcast %75 : vector<1x16xf32> to vector<8x16xf32>
    %77 = arith.addf %74, %76 : vector<8x16xf32>
    %78 = arith.truncf %77 : vector<8x16xf32> to vector<8x16xbf16>
    %c0_49 = arith.constant 0 : index
    %c16_50 = arith.constant 16 : index
    %79 = vector.load %arg5[%c0_49, %c16_50] : memref<32x32xbf16, #tpu.memory_space<vmem>>, vector<32x16xbf16>
    %cst_51 = arith.constant dense<0.000000e+00> : vector<8x16xf32>
    %80 = tpu.matmul %11, %79, %cst_51 {dimension_numbers = #tpu.dot_dimension_numbers<[1], [0], [0], [1], [0, 0, 1, 1], [], []>} : vector<8x32xbf16>, vector<32x16xbf16>, vector<8x16xf32> -> vector<8x16xf32>
    %c0_52 = arith.constant 0 : index
    %c16_53 = arith.constant 16 : index
    %81 = vector.load %arg6[%c0_52, %c16_53] : memref<1x32xf32, #tpu.memory_space<vmem>>, vector<1x16xf32>
    %82 = vector.broadcast %81 : vector<1x16xf32> to vector<8x16xf32>
    %83 = arith.addf %80, %82 : vector<8x16xf32>
    %84 = arith.truncf %83 : vector<8x16xf32> to vector<8x16xbf16>
    %c0_54 = arith.constant 0 : index
    %c16_55 = arith.constant 16 : index
    %85 = vector.load %arg7[%c0_54, %c16_55] : memref<32x32xbf16, #tpu.memory_space<vmem>>, vector<32x16xbf16>
    %cst_56 = arith.constant dense<0.000000e+00> : vector<8x16xf32>
    %86 = tpu.matmul %11, %85, %cst_56 {dimension_numbers = #tpu.dot_dimension_numbers<[1], [0], [0], [1], [0, 0, 1, 1], [], []>} : vector<8x32xbf16>, vector<32x16xbf16>, vector<8x16xf32> -> vector<8x16xf32>
    %c0_57 = arith.constant 0 : index
    %c16_58 = arith.constant 16 : index
    %87 = vector.load %arg8[%c0_57, %c16_58] : memref<1x32xf32, #tpu.memory_space<vmem>>, vector<1x16xf32>
    %88 = vector.broadcast %87 : vector<1x16xf32> to vector<8x16xf32>
    %89 = arith.addf %86, %88 : vector<8x16xf32>
    %90 = arith.truncf %89 : vector<8x16xf32> to vector<8x16xbf16>
    %91 = vector.extract_strided_slice %78 {offsets = [0, 0], sizes = [8, 8], strides = [1, 1]} : vector<8x16xbf16> to vector<8x8xbf16>
    %92 = vector.extract_strided_slice %84 {offsets = [0, 0], sizes = [8, 8], strides = [1, 1]} : vector<8x16xbf16> to vector<8x8xbf16>
    %93 = vector.extract_strided_slice %90 {offsets = [0, 0], sizes = [8, 8], strides = [1, 1]} : vector<8x16xbf16> to vector<8x8xbf16>
    %cst_59 = arith.constant dense<0.000000e+00> : vector<8x8xf32>
    %94 = tpu.matmul %91, %92, %cst_59 {dimension_numbers = #tpu.dot_dimension_numbers<[1], [1], [0], [0], [0, 0, 1, 0], [], []>} : vector<8x8xbf16>, vector<8x8xbf16>, vector<8x8xf32> -> vector<8x8xf32>
    %95 = arith.addf %94, %4 : vector<8x8xf32>
    %cst_60 = arith.constant dense<0xFF800000> : vector<8xf32>
    %96 = vector.multi_reduction <maximumf>, %95, %cst_60 [1] : vector<8x8xf32> to vector<8xf32>
    %97 = vector.shape_cast %96 : vector<8xf32> to vector<8x1xf32>
    %98 = vector.broadcast %97 : vector<8x1xf32> to vector<8x8xf32>
    %99 = arith.subf %95, %98 : vector<8x8xf32>
    %100 = math.exp %99 : vector<8x8xf32>
    %cst_61 = arith.constant dense<0.000000e+00> : vector<8xf32>
    %101 = vector.multi_reduction <add>, %100, %cst_61 [1] : vector<8x8xf32> to vector<8xf32>
    %102 = vector.shape_cast %101 : vector<8xf32> to vector<8x1xf32>
    %103 = arith.truncf %100 : vector<8x8xf32> to vector<8x8xbf16>
    %cst_62 = arith.constant dense<0.000000e+00> : vector<8x8xf32>
    %104 = tpu.matmul %103, %93, %cst_62 {dimension_numbers = #tpu.dot_dimension_numbers<[1], [0], [0], [1], [0, 0, 1, 1], [], []>} : vector<8x8xbf16>, vector<8x8xbf16>, vector<8x8xf32> -> vector<8x8xf32>
    %105 = tpu.reciprocal %102 {approx = true} : vector<8x1xf32> -> vector<8x1xf32>
    %106 = vector.broadcast %105 : vector<8x1xf32> to vector<8x8xf32>
    %107 = arith.mulf %104, %106 : vector<8x8xf32>
    %108 = arith.truncf %107 : vector<8x8xf32> to vector<8x8xbf16>
    %c16_63 = arith.constant 16 : index
    %c0_64 = arith.constant 0 : index
    %109 = vector.load %arg9[%c16_63, %c0_64] : memref<32x32xbf16, #tpu.memory_space<vmem>>, vector<8x32xbf16>
    %cst_65 = arith.constant dense<0.000000e+00> : vector<8x32xf32>
    %110 = tpu.matmul %108, %109, %cst_65 {dimension_numbers = #tpu.dot_dimension_numbers<[1], [0], [0], [1], [0, 0, 1, 1], [], []>} : vector<8x8xbf16>, vector<8x32xbf16>, vector<8x32xf32> -> vector<8x32xf32>
    %111 = arith.addf %72, %110 : vector<8x32xf32>
    %112 = vector.extract_strided_slice %78 {offsets = [0, 8], sizes = [8, 8], strides = [1, 1]} : vector<8x16xbf16> to vector<8x8xbf16>
    %113 = vector.extract_strided_slice %84 {offsets = [0, 8], sizes = [8, 8], strides = [1, 1]} : vector<8x16xbf16> to vector<8x8xbf16>
    %114 = vector.extract_strided_slice %90 {offsets = [0, 8], sizes = [8, 8], strides = [1, 1]} : vector<8x16xbf16> to vector<8x8xbf16>
    %cst_66 = arith.constant dense<0.000000e+00> : vector<8x8xf32>
    %115 = tpu.matmul %112, %113, %cst_66 {dimension_numbers = #tpu.dot_dimension_numbers<[1], [1], [0], [0], [0, 0, 1, 0], [], []>} : vector<8x8xbf16>, vector<8x8xbf16>, vector<8x8xf32> -> vector<8x8xf32>
    %116 = arith.addf %115, %4 : vector<8x8xf32>
    %cst_67 = arith.constant dense<0xFF800000> : vector<8xf32>
    %117 = vector.multi_reduction <maximumf>, %116, %cst_67 [1] : vector<8x8xf32> to vector<8xf32>
    %118 = vector.shape_cast %117 : vector<8xf32> to vector<8x1xf32>
    %119 = vector.broadcast %118 : vector<8x1xf32> to vector<8x8xf32>
    %120 = arith.subf %116, %119 : vector<8x8xf32>
    %121 = math.exp %120 : vector<8x8xf32>
    %cst_68 = arith.constant dense<0.000000e+00> : vector<8xf32>
    %122 = vector.multi_reduction <add>, %121, %cst_68 [1] : vector<8x8xf32> to vector<8xf32>
    %123 = vector.shape_cast %122 : vector<8xf32> to vector<8x1xf32>
    %124 = arith.truncf %121 : vector<8x8xf32> to vector<8x8xbf16>
    %cst_69 = arith.constant dense<0.000000e+00> : vector<8x8xf32>
    %125 = tpu.matmul %124, %114, %cst_69 {dimension_numbers = #tpu.dot_dimension_numbers<[1], [0], [0], [1], [0, 0, 1, 1], [], []>} : vector<8x8xbf16>, vector<8x8xbf16>, vector<8x8xf32> -> vector<8x8xf32>
    %126 = tpu.reciprocal %123 {approx = true} : vector<8x1xf32> -> vector<8x1xf32>
    %127 = vector.broadcast %126 : vector<8x1xf32> to vector<8x8xf32>
    %128 = arith.mulf %125, %127 : vector<8x8xf32>
    %129 = arith.truncf %128 : vector<8x8xf32> to vector<8x8xbf16>
    %c24 = arith.constant 24 : index
    %c0_70 = arith.constant 0 : index
    %130 = vector.load %arg9[%c24, %c0_70] : memref<32x32xbf16, #tpu.memory_space<vmem>>, vector<8x32xbf16>
    %cst_71 = arith.constant dense<0.000000e+00> : vector<8x32xf32>
    %131 = tpu.matmul %129, %130, %cst_71 {dimension_numbers = #tpu.dot_dimension_numbers<[1], [0], [0], [1], [0, 0, 1, 1], [], []>} : vector<8x8xbf16>, vector<8x32xbf16>, vector<8x32xf32> -> vector<8x32xf32>
    %132 = arith.addf %111, %131 : vector<8x32xf32>
    %133 = arith.addf %1, %132 : vector<8x32xf32>
    %134 = vector.broadcast %5 : vector<1x32xf32> to vector<8x32xf32>
    %135 = arith.addf %133, %134 : vector<8x32xf32>
    %cst_72 = arith.constant dense<0.000000e+00> : vector<8xf32>
    %136 = vector.multi_reduction <add>, %135, %cst_72 [1] : vector<8x32xf32> to vector<8xf32>
    %137 = vector.shape_cast %136 : vector<8xf32> to vector<8x1xf32>
    %cst_73 = arith.constant 3.200000e+01 : f32
    %138 = vector.broadcast %cst_73 : f32 to vector<8x1xf32>
    %139 = arith.divf %137, %138 : vector<8x1xf32>
    %140 = vector.broadcast %139 : vector<8x1xf32> to vector<8x32xf32>
    %141 = arith.subf %135, %140 : vector<8x32xf32>
    %142 = arith.mulf %141, %141 : vector<8x32xf32>
    %cst_74 = arith.constant dense<0.000000e+00> : vector<8xf32>
    %143 = vector.multi_reduction <add>, %142, %cst_74 [1] : vector<8x32xf32> to vector<8xf32>
    %144 = vector.shape_cast %143 : vector<8xf32> to vector<8x1xf32>
    %cst_75 = arith.constant 3.200000e+01 : f32
    %145 = vector.broadcast %cst_75 : f32 to vector<8x1xf32>
    %146 = arith.divf %144, %145 : vector<8x1xf32>
    %147 = vector.broadcast %139 : vector<8x1xf32> to vector<8x32xf32>
    %148 = arith.subf %135, %147 : vector<8x32xf32>
    %cst_76 = arith.constant 9.99999974E-6 : f32
    %149 = vector.broadcast %cst_76 : f32 to vector<8x1xf32>
    %150 = arith.addf %146, %149 : vector<8x1xf32>
    %151 = math.rsqrt %150 : vector<8x1xf32>
    %152 = vector.broadcast %151 : vector<8x1xf32> to vector<8x32xf32>
    %153 = arith.mulf %148, %152 : vector<8x32xf32>
    %154 = vector.broadcast %7 : vector<1x32xf32> to vector<8x32xf32>
    %155 = arith.mulf %153, %154 : vector<8x32xf32>
    %156 = vector.broadcast %8 : vector<1x32xf32> to vector<8x32xf32>
    %157 = arith.addf %155, %156 : vector<8x32xf32>
    %158 = arith.truncf %157 : vector<8x32xf32> to vector<8x32xbf16>
    %cst_77 = arith.constant 0.000000e+00 : f32
    %159 = vector.broadcast %cst_77 : f32 to vector<8x32xf32>
    %c0_78 = arith.constant 0 : index
    %c0_79 = arith.constant 0 : index
    %160 = vector.load %arg13[%c0_78, %c0_79] : memref<32x64xbf16, #tpu.memory_space<vmem>>, vector<32x32xbf16>
    %cst_80 = arith.constant dense<0.000000e+00> : vector<8x32xf32>
    %161 = tpu.matmul %158, %160, %cst_80 {dimension_numbers = #tpu.dot_dimension_numbers<[1], [0], [0], [1], [0, 0, 1, 1], [], []>} : vector<8x32xbf16>, vector<32x32xbf16>, vector<8x32xf32> -> vector<8x32xf32>
    %c0_81 = arith.constant 0 : index
    %c0_82 = arith.constant 0 : index
    %162 = vector.load %arg14[%c0_81, %c0_82] : memref<1x64xf32, #tpu.memory_space<vmem>>, vector<1x32xf32>
    %163 = vector.broadcast %162 : vector<1x32xf32> to vector<8x32xf32>
    %164 = arith.addf %161, %163 : vector<8x32xf32>
    %cst_83 = arith.constant 0.000000e+00 : f32
    %165 = vector.broadcast %cst_83 : f32 to vector<8x32xf32>
    %166 = arith.maximumf %164, %165 : vector<8x32xf32>
    %167 = arith.truncf %166 : vector<8x32xf32> to vector<8x32xbf16>
    %c0_84 = arith.constant 0 : index
    %c0_85 = arith.constant 0 : index
    %168 = vector.load %arg15[%c0_84, %c0_85] : memref<64x32xbf16, #tpu.memory_space<vmem>>, vector<32x32xbf16>
    %cst_86 = arith.constant dense<0.000000e+00> : vector<8x32xf32>
    %169 = tpu.matmul %167, %168, %cst_86 {dimension_numbers = #tpu.dot_dimension_numbers<[1], [0], [0], [1], [0, 0, 1, 1], [], []>} : vector<8x32xbf16>, vector<32x32xbf16>, vector<8x32xf32> -> vector<8x32xf32>
    %170 = arith.addf %159, %169 : vector<8x32xf32>
    %c0_87 = arith.constant 0 : index
    %c32 = arith.constant 32 : index
    %171 = vector.load %arg13[%c0_87, %c32] : memref<32x64xbf16, #tpu.memory_space<vmem>>, vector<32x32xbf16>
    %cst_88 = arith.constant dense<0.000000e+00> : vector<8x32xf32>
    %172 = tpu.matmul %158, %171, %cst_88 {dimension_numbers = #tpu.dot_dimension_numbers<[1], [0], [0], [1], [0, 0, 1, 1], [], []>} : vector<8x32xbf16>, vector<32x32xbf16>, vector<8x32xf32> -> vector<8x32xf32>
    %c0_89 = arith.constant 0 : index
    %c32_90 = arith.constant 32 : index
    %173 = vector.load %arg14[%c0_89, %c32_90] : memref<1x64xf32, #tpu.memory_space<vmem>>, vector<1x32xf32>
    %174 = vector.broadcast %173 : vector<1x32xf32> to vector<8x32xf32>
    %175 = arith.addf %172, %174 : vector<8x32xf32>
    %cst_91 = arith.constant 0.000000e+00 : f32
    %176 = vector.broadcast %cst_91 : f32 to vector<8x32xf32>
    %177 = arith.maximumf %175, %176 : vector<8x32xf32>
    %178 = arith.truncf %177 : vector<8x32xf32> to vector<8x32xbf16>
    %c32_92 = arith.constant 32 : index
    %c0_93 = arith.constant 0 : index
    %179 = vector.load %arg15[%c32_92, %c0_93] : memref<64x32xbf16, #tpu.memory_space<vmem>>, vector<32x32xbf16>
    %cst_94 = arith.constant dense<0.000000e+00> : vector<8x32xf32>
    %180 = tpu.matmul %178, %179, %cst_94 {dimension_numbers = #tpu.dot_dimension_numbers<[1], [0], [0], [1], [0, 0, 1, 1], [], []>} : vector<8x32xbf16>, vector<32x32xbf16>, vector<8x32xf32> -> vector<8x32xf32>
    %181 = arith.addf %170, %180 : vector<8x32xf32>
    %182 = arith.addf %157, %181 : vector<8x32xf32>
    %183 = vector.broadcast %6 : vector<1x32xf32> to vector<8x32xf32>
    %184 = arith.addf %182, %183 : vector<8x32xf32>
    %cst_95 = arith.constant dense<0.000000e+00> : vector<8xf32>
    %185 = vector.multi_reduction <add>, %184, %cst_95 [1] : vector<8x32xf32> to vector<8xf32>
    %186 = vector.shape_cast %185 : vector<8xf32> to vector<8x1xf32>
    %cst_96 = arith.constant 3.200000e+01 : f32
    %187 = vector.broadcast %cst_96 : f32 to vector<8x1xf32>
    %188 = arith.divf %186, %187 : vector<8x1xf32>
    %189 = vector.broadcast %188 : vector<8x1xf32> to vector<8x32xf32>
    %190 = arith.subf %184, %189 : vector<8x32xf32>
    %191 = arith.mulf %190, %190 : vector<8x32xf32>
    %cst_97 = arith.constant dense<0.000000e+00> : vector<8xf32>
    %192 = vector.multi_reduction <add>, %191, %cst_97 [1] : vector<8x32xf32> to vector<8xf32>
    %193 = vector.shape_cast %192 : vector<8xf32> to vector<8x1xf32>
    %cst_98 = arith.constant 3.200000e+01 : f32
    %194 = vector.broadcast %cst_98 : f32 to vector<8x1xf32>
    %195 = arith.divf %193, %194 : vector<8x1xf32>
    %196 = vector.broadcast %188 : vector<8x1xf32> to vector<8x32xf32>
    %197 = arith.subf %184, %196 : vector<8x32xf32>
    %cst_99 = arith.constant 9.99999974E-6 : f32
    %198 = vector.broadcast %cst_99 : f32 to vector<8x1xf32>
    %199 = arith.addf %195, %198 : vector<8x1xf32>
    %200 = math.rsqrt %199 : vector<8x1xf32>
    %201 = vector.broadcast %200 : vector<8x1xf32> to vector<8x32xf32>
    %202 = arith.mulf %197, %201 : vector<8x32xf32>
    %203 = vector.broadcast %9 : vector<1x32xf32> to vector<8x32xf32>
    %204 = arith.mulf %202, %203 : vector<8x32xf32>
    %205 = vector.broadcast %10 : vector<1x32xf32> to vector<8x32xf32>
    %206 = arith.addf %204, %205 : vector<8x32xf32>
    %c1_i32 = arith.constant 1 : i32
    %207 = arith.truncf %206 : vector<8x32xf32> to vector<8x32xbf16>
    %cst_100 = arith.constant 0.000000e+00 : f32
    %208 = vector.broadcast %cst_100 : f32 to vector<8x32xf32>
    %c0_101 = arith.constant 0 : index
    %c0_102 = arith.constant 0 : index
    %209 = vector.load %arg3[%c0_101, %c0_102] : memref<32x32xbf16, #tpu.memory_space<vmem>>, vector<32x16xbf16>
    %cst_103 = arith.constant dense<0.000000e+00> : vector<8x16xf32>
    %210 = tpu.matmul %207, %209, %cst_103 {dimension_numbers = #tpu.dot_dimension_numbers<[1], [0], [0], [1], [0, 0, 1, 1], [], []>} : vector<8x32xbf16>, vector<32x16xbf16>, vector<8x16xf32> -> vector<8x16xf32>
    %c0_104 = arith.constant 0 : index
    %c0_105 = arith.constant 0 : index
    %211 = vector.load %arg4[%c0_104, %c0_105] : memref<1x32xf32, #tpu.memory_space<vmem>>, vector<1x16xf32>
    %212 = vector.broadcast %211 : vector<1x16xf32> to vector<8x16xf32>
    %213 = arith.addf %210, %212 : vector<8x16xf32>
    %214 = arith.truncf %213 : vector<8x16xf32> to vector<8x16xbf16>
    %c0_106 = arith.constant 0 : index
    %c0_107 = arith.constant 0 : index
    %215 = vector.load %arg5[%c0_106, %c0_107] : memref<32x32xbf16, #tpu.memory_space<vmem>>, vector<32x16xbf16>
    %cst_108 = arith.constant dense<0.000000e+00> : vector<8x16xf32>
    %216 = tpu.matmul %207, %215, %cst_108 {dimension_numbers = #tpu.dot_dimension_numbers<[1], [0], [0], [1], [0, 0, 1, 1], [], []>} : vector<8x32xbf16>, vector<32x16xbf16>, vector<8x16xf32> -> vector<8x16xf32>
    %c0_109 = arith.constant 0 : index
    %c0_110 = arith.constant 0 : index
    %217 = vector.load %arg6[%c0_109, %c0_110] : memref<1x32xf32, #tpu.memory_space<vmem>>, vector<1x16xf32>
    %218 = vector.broadcast %217 : vector<1x16xf32> to vector<8x16xf32>
    %219 = arith.addf %216, %218 : vector<8x16xf32>
    %220 = arith.truncf %219 : vector<8x16xf32> to vector<8x16xbf16>
    %c0_111 = arith.constant 0 : index
    %c0_112 = arith.constant 0 : index
    %221 = vector.load %arg7[%c0_111, %c0_112] : memref<32x32xbf16, #tpu.memory_space<vmem>>, vector<32x16xbf16>
    %cst_113 = arith.constant dense<0.000000e+00> : vector<8x16xf32>
    %222 = tpu.matmul %207, %221, %cst_113 {dimension_numbers = #tpu.dot_dimension_numbers<[1], [0], [0], [1], [0, 0, 1, 1], [], []>} : vector<8x32xbf16>, vector<32x16xbf16>, vector<8x16xf32> -> vector<8x16xf32>
    %c0_114 = arith.constant 0 : index
    %c0_115 = arith.constant 0 : index
    %223 = vector.load %arg8[%c0_114, %c0_115] : memref<1x32xf32, #tpu.memory_space<vmem>>, vector<1x16xf32>
    %224 = vector.broadcast %223 : vector<1x16xf32> to vector<8x16xf32>
    %225 = arith.addf %222, %224 : vector<8x16xf32>
    %226 = arith.truncf %225 : vector<8x16xf32> to vector<8x16xbf16>
    %227 = vector.extract_strided_slice %214 {offsets = [0, 0], sizes = [8, 8], strides = [1, 1]} : vector<8x16xbf16> to vector<8x8xbf16>
    %228 = vector.extract_strided_slice %220 {offsets = [0, 0], sizes = [8, 8], strides = [1, 1]} : vector<8x16xbf16> to vector<8x8xbf16>
    %229 = vector.extract_strided_slice %226 {offsets = [0, 0], sizes = [8, 8], strides = [1, 1]} : vector<8x16xbf16> to vector<8x8xbf16>
    %cst_116 = arith.constant dense<0.000000e+00> : vector<8x8xf32>
    %230 = tpu.matmul %227, %228, %cst_116 {dimension_numbers = #tpu.dot_dimension_numbers<[1], [1], [0], [0], [0, 0, 1, 0], [], []>} : vector<8x8xbf16>, vector<8x8xbf16>, vector<8x8xf32> -> vector<8x8xf32>
    %231 = arith.addf %230, %4 : vector<8x8xf32>
    %cst_117 = arith.constant dense<0xFF800000> : vector<8xf32>
    %232 = vector.multi_reduction <maximumf>, %231, %cst_117 [1] : vector<8x8xf32> to vector<8xf32>
    %233 = vector.shape_cast %232 : vector<8xf32> to vector<8x1xf32>
    %234 = vector.broadcast %233 : vector<8x1xf32> to vector<8x8xf32>
    %235 = arith.subf %231, %234 : vector<8x8xf32>
    %236 = math.exp %235 : vector<8x8xf32>
    %cst_118 = arith.constant dense<0.000000e+00> : vector<8xf32>
    %237 = vector.multi_reduction <add>, %236, %cst_118 [1] : vector<8x8xf32> to vector<8xf32>
    %238 = vector.shape_cast %237 : vector<8xf32> to vector<8x1xf32>
    %239 = arith.truncf %236 : vector<8x8xf32> to vector<8x8xbf16>
    %cst_119 = arith.constant dense<0.000000e+00> : vector<8x8xf32>
    %240 = tpu.matmul %239, %229, %cst_119 {dimension_numbers = #tpu.dot_dimension_numbers<[1], [0], [0], [1], [0, 0, 1, 1], [], []>} : vector<8x8xbf16>, vector<8x8xbf16>, vector<8x8xf32> -> vector<8x8xf32>
    %241 = tpu.reciprocal %238 {approx = true} : vector<8x1xf32> -> vector<8x1xf32>
    %242 = vector.broadcast %241 : vector<8x1xf32> to vector<8x8xf32>
    %243 = arith.mulf %240, %242 : vector<8x8xf32>
    %244 = arith.truncf %243 : vector<8x8xf32> to vector<8x8xbf16>
    %c0_120 = arith.constant 0 : index
    %c0_121 = arith.constant 0 : index
    %245 = vector.load %arg9[%c0_120, %c0_121] : memref<32x32xbf16, #tpu.memory_space<vmem>>, vector<8x32xbf16>
    %cst_122 = arith.constant dense<0.000000e+00> : vector<8x32xf32>
    %246 = tpu.matmul %244, %245, %cst_122 {dimension_numbers = #tpu.dot_dimension_numbers<[1], [0], [0], [1], [0, 0, 1, 1], [], []>} : vector<8x8xbf16>, vector<8x32xbf16>, vector<8x32xf32> -> vector<8x32xf32>
    %247 = arith.addf %208, %246 : vector<8x32xf32>
    %248 = vector.extract_strided_slice %214 {offsets = [0, 8], sizes = [8, 8], strides = [1, 1]} : vector<8x16xbf16> to vector<8x8xbf16>
    %249 = vector.extract_strided_slice %220 {offsets = [0, 8], sizes = [8, 8], strides = [1, 1]} : vector<8x16xbf16> to vector<8x8xbf16>
    %250 = vector.extract_strided_slice %226 {offsets = [0, 8], sizes = [8, 8], strides = [1, 1]} : vector<8x16xbf16> to vector<8x8xbf16>
    %cst_123 = arith.constant dense<0.000000e+00> : vector<8x8xf32>
    %251 = tpu.matmul %248, %249, %cst_123 {dimension_numbers = #tpu.dot_dimension_numbers<[1], [1], [0], [0], [0, 0, 1, 0], [], []>} : vector<8x8xbf16>, vector<8x8xbf16>, vector<8x8xf32> -> vector<8x8xf32>
    %252 = arith.addf %251, %4 : vector<8x8xf32>
    %cst_124 = arith.constant dense<0xFF800000> : vector<8xf32>
    %253 = vector.multi_reduction <maximumf>, %252, %cst_124 [1] : vector<8x8xf32> to vector<8xf32>
    %254 = vector.shape_cast %253 : vector<8xf32> to vector<8x1xf32>
    %255 = vector.broadcast %254 : vector<8x1xf32> to vector<8x8xf32>
    %256 = arith.subf %252, %255 : vector<8x8xf32>
    %257 = math.exp %256 : vector<8x8xf32>
    %cst_125 = arith.constant dense<0.000000e+00> : vector<8xf32>
    %258 = vector.multi_reduction <add>, %257, %cst_125 [1] : vector<8x8xf32> to vector<8xf32>
    %259 = vector.shape_cast %258 : vector<8xf32> to vector<8x1xf32>
    %260 = arith.truncf %257 : vector<8x8xf32> to vector<8x8xbf16>
    %cst_126 = arith.constant dense<0.000000e+00> : vector<8x8xf32>
    %261 = tpu.matmul %260, %250, %cst_126 {dimension_numbers = #tpu.dot_dimension_numbers<[1], [0], [0], [1], [0, 0, 1, 1], [], []>} : vector<8x8xbf16>, vector<8x8xbf16>, vector<8x8xf32> -> vector<8x8xf32>
    %262 = tpu.reciprocal %259 {approx = true} : vector<8x1xf32> -> vector<8x1xf32>
    %263 = vector.broadcast %262 : vector<8x1xf32> to vector<8x8xf32>
    %264 = arith.mulf %261, %263 : vector<8x8xf32>
    %265 = arith.truncf %264 : vector<8x8xf32> to vector<8x8xbf16>
    %c8_127 = arith.constant 8 : index
    %c0_128 = arith.constant 0 : index
    %266 = vector.load %arg9[%c8_127, %c0_128] : memref<32x32xbf16, #tpu.memory_space<vmem>>, vector<8x32xbf16>
    %cst_129 = arith.constant dense<0.000000e+00> : vector<8x32xf32>
    %267 = tpu.matmul %265, %266, %cst_129 {dimension_numbers = #tpu.dot_dimension_numbers<[1], [0], [0], [1], [0, 0, 1, 1], [], []>} : vector<8x8xbf16>, vector<8x32xbf16>, vector<8x32xf32> -> vector<8x32xf32>
    %268 = arith.addf %247, %267 : vector<8x32xf32>
    %c0_130 = arith.constant 0 : index
    %c16_131 = arith.constant 16 : index
    %269 = vector.load %arg3[%c0_130, %c16_131] : memref<32x32xbf16, #tpu.memory_space<vmem>>, vector<32x16xbf16>
    %cst_132 = arith.constant dense<0.000000e+00> : vector<8x16xf32>
    %270 = tpu.matmul %207, %269, %cst_132 {dimension_numbers = #tpu.dot_dimension_numbers<[1], [0], [0], [1], [0, 0, 1, 1], [], []>} : vector<8x32xbf16>, vector<32x16xbf16>, vector<8x16xf32> -> vector<8x16xf32>
    %c0_133 = arith.constant 0 : index
    %c16_134 = arith.constant 16 : index
    %271 = vector.load %arg4[%c0_133, %c16_134] : memref<1x32xf32, #tpu.memory_space<vmem>>, vector<1x16xf32>
    %272 = vector.broadcast %271 : vector<1x16xf32> to vector<8x16xf32>
    %273 = arith.addf %270, %272 : vector<8x16xf32>
    %274 = arith.truncf %273 : vector<8x16xf32> to vector<8x16xbf16>
    %c0_135 = arith.constant 0 : index
    %c16_136 = arith.constant 16 : index
    %275 = vector.load %arg5[%c0_135, %c16_136] : memref<32x32xbf16, #tpu.memory_space<vmem>>, vector<32x16xbf16>
    %cst_137 = arith.constant dense<0.000000e+00> : vector<8x16xf32>
    %276 = tpu.matmul %207, %275, %cst_137 {dimension_numbers = #tpu.dot_dimension_numbers<[1], [0], [0], [1], [0, 0, 1, 1], [], []>} : vector<8x32xbf16>, vector<32x16xbf16>, vector<8x16xf32> -> vector<8x16xf32>
    %c0_138 = arith.constant 0 : index
    %c16_139 = arith.constant 16 : index
    %277 = vector.load %arg6[%c0_138, %c16_139] : memref<1x32xf32, #tpu.memory_space<vmem>>, vector<1x16xf32>
    %278 = vector.broadcast %277 : vector<1x16xf32> to vector<8x16xf32>
    %279 = arith.addf %276, %278 : vector<8x16xf32>
    %280 = arith.truncf %279 : vector<8x16xf32> to vector<8x16xbf16>
    %c0_140 = arith.constant 0 : index
    %c16_141 = arith.constant 16 : index
    %281 = vector.load %arg7[%c0_140, %c16_141] : memref<32x32xbf16, #tpu.memory_space<vmem>>, vector<32x16xbf16>
    %cst_142 = arith.constant dense<0.000000e+00> : vector<8x16xf32>
    %282 = tpu.matmul %207, %281, %cst_142 {dimension_numbers = #tpu.dot_dimension_numbers<[1], [0], [0], [1], [0, 0, 1, 1], [], []>} : vector<8x32xbf16>, vector<32x16xbf16>, vector<8x16xf32> -> vector<8x16xf32>
    %c0_143 = arith.constant 0 : index
    %c16_144 = arith.constant 16 : index
    %283 = vector.load %arg8[%c0_143, %c16_144] : memref<1x32xf32, #tpu.memory_space<vmem>>, vector<1x16xf32>
    %284 = vector.broadcast %283 : vector<1x16xf32> to vector<8x16xf32>
    %285 = arith.addf %282, %284 : vector<8x16xf32>
    %286 = arith.truncf %285 : vector<8x16xf32> to vector<8x16xbf16>
    %287 = vector.extract_strided_slice %274 {offsets = [0, 0], sizes = [8, 8], strides = [1, 1]} : vector<8x16xbf16> to vector<8x8xbf16>
    %288 = vector.extract_strided_slice %280 {offsets = [0, 0], sizes = [8, 8], strides = [1, 1]} : vector<8x16xbf16> to vector<8x8xbf16>
    %289 = vector.extract_strided_slice %286 {offsets = [0, 0], sizes = [8, 8], strides = [1, 1]} : vector<8x16xbf16> to vector<8x8xbf16>
    %cst_145 = arith.constant dense<0.000000e+00> : vector<8x8xf32>
    %290 = tpu.matmul %287, %288, %cst_145 {dimension_numbers = #tpu.dot_dimension_numbers<[1], [1], [0], [0], [0, 0, 1, 0], [], []>} : vector<8x8xbf16>, vector<8x8xbf16>, vector<8x8xf32> -> vector<8x8xf32>
    %291 = arith.addf %290, %4 : vector<8x8xf32>
    %cst_146 = arith.constant dense<0xFF800000> : vector<8xf32>
    %292 = vector.multi_reduction <maximumf>, %291, %cst_146 [1] : vector<8x8xf32> to vector<8xf32>
    %293 = vector.shape_cast %292 : vector<8xf32> to vector<8x1xf32>
    %294 = vector.broadcast %293 : vector<8x1xf32> to vector<8x8xf32>
    %295 = arith.subf %291, %294 : vector<8x8xf32>
    %296 = math.exp %295 : vector<8x8xf32>
    %cst_147 = arith.constant dense<0.000000e+00> : vector<8xf32>
    %297 = vector.multi_reduction <add>, %296, %cst_147 [1] : vector<8x8xf32> to vector<8xf32>
    %298 = vector.shape_cast %297 : vector<8xf32> to vector<8x1xf32>
    %299 = arith.truncf %296 : vector<8x8xf32> to vector<8x8xbf16>
    %cst_148 = arith.constant dense<0.000000e+00> : vector<8x8xf32>
    %300 = tpu.matmul %299, %289, %cst_148 {dimension_numbers = #tpu.dot_dimension_numbers<[1], [0], [0], [1], [0, 0, 1, 1], [], []>} : vector<8x8xbf16>, vector<8x8xbf16>, vector<8x8xf32> -> vector<8x8xf32>
    %301 = tpu.reciprocal %298 {approx = true} : vector<8x1xf32> -> vector<8x1xf32>
    %302 = vector.broadcast %301 : vector<8x1xf32> to vector<8x8xf32>
    %303 = arith.mulf %300, %302 : vector<8x8xf32>
    %304 = arith.truncf %303 : vector<8x8xf32> to vector<8x8xbf16>
    %c16_149 = arith.constant 16 : index
    %c0_150 = arith.constant 0 : index
    %305 = vector.load %arg9[%c16_149, %c0_150] : memref<32x32xbf16, #tpu.memory_space<vmem>>, vector<8x32xbf16>
    %cst_151 = arith.constant dense<0.000000e+00> : vector<8x32xf32>
    %306 = tpu.matmul %304, %305, %cst_151 {dimension_numbers = #tpu.dot_dimension_numbers<[1], [0], [0], [1], [0, 0, 1, 1], [], []>} : vector<8x8xbf16>, vector<8x32xbf16>, vector<8x32xf32> -> vector<8x32xf32>
    %307 = arith.addf %268, %306 : vector<8x32xf32>
    %308 = vector.extract_strided_slice %274 {offsets = [0, 8], sizes = [8, 8], strides = [1, 1]} : vector<8x16xbf16> to vector<8x8xbf16>
    %309 = vector.extract_strided_slice %280 {offsets = [0, 8], sizes = [8, 8], strides = [1, 1]} : vector<8x16xbf16> to vector<8x8xbf16>
    %310 = vector.extract_strided_slice %286 {offsets = [0, 8], sizes = [8, 8], strides = [1, 1]} : vector<8x16xbf16> to vector<8x8xbf16>
    %cst_152 = arith.constant dense<0.000000e+00> : vector<8x8xf32>
    %311 = tpu.matmul %308, %309, %cst_152 {dimension_numbers = #tpu.dot_dimension_numbers<[1], [1], [0], [0], [0, 0, 1, 0], [], []>} : vector<8x8xbf16>, vector<8x8xbf16>, vector<8x8xf32> -> vector<8x8xf32>
    %312 = arith.addf %311, %4 : vector<8x8xf32>
    %cst_153 = arith.constant dense<0xFF800000> : vector<8xf32>
    %313 = vector.multi_reduction <maximumf>, %312, %cst_153 [1] : vector<8x8xf32> to vector<8xf32>
    %314 = vector.shape_cast %313 : vector<8xf32> to vector<8x1xf32>
    %315 = vector.broadcast %314 : vector<8x1xf32> to vector<8x8xf32>
    %316 = arith.subf %312, %315 : vector<8x8xf32>
    %317 = math.exp %316 : vector<8x8xf32>
    %cst_154 = arith.constant dense<0.000000e+00> : vector<8xf32>
    %318 = vector.multi_reduction <add>, %317, %cst_154 [1] : vector<8x8xf32> to vector<8xf32>
    %319 = vector.shape_cast %318 : vector<8xf32> to vector<8x1xf32>
    %320 = arith.truncf %317 : vector<8x8xf32> to vector<8x8xbf16>
    %cst_155 = arith.constant dense<0.000000e+00> : vector<8x8xf32>
    %321 = tpu.matmul %320, %310, %cst_155 {dimension_numbers = #tpu.dot_dimension_numbers<[1], [0], [0], [1], [0, 0, 1, 1], [], []>} : vector<8x8xbf16>, vector<8x8xbf16>, vector<8x8xf32> -> vector<8x8xf32>
    %322 = tpu.reciprocal %319 {approx = true} : vector<8x1xf32> -> vector<8x1xf32>
    %323 = vector.broadcast %322 : vector<8x1xf32> to vector<8x8xf32>
    %324 = arith.mulf %321, %323 : vector<8x8xf32>
    %325 = arith.truncf %324 : vector<8x8xf32> to vector<8x8xbf16>
    %c24_156 = arith.constant 24 : index
    %c0_157 = arith.constant 0 : index
    %326 = vector.load %arg9[%c24_156, %c0_157] : memref<32x32xbf16, #tpu.memory_space<vmem>>, vector<8x32xbf16>
    %cst_158 = arith.constant dense<0.000000e+00> : vector<8x32xf32>
    %327 = tpu.matmul %325, %326, %cst_158 {dimension_numbers = #tpu.dot_dimension_numbers<[1], [0], [0], [1], [0, 0, 1, 1], [], []>} : vector<8x8xbf16>, vector<8x32xbf16>, vector<8x32xf32> -> vector<8x32xf32>
    %328 = arith.addf %307, %327 : vector<8x32xf32>
    %329 = arith.addf %206, %328 : vector<8x32xf32>
    %330 = vector.broadcast %5 : vector<1x32xf32> to vector<8x32xf32>
    %331 = arith.addf %329, %330 : vector<8x32xf32>
    %cst_159 = arith.constant dense<0.000000e+00> : vector<8xf32>
    %332 = vector.multi_reduction <add>, %331, %cst_159 [1] : vector<8x32xf32> to vector<8xf32>
    %333 = vector.shape_cast %332 : vector<8xf32> to vector<8x1xf32>
    %cst_160 = arith.constant 3.200000e+01 : f32
    %334 = vector.broadcast %cst_160 : f32 to vector<8x1xf32>
    %335 = arith.divf %333, %334 : vector<8x1xf32>
    %336 = vector.broadcast %335 : vector<8x1xf32> to vector<8x32xf32>
    %337 = arith.subf %331, %336 : vector<8x32xf32>
    %338 = arith.mulf %337, %337 : vector<8x32xf32>
    %cst_161 = arith.constant dense<0.000000e+00> : vector<8xf32>
    %339 = vector.multi_reduction <add>, %338, %cst_161 [1] : vector<8x32xf32> to vector<8xf32>
    %340 = vector.shape_cast %339 : vector<8xf32> to vector<8x1xf32>
    %cst_162 = arith.constant 3.200000e+01 : f32
    %341 = vector.broadcast %cst_162 : f32 to vector<8x1xf32>
    %342 = arith.divf %340, %341 : vector<8x1xf32>
    %343 = vector.broadcast %335 : vector<8x1xf32> to vector<8x32xf32>
    %344 = arith.subf %331, %343 : vector<8x32xf32>
    %cst_163 = arith.constant 9.99999974E-6 : f32
    %345 = vector.broadcast %cst_163 : f32 to vector<8x1xf32>
    %346 = arith.addf %342, %345 : vector<8x1xf32>
    %347 = math.rsqrt %346 : vector<8x1xf32>
    %348 = vector.broadcast %347 : vector<8x1xf32> to vector<8x32xf32>
    %349 = arith.mulf %344, %348 : vector<8x32xf32>
    %350 = vector.broadcast %7 : vector<1x32xf32> to vector<8x32xf32>
    %351 = arith.mulf %349, %350 : vector<8x32xf32>
    %352 = vector.broadcast %8 : vector<1x32xf32> to vector<8x32xf32>
    %353 = arith.addf %351, %352 : vector<8x32xf32>
    %354 = arith.truncf %353 : vector<8x32xf32> to vector<8x32xbf16>
    %cst_164 = arith.constant 0.000000e+00 : f32
    %355 = vector.broadcast %cst_164 : f32 to vector<8x32xf32>
    %c0_165 = arith.constant 0 : index
    %c0_166 = arith.constant 0 : index
    %356 = vector.load %arg13[%c0_165, %c0_166] : memref<32x64xbf16, #tpu.memory_space<vmem>>, vector<32x32xbf16>
    %cst_167 = arith.constant dense<0.000000e+00> : vector<8x32xf32>
    %357 = tpu.matmul %354, %356, %cst_167 {dimension_numbers = #tpu.dot_dimension_numbers<[1], [0], [0], [1], [0, 0, 1, 1], [], []>} : vector<8x32xbf16>, vector<32x32xbf16>, vector<8x32xf32> -> vector<8x32xf32>
    %c0_168 = arith.constant 0 : index
    %c0_169 = arith.constant 0 : index
    %358 = vector.load %arg14[%c0_168, %c0_169] : memref<1x64xf32, #tpu.memory_space<vmem>>, vector<1x32xf32>
    %359 = vector.broadcast %358 : vector<1x32xf32> to vector<8x32xf32>
    %360 = arith.addf %357, %359 : vector<8x32xf32>
    %cst_170 = arith.constant 0.000000e+00 : f32
    %361 = vector.broadcast %cst_170 : f32 to vector<8x32xf32>
    %362 = arith.maximumf %360, %361 : vector<8x32xf32>
    %363 = arith.truncf %362 : vector<8x32xf32> to vector<8x32xbf16>
    %c0_171 = arith.constant 0 : index
    %c0_172 = arith.constant 0 : index
    %364 = vector.load %arg15[%c0_171, %c0_172] : memref<64x32xbf16, #tpu.memory_space<vmem>>, vector<32x32xbf16>
    %cst_173 = arith.constant dense<0.000000e+00> : vector<8x32xf32>
    %365 = tpu.matmul %363, %364, %cst_173 {dimension_numbers = #tpu.dot_dimension_numbers<[1], [0], [0], [1], [0, 0, 1, 1], [], []>} : vector<8x32xbf16>, vector<32x32xbf16>, vector<8x32xf32> -> vector<8x32xf32>
    %366 = arith.addf %355, %365 : vector<8x32xf32>
    %c0_174 = arith.constant 0 : index
    %c32_175 = arith.constant 32 : index
    %367 = vector.load %arg13[%c0_174, %c32_175] : memref<32x64xbf16, #tpu.memory_space<vmem>>, vector<32x32xbf16>
    %cst_176 = arith.constant dense<0.000000e+00> : vector<8x32xf32>
    %368 = tpu.matmul %354, %367, %cst_176 {dimension_numbers = #tpu.dot_dimension_numbers<[1], [0], [0], [1], [0, 0, 1, 1], [], []>} : vector<8x32xbf16>, vector<32x32xbf16>, vector<8x32xf32> -> vector<8x32xf32>
    %c0_177 = arith.constant 0 : index
    %c32_178 = arith.constant 32 : index
    %369 = vector.load %arg14[%c0_177, %c32_178] : memref<1x64xf32, #tpu.memory_space<vmem>>, vector<1x32xf32>
    %370 = vector.broadcast %369 : vector<1x32xf32> to vector<8x32xf32>
    %371 = arith.addf %368, %370 : vector<8x32xf32>
    %cst_179 = arith.constant 0.000000e+00 : f32
    %372 = vector.broadcast %cst_179 : f32 to vector<8x32xf32>
    %373 = arith.maximumf %371, %372 : vector<8x32xf32>
    %374 = arith.truncf %373 : vector<8x32xf32> to vector<8x32xbf16>
    %c32_180 = arith.constant 32 : index
    %c0_181 = arith.constant 0 : index
    %375 = vector.load %arg15[%c32_180, %c0_181] : memref<64x32xbf16, #tpu.memory_space<vmem>>, vector<32x32xbf16>
    %cst_182 = arith.constant dense<0.000000e+00> : vector<8x32xf32>
    %376 = tpu.matmul %374, %375, %cst_182 {dimension_numbers = #tpu.dot_dimension_numbers<[1], [0], [0], [1], [0, 0, 1, 1], [], []>} : vector<8x32xbf16>, vector<32x32xbf16>, vector<8x32xf32> -> vector<8x32xf32>
    %377 = arith.addf %366, %376 : vector<8x32xf32>
    %378 = arith.addf %353, %377 : vector<8x32xf32>
    %379 = vector.broadcast %6 : vector<1x32xf32> to vector<8x32xf32>
    %380 = arith.addf %378, %379 : vector<8x32xf32>
    %cst_183 = arith.constant dense<0.000000e+00> : vector<8xf32>
    %381 = vector.multi_reduction <add>, %380, %cst_183 [1] : vector<8x32xf32> to vector<8xf32>
    %382 = vector.shape_cast %381 : vector<8xf32> to vector<8x1xf32>
    %cst_184 = arith.constant 3.200000e+01 : f32
    %383 = vector.broadcast %cst_184 : f32 to vector<8x1xf32>
    %384 = arith.divf %382, %383 : vector<8x1xf32>
    %385 = vector.broadcast %384 : vector<8x1xf32> to vector<8x32xf32>
    %386 = arith.subf %380, %385 : vector<8x32xf32>
    %387 = arith.mulf %386, %386 : vector<8x32xf32>
    %cst_185 = arith.constant dense<0.000000e+00> : vector<8xf32>
    %388 = vector.multi_reduction <add>, %387, %cst_185 [1] : vector<8x32xf32> to vector<8xf32>
    %389 = vector.shape_cast %388 : vector<8xf32> to vector<8x1xf32>
    %cst_186 = arith.constant 3.200000e+01 : f32
    %390 = vector.broadcast %cst_186 : f32 to vector<8x1xf32>
    %391 = arith.divf %389, %390 : vector<8x1xf32>
    %392 = vector.broadcast %384 : vector<8x1xf32> to vector<8x32xf32>
    %393 = arith.subf %380, %392 : vector<8x32xf32>
    %cst_187 = arith.constant 9.99999974E-6 : f32
    %394 = vector.broadcast %cst_187 : f32 to vector<8x1xf32>
    %395 = arith.addf %391, %394 : vector<8x1xf32>
    %396 = math.rsqrt %395 : vector<8x1xf32>
    %397 = vector.broadcast %396 : vector<8x1xf32> to vector<8x32xf32>
    %398 = arith.mulf %393, %397 : vector<8x32xf32>
    %399 = vector.broadcast %9 : vector<1x32xf32> to vector<8x32xf32>
    %400 = arith.mulf %398, %399 : vector<8x32xf32>
    %401 = vector.broadcast %10 : vector<1x32xf32> to vector<8x32xf32>
    %402 = arith.addf %400, %401 : vector<8x32xf32>
    %c0_188 = arith.constant 0 : index
    %c0_189 = arith.constant 0 : index
    %c0_190 = arith.constant 0 : index
    %403 = vector.load %arg19[%c0_188, %c0_189, %c0_190] : memref<1x8x32xf32, #tpu.memory_space<vmem>>, vector<1x8x32xf32>
    %404 = vector.shape_cast %403 : vector<1x8x32xf32> to vector<8x32xf32>
    %405 = vector.shape_cast %402 : vector<8x32xf32> to vector<1x8x32xf32>
    tpu.vector_store %arg19[%c0_188, %c0_189, %c0_190], %405 {strides = array<i32>} : memref<1x8x32xf32, #tpu.memory_space<vmem>>, vector<1x8x32xf32>,
    return
  }
  func.func @transform_0(%arg0: i32) -> (i32, i32, i32) {
    %c0_i32 = arith.constant 0 : i32
    %c0_i32_0 = arith.constant 0 : i32
    %c0_i32_1 = arith.constant 0 : i32
    return %arg0, %c0_i32, %c0_i32_0 : i32, i32, i32
  }
  func.func @transform_1(%arg0: i32) -> (i32, i32, i32) {
    %c0_i32 = arith.constant 0 : i32
    %c0_i32_0 = arith.constant 0 : i32
    %c0_i32_1 = arith.constant 0 : i32
    return %arg0, %c0_i32, %c0_i32_0 : i32, i32, i32
  }
  func.func @transform_2(%arg0: i32) -> (i32, i32) {
    %c0_i32 = arith.constant 0 : i32
    %c0_i32_0 = arith.constant 0 : i32
    %c0_i32_1 = arith.constant 0 : i32
    return %c0_i32, %c0_i32_0 : i32, i32
  }
  func.func @transform_3(%arg0: i32) -> (i32, i32) {
    %c0_i32 = arith.constant 0 : i32
    %c0_i32_0 = arith.constant 0 : i32
    %c0_i32_1 = arith.constant 0 : i32
    return %c0_i32, %c0_i32_0 : i32, i32
  }
  func.func @transform_4(%arg0: i32) -> (i32, i32) {
    %c0_i32 = arith.constant 0 : i32
    %c0_i32_0 = arith.constant 0 : i32
    %c0_i32_1 = arith.constant 0 : i32
    return %c0_i32, %c0_i32_0 : i32, i32
  }
  func.func @transform_5(%arg0: i32) -> (i32, i32) {
    %c0_i32 = arith.constant 0 : i32
    %c0_i32_0 = arith.constant 0 : i32
    %c0_i32_1 = arith.constant 0 : i32
    return %c0_i32, %c0_i32_0 : i32, i32
  }
  func.func @transform_6(%arg0: i32) -> (i32, i32) {
    %c0_i32 = arith.constant 0 : i32
    %c0_i32_0 = arith.constant 0 : i32
    %c0_i32_1 = arith.constant 0 : i32
    return %c0_i32, %c0_i32_0 : i32, i32
  }
  func.func @transform_7(%arg0: i32) -> (i32, i32) {
    %c0_i32 = arith.constant 0 : i32
    %c0_i32_0 = arith.constant 0 : i32
    %c0_i32_1 = arith.constant 0 : i32
    return %c0_i32, %c0_i32_0 : i32, i32
  }
  func.func @transform_8(%arg0: i32) -> (i32, i32) {
    %c0_i32 = arith.constant 0 : i32
    %c0_i32_0 = arith.constant 0 : i32
    %c0_i32_1 = arith.constant 0 : i32
    return %c0_i32, %c0_i32_0 : i32, i32
  }
  func.func @transform_9(%arg0: i32) -> (i32, i32) {
    %c0_i32 = arith.constant 0 : i32
    %c0_i32_0 = arith.constant 0 : i32
    %c0_i32_1 = arith.constant 0 : i32
    return %c0_i32, %c0_i32_0 : i32, i32
  }
  func.func @transform_10(%arg0: i32) -> (i32, i32) {
    %c0_i32 = arith.constant 0 : i32
    %c0_i32_0 = arith.constant 0 : i32
    %c0_i32_1 = arith.constant 0 : i32
    return %c0_i32, %c0_i32_0 : i32, i32
  }
  func.func @transform_11(%arg0: i32) -> (i32, i32) {
    %c0_i32 = arith.constant 0 : i32
    %c0_i32_0 = arith.constant 0 : i32
    %c0_i32_1 = arith.constant 0 : i32
    return %c0_i32, %c0_i32_0 : i32, i32
  }
  func.func @transform_12(%arg0: i32) -> (i32, i32) {
    %c0_i32 = arith.constant 0 : i32
    %c0_i32_0 = arith.constant 0 : i32
    %c0_i32_1 = arith.constant 0 : i32
    return %c0_i32, %c0_i32_0 : i32, i32
  }
  func.func @transform_13(%arg0: i32) -> (i32, i32) {
    %c0_i32 = arith.constant 0 : i32
    %c0_i32_0 = arith.constant 0 : i32
    %c0_i32_1 = arith.constant 0 : i32
    return %c0_i32, %c0_i32_0 : i32, i32
  }
  func.func @transform_14(%arg0: i32) -> (i32, i32) {
    %c0_i32 = arith.constant 0 : i32
    %c0_i32_0 = arith.constant 0 : i32
    %c0_i32_1 = arith.constant 0 : i32
    return %c0_i32, %c0_i32_0 : i32, i32
  }
  func.func @transform_15(%arg0: i32) -> (i32, i32) {
    %c0_i32 = arith.constant 0 : i32
    %c0_i32_0 = arith.constant 0 : i32
    %c0_i32_1 = arith.constant 0 : i32
    return %c0_i32, %c0_i32_0 : i32, i32
  }
  func.func @transform_16(%arg0: i32) -> (i32, i32) {
    %c0_i32 = arith.constant 0 : i32
    %c0_i32_0 = arith.constant 0 : i32
    %c0_i32_1 = arith.constant 0 : i32
    return %c0_i32, %c0_i32_0 : i32, i32
  }
  func.func @transform_17(%arg0: i32) -> (i32, i32) {
    %c0_i32 = arith.constant 0 : i32
    %c0_i32_0 = arith.constant 0 : i32
    %c0_i32_1 = arith.constant 0 : i32
    return %c0_i32, %c0_i32_0 : i32, i32
  }
  func.func @transform_18(%arg0: i32) -> (i32, i32, i32) {
    %c0_i32 = arith.constant 0 : i32
    %c0_i32_0 = arith.constant 0 : i32
    %c0_i32_1 = arith.constant 0 : i32
    return %arg0, %c0_i32, %c0_i32_0 : i32, i32, i32
  }
}

</mosaic_0001>

<bundles_post_ra>
// kernel: tpu_custom_call.1
= control target key start
LH: loop header
LB: loop body
LE: loop exit
PB: predicated region body
PF: predicated region fallthrough
CT: control target
= control target key end

     0   :  { %s4991_s0 = inlined_call_operand.hbm [shape: f32[2,8,32], index: 0, kind: input, shape index: {}, may-alias: {0,18}]   ;;  %s4992_s1 = inlined_call_operand.hbm [shape: bf16[2,8,8], index: 1, kind: input, shape index: {}]   ;;  %s4993_s2 = inlined_call_operand.vmem [shape: bf16[32,32], index: 2, kind: input, shape index: {}]   ;;  %s4994_s3 = inlined_call_operand.hbm [shape: f32[1,32], index: 3, kind: input, shape index: {}]   ;;  %s4995_s4 = inlined_call_operand.vmem [shape: bf16[32,32], index: 4, kind: input, shape index: {}]   ;;  %s4996_s5 = inlined_call_operand.hbm [shape: f32[1,32], index: 5, kind: input, shape index: {}]   ;;  %s4997_s6 = inlined_call_operand.vmem [shape: bf16[32,32], index: 6, kind: input, shape index: {}]   ;;  %s4998_s7 = inlined_call_operand.hbm [shape: f32[1,32], index: 7, kind: input, shape index: {}]   ;;  %s4999_s8 = inlined_call_operand.vmem [shape: bf16[32,32], index: 8, kind: input, shape index: {}]   ;;  %s5000_s9 = inlined_call_operand.hbm [shape: f32[1,32], index: 9, kind: input, shape index: {}]   ;;  %s5001_s10 = inlined_call_operand.vmem [shape: f32[1,32], index: 10, kind: input, shape index: {}]   ;;  %s5002_s11 = inlined_call_operand.vmem [shape: f32[1,32], index: 11, kind: input, shape index: {}]   ;;  %s5003_s12 = inlined_call_operand.vmem [shape: bf16[32,64], index: 12, kind: input, shape index: {}]   ;;  %s5004_s13 = inlined_call_operand.vmem [shape: f32[1,64], index: 13, kind: input, shape index: {}]   ;;  %s5005_s14 = inlined_call_operand.vmem [shape: bf16[64,32], index: 14, kind: input, shape index: {}]   ;;  %s5006_s15 = inlined_call_operand.vmem [shape: f32[1,32], index: 15, kind: input, shape index: {}]   ;;  %s5007_s16 = inlined_call_operand.vmem [shape: f32[1,32], index: 16, kind: input, shape index: {}]   ;;  %s5008_s17 = inlined_call_operand.vmem [shape: f32[1,32], index: 17, kind: input, shape index: {}]   ;;  %s5009_s18 = inlined_call_operand.hbm [shape: f32[2,8,32], index: 18, kind: output, shape index: {}, may-alias: {0,18}]  }
   0x1   :  { %5026 = sst [smem:[#allocation26_spill]] %s4991_s0 }
   0x2   :  { %5027 = sst [smem:[#allocation27_spill]] %s4992_s1 }
   0x3   :  { %5028 = sst [smem:[#allocation28_spill]] %s4993_s2 }
   0x4   :  { %5029 = sst [smem:[#allocation29_spill]] %s4994_s3 }
   0x5   :  { %5030 = sst [smem:[#allocation30_spill]] %s4996_s5 }
   0x6   :  { %5031 = sst [smem:[#allocation31_spill]] %s4998_s7 }
   0x7   :  { %5032 = sst [smem:[#allocation32_spill]] %s5000_s9 }
   0x8   :  { %5033 = sst [smem:[#allocation33_spill]] %s5008_s17 }
   0x9   :  { %5034 = sst [smem:[#allocation34_spill]] %s5009_s18 }
   0xa   :  { %23 = vsyncpa [#allocation3], 0 }
   0xb   :  { %25 = vsyncpa [#allocation3 + $0x1], 0 }
   0xc   :  { %26 = vsyncpa [#allocation6], 0 }
   0xd   :  { %28 = vsyncpa [#allocation6 + $0x1], 0 }
   0xe   :  { %29 = vsyncpa [#allocation9], 0 }
   0xf   :  { %30 = vsyncpa [#allocation12], 0 }
  0x10   :  { %31 = vsyncpa [#allocation4], 0 }
  0x11   :  { %33 = vsyncpa [#allocation4 + $0x1], 0  ;;  %s4189_s27 = smov 0   ;;  %s4191_s28 = smov 0  }
  0x12   :  { %s4193_s29 = smov 0   ;;  %s4195_s30 = smov 0  }
  0x13 LB: > { %5035 = sst [smem:[#allocation20_spill]] %s4068_s27  ;;  %s4082_s0 = smov [#allocation7]   ;;  %s4080_s30 = sphi %s4195_s30, %s5073_s30   ;;  %s4076_s29 = sphi %s4193_s29, %s5075_s29   ;;  %s4072_s28 = sphi %s4191_s28, %s5077_s28   ;;  %s4068_s27 = sphi %s4189_s27, %s5076_s27  }
  0x14   : > { %5036 = sst [smem:[#allocation21_spill]] %s4076_s29  ;;  %s474_s19 = sshll.u32 %s4082_s0, 4  ;;  %s475_s19 = int_to_ptr.vmem [resolvable:$true] %s474_s19 }
  0x15   : > { %s4210_s1 = sadd.s32 4294967295, %s4080_s30   ;;  %p3191_p0 = scmp.ge.s32.totalorder %s4080_s30, 1 }
  0x16   : > { %p5019_p1 = scmp.eq.s32.totalorder %s4210_s1, 0  ;;  %p458_p2 = scmp.lt.s32.totalorder %s4080_s30, 3 }
  0x17   : > { %s4083_s21 = smov [#allocation8]   ;;  %s4084_s2 = smov [#allocation10]  }
  0x18   : > { %p4215_p3 = pnand %p3191_p0, %p458_p2  ;;  %s488_s22 = sshll.u32 %s4083_s21, 4  ;;  %s4222_s22 = int_to_ptr.vmem [resolvable:$true] %s488_s22 }
  0x19   : > { %s502_s23 = sshll.u32 %s4084_s2, 4  ;;  %s4085_s25 = smov [#allocation11]   ;;  %s4230_s23 = int_to_ptr.vmem [resolvable:$true] %s502_s23 }
  0x1a   : > { %s5037_s20 = scalar_select %p4215_p3, 1, 0 }
  0x1b   : > { %p3713_p5 = pneg %p4215_p3  ;;  %s4232_s26 = sshll.u32 %s4085_s25, 4  ;;  %s517_s26 = int_to_ptr.vmem [resolvable:$true] %s4232_s26 }
  0x1c   : > { %s3851_s0 = scalar_lea.vmem %s475_s19, 16  ;;  %s3858_s21 = scalar_lea.vmem %s475_s19, 32 }
  0x1d   : > { %p4226_p6 = pnand %p3713_p5, %p5019_p1  ;;  %p3852_p8 = scmp.ne.s32.totalorder %s475_s19, %s3851_s0 }
  0x1e   : > { %p3859_p11 = scmp.lt.s32.totalorder %s475_s19, %s475_s19  ;;  %p3860_p12 = scmp.lt.s32.totalorder %s3858_s21, %s3851_s0 }
  0x1f   : > { %p3842_p7 = pneg %p4226_p6 }
  0x20   : > { %p3861_p13 = por %p3860_p12, %p3859_p11 }
  0x21   : > { %p3854_p9 = pnand %p3852_p8, %p3842_p7 }
  0x23   : > { %p3855_p10 = pneg %p3854_p9 }
  0x25   : > { %p3862_p0 = pnand %p3861_p13, %p3855_p10 }
  0x27   : > { %3865 = shalt.err (!%p3862_p0)
}
  0x28   : > { %s5039_s3 = sld [smem:[#allocation29_spill]]  ;;  %s3877_s25 = scalar_lea.vmem %s4222_s22, 16 }
  0x29   : > { %p3878_p2 = scmp.ne.s32.totalorder %s4222_s22, %s3877_s25  ;;  %s3884_s0 = scalar_lea.vmem %s4222_s22, 32 }
  0x2a   : > { %p3885_p9 = scmp.lt.s32.totalorder %s4222_s22, %s4222_s22  ;;  %p3886_p10 = scmp.lt.s32.totalorder %s3884_s0, %s3877_s25 }
  0x2b   : > { %p3880_p5 = pnand %p3878_p2, %p3842_p7 }
  0x2c   : > { %p3887_p11 = por %p3886_p10, %p3885_p9 }
  0x2d   : > { %p3881_p8 = pneg %p3880_p5 }
  0x2e   : > { %3716 = dma.hbm_to_vmem [thread:$0]  (!%p4226_p6), %s5039_s3, 16, %s475_s19, [#allocation6]  }
  0x2f   : > { %p3888_p12 = pnand %p3887_p11, %p3881_p8 }
  0x31   : > { %3891 = shalt.err (!%p3888_p12)
}
  0x32   : > { %s5040_s5 = sld [smem:[#allocation30_spill]]  ;;  %s3903_s19 = scalar_lea.vmem %s4230_s23, 16 }
  0x33   : > { %p3904_p13 = scmp.ne.s32.totalorder %s4230_s23, %s3903_s19  ;;  %s3910_s2 = scalar_lea.vmem %s4230_s23, 32 }
  0x34   : > { %p3911_p5 = scmp.lt.s32.totalorder %s4230_s23, %s4230_s23  ;;  %p3912_p8 = scmp.lt.s32.totalorder %s3910_s2, %s3903_s19 }
  0x35   : > { %p3906_p0 = pnand %p3904_p13, %p3842_p7 }
  0x36   : > { %p3913_p9 = por %p3912_p8, %p3911_p5 }
  0x37   : > { %p3907_p2 = pneg %p3906_p0 }
  0x38   : > { %3719 = dma.hbm_to_vmem [thread:$0]  (!%p4226_p6), %s5040_s5, 16, %s4222_s22, [#allocation9]  }
  0x39   : > { %p3914_p10 = pnand %p3913_p9, %p3907_p2 }
  0x3b   : > { %3917 = shalt.err (!%p3914_p10)
}
  0x3c   : > { %s5041_s7 = sld [smem:[#allocation31_spill]]  ;;  %s3929_s22 = scalar_lea.vmem %s517_s26, 16 }
  0x3d   : > { %p3930_p11 = scmp.ne.s32.totalorder %s517_s26, %s3929_s22  ;;  %s3936_s18 = scalar_lea.vmem %s517_s26, 32 }
  0x3e   : > { %p3937_p0 = scmp.lt.s32.totalorder %s517_s26, %s517_s26  ;;  %p3938_p2 = scmp.lt.s32.totalorder %s3936_s18, %s3929_s22 }
  0x3f   : > { %p3932_p12 = pnand %p3930_p11, %p3842_p7 }
  0x40   : > { %p3939_p5 = por %p3938_p2, %p3937_p0 }
  0x41   : > { %p3933_p13 = pneg %p3932_p12 }
  0x42   : > { %3722 = dma.hbm_to_vmem [thread:$0]  (!%p4226_p6), %s5041_s7, 16, %s4230_s23, [#allocation9]  }
  0x43   : > { %p3940_p8 = pnand %p3939_p5, %p3933_p13 }
  0x45   : > { %3943 = shalt.err (!%p3940_p8)
}
  0x46   : > { %s5042_s9 = sld [smem:[#allocation32_spill]]  ;;  %s3190_s23 = sadd.s32 4294967294, %s4080_s30  }
  0x47   : > { %s4283_s24 = sadd.s32 1, %s4080_s30   ;;  %s46_s25 = sadd.s32 1, %s4076_s29 }
  0x48   : > { %5043 = sst [smem:[#allocation22_spill]] %s4283_s24  ;;  %s43_s2 = ssub.s32 %s4080_s30, %s4283_s24 }
  0x49   : > { %p44_p7 = scmp.eq.s32.totalorder %s43_s2, 0  ;;  %p53_p9 = scmp.ne.s32.totalorder %s4076_s29, %s4072_s28 }
  0x4a   : > { %p54_p10 = scmp.eq.s32.totalorder %s4080_s30, 0  ;;  %p59_p11 = scmp.ne.s32.totalorder %s4072_s28, %s4068_s27 }
  0x4b   : > { %s4294_s0 = scalar_select %p44_p7, %s4076_s29, %s46_s25  }
  0x4c   : > { %3725 = dma.hbm_to_vmem [thread:$0]  (!%p4226_p6), %s5042_s9, 16, %s517_s26, [#allocation12]  }
  0x4d   : > { %5044 = sst [smem:[#allocation23_spill]] %s4294_s0  ;;  %p4296_p12 = por %p54_p10, %p53_p9 }
  0x4e   : > { %p4302_p6 = por %p5019_p1, %p59_p11  ;;  %p445_p13 = scmp.eq.s32.totalorder %s4210_s1, 1 }
  0x4f   : > { %p451_p0 = scmp.eq.s32.totalorder %s3190_s23, 1  ;;  %p3741_p2 = scmp.lt.s32.totalorder %s4080_s30, 2 }
  0x50   : > { %s5046_s26 = scalar_select %p4302_p6, 1, 0 }
  0x51   : > { %s4309_s18 = sand.u32 1, %s4076_s29   ;;  %p4311_p5 = por %p445_p13, %p53_p9 }
  0x52   : > { %p4315_p8 = por %p451_p0, %p59_p11  ;;  %s3197_s2 = sshll.u32 %s4309_s18, 3 }
  0x53   : > { %s5047_s21 = scalar_select %p4311_p5, 1, 0 }
  0x54   : > { %s5049_s19 = scalar_select %p4315_p8, 1, 0 }
  0x55   : > { %5048 = sst [smem:[#allocation24_spill]] %s5047_s21  ;;  %s3198_s25 = sshll.u32 %s4080_s30, 7 }
  0x56   : > { %5050 = sst [smem:[#allocation25_spill]] %s5049_s19  ;;  %s555_s9 = scalar_lea.vmem [#allocation2], %s3197_s2 }
  0x57   : > { %s5051_s7 = sld [smem:[#allocation26_spill]]  ;;  %s562_s0 = sshll.u32 %s555_s9, 4  ;;  %s4326_s0 = int_to_ptr.vmem [resolvable:$true] %s562_s0 }
  0x58   : > { %p4330_p7 = pnand %p3741_p2, %p4296_p12  ;;  %s552_s27 = scalar_lea.sflag [#allocation3], %s4309_s18 }
  0x5a   : > { %p3946_p10 = pneg %p4330_p7 }
  0x5d   : > { %s4324_s23 = scalar_lea.hbm %s5051_s7, %s3198_s25  ;;  %s3949_s22 = scalar_lea.hbm %s5051_s7, 256 }
  0x5e   : > { %s3944_s3 = scalar_lea.hbm %s4324_s23, 128  ;;  %p3950_p12 = scmp.lt.s32.totalorder %s4324_s23, %s5051_s7 }
  0x5f   : > { %p3945_p9 = scmp.ne.s32.totalorder %s4324_s23, %s3944_s3  ;;  %p3951_p0 = scmp.lt.s32.totalorder %s3949_s22, %s3944_s3 }
  0x61   : > { %p3947_p11 = pnand %p3946_p10, %p3945_p9  ;;  %p3952_p2 = por %p3951_p0, %p3950_p12 }
  0x63   : > { %p3948_p13 = pneg %p3947_p11 }
  0x65   : > { %p3953_p4 = pnand %p3952_p2, %p3948_p13 }
  0x67   : > { %3956 = shalt.err (!%p3953_p4)
}
  0x68   : > { %s3957_s24 = scalar_lea.vmem %s4326_s0, 128  ;;  %s4086_s5 = smov [#allocation2]  }
  0x69   : > { %p3958_p1 = scmp.ne.s32.totalorder %s4326_s0, %s3957_s24  ;;  %s3962_s9 = sshll.u32 %s4086_s5, 4  ;;  %s3963_s9 = int_to_ptr.vmem [resolvable:$false] %s3962_s9 }
  0x6a   : > { %s3964_s19 = scalar_lea.vmem %s3963_s9, 256  ;;  %p3965_p8 = scmp.lt.s32.totalorder %s4326_s0, %s3963_s9 }
  0x6b   : > { %p3960_p9 = pnand %p3958_p1, %p3946_p10  ;;  %p3966_p5 = scmp.lt.s32.totalorder %s3964_s19, %s3957_s24 }
  0x6d   : > { %p3961_p11 = pneg %p3960_p9  ;;  %p3967_p6 = por %p3966_p5, %p3965_p8 }
  0x6f   : > { %p3968_p12 = pnand %p3967_p6, %p3961_p11 }
  0x71   : > { %3971 = shalt.err (!%p3968_p12)
}
  0x72   : > { %3729 = dma.hbm_to_vmem [thread:$0]  (!%p4330_p7), %s4324_s23, 128, %s4326_s0, %s552_s27  }
  0x73   : > { %s3200_s3 = sshll.u32 %s4080_s30, 6  ;;  %s5053_s25 = sld [smem:[#allocation27_spill]] }
  0x74   : > { %s5054_s9 = sshll.u32 %s4309_s18, 2  ;;  %s5055_s7 = sand.u32 1, %s4080_s30  }
  0x75   : > { %s573_s24 = scalar_lea.vmem [#allocation5], %s5054_s9  ;;  %s570_s21 = scalar_lea.sflag [#allocation6], %s5055_s7 }
  0x76   : > { %s580_s19 = sshll.u32 %s573_s24, 4  ;;  %s581_s19 = int_to_ptr.vmem [resolvable:$true] %s580_s19 }
  0x79   : > { %s4365_s5 = scalar_lea.hbm %s5053_s25, %s3200_s3  ;;  %s3977_s23 = scalar_lea.hbm %s5053_s25, 128 }
  0x7a   : > { %s3972_s17 = scalar_lea.hbm %s4365_s5, 64  ;;  %p3978_p5 = scmp.lt.s32.totalorder %s4365_s5, %s5053_s25 }
  0x7b   : > { %p3973_p1 = scmp.ne.s32.totalorder %s4365_s5, %s3972_s17  ;;  %p3979_p8 = scmp.lt.s32.totalorder %s3977_s23, %s3972_s17 }
  0x7d   : > { %p3975_p4 = pnand %p3973_p1, %p3946_p10  ;;  %p3980_p13 = por %p3979_p8, %p3978_p5 }
  0x7f   : > { %p3976_p6 = pneg %p3975_p4 }
  0x81   : > { %p3981_p0 = pnand %p3980_p13, %p3976_p6 }
  0x83   : > { %3984 = shalt.err (!%p3981_p0)
}
  0x84   : > { %s3985_s22 = scalar_lea.vmem %s581_s19, 64  ;;  %s4087_s7 = smov [#allocation5]  }
  0x85   : > { %p3986_p2 = scmp.ne.s32.totalorder %s581_s19, %s3985_s22  ;;  %s3990_s2 = sshll.u32 %s4087_s7, 4  ;;  %s3991_s2 = int_to_ptr.vmem [resolvable:$false] %s3990_s2 }
  0x86   : > { %s3992_s9 = scalar_lea.vmem %s3991_s2, 128  ;;  %p3993_p12 = scmp.lt.s32.totalorder %s581_s19, %s3991_s2 }
  0x87   : > { %p3988_p9 = pnand %p3986_p2, %p3946_p10  ;;  %p3994_p1 = scmp.lt.s32.totalorder %s3992_s9, %s3985_s22 }
  0x89   : > { %p3989_p11 = pneg %p3988_p9  ;;  %p3995_p4 = por %p3994_p1, %p3993_p12 }
  0x8b   : > { %p3996_p3 = pnand %p3995_p4, %p3989_p11 }
  0x8d   : > { %3999 = shalt.err (!%p3996_p3)
}
  0x8e   : > { %3732 = dma.hbm_to_vmem [thread:$0]  (!%p4330_p7), %s4365_s5, 64, %s581_s19, %s570_s21  }
  0x8f   : > { %p5056_p6 = scmp.ne.s32.totalorder %s5037_s20, 0 }
  0x90   : > { %s4392_s17 = sand.u32 (!%p5056_p6), 1, %s4072_s28   ;;  %p5057_p10 = scmp.ne.s32.totalorder (!%p5056_p6), %s5046_s26, 0 }
  0x91   : > { %589 = sbr.rel (%p5056_p6) target bundleno = 6596 (0x19c4), region = 92  ;;  %s3202_s24 = sshll.u32 (!%p5056_p6), %s4392_s17, 3 }
  0x92   : > { %s592_s27 = scalar_lea.sflag (!%p5056_p6), [#allocation3], %s4392_s17  ;;  %s595_s0 = scalar_lea.vmem (!%p5056_p6), [#allocation2], %s3202_s24 }
  0x96   : > { %4043 = dma.done.wait (%p5057_p10), %s592_s27, 128  }
  0x97   : > { %4045 = vsyncadd (%p5057_p10), %s592_s27, 4294967168  ;;  %s600_s29 = sand.u32 1, %s4210_s1   ;;  %s3203_s20 = sshll.u32 %s4392_s17, 2 }
  0x98   : > { %s601_s21 = scalar_lea.sflag [#allocation6], %s600_s29  ;;  %s4404_s5 = scalar_lea.vmem [#allocation5], %s3203_s20 }
  0x99   : > { %4047 = dma.done.wait (%p5057_p10), %s601_s21, 64  }
  0x9a   : > { %4049 = vsyncadd (%p5057_p10), %s601_s21, 4294967232  ;;  %p5058_p3 = scmp.eq.s32.totalorder %s4210_s1, 0 }
  0x9c   : > { %4051 = dma.done.wait (%p5058_p3), [#allocation6], 16   ;;  %p5059_p7 = pmov %p5058_p3 }
  0x9d   : > { %p5060_p5 = pmov %p5058_p3 }
  0x9e   : > { %4053 = vsyncadd (%p5059_p7), [#allocation6], 4294967280 }
  0x9f   : > { %4055 = dma.done.wait (%p5060_p5), [#allocation9], 32   ;;  %p5061_p8 = pmov %p5058_p3 }
  0xa0   : > { %p5062_p13 = pmov %p5058_p3 }
  0xa1   : > { %4057 = vsyncadd (%p5061_p8), [#allocation9], 4294967264 }
  0xa2   : > { %4059 = dma.done.wait (%p5062_p13), [#allocation12], 16   ;;  %p5063_p0 = pmov %p5058_p3 }
  0xa3   : > { %v4088_v0 = vmov 0.0   ;;  %vm4089_vm0 = vmmov 0   ;;  %v4431_v1 = vld [vmem:[%s4995_s4 + $0x8] sm:$0xff]   ;;  %s5064_s18 = sld [smem:[#allocation28_spill]]  ;;  %v4442_v3 = vld [vmem:[%s4995_s4] sm:$0xff]   ;;  %vm712_vm1 = vcmask 261120  }
  0xa4   : > { %4061 = vsyncadd (%p5063_p0), [#allocation12], 4294967280  ;;  %3395 = vmatprep.subr.bf16.mxu1 %v4088_v0  ;;  %3387 = vmatprep.subr.bf16.mxu0 %v4088_v0  ;;  %v4452_v5 = vld [vmem:[%s595_s0] sm:$0xff]  ;;  %v4470_v7 = vld [vmem:[#allocation8] ss:$0 sm:$0xff]  ;;  %vm885_vm2 = vcmask 64512  }
  0xa5   : > { %3399 = vmatprep.mubr.msk.bf16.mxu1 %vm4089_vm0, %v4088_v0  ;;  %3391 = vmatprep.mubr.msk.bf16.mxu0 %vm4089_vm0, %v4088_v0  ;;  %v4456_v6 = vpack.c.bf16 %v4452_v5, %v4452_v5  ;;  %v4472_v8 = vld [vmem:[#allocation7] ss:$0 sm:$0xff]  ;;  %v4477_v10 = vld [vmem:[%s4997_s6 + $0x8] sm:$0xff]   ;;  %v4485_v15 = vld [vmem:[%s4997_s6] sm:$0xff]   ;;  %s4090_s21 = smov 120   ;;  %vm945_vm3 = vcmask 1043456  }
  0xa6   : > { %3396 = vmatpush3.bf16.msra.mxu1 %v4431_v1  ;;  %v680_v27 = vld [vmem:[%s4404_s5] sm:$0xf]  ;;  %v4511_v35 = vld [vmem:[#allocation10] ss:$0 sm:$0xff]  ;;  %s4091_s5 = smov 112   ;;  %s5065_s9 = sld [smem:[#allocation33_spill]] }
  0xa7   : > { %3397 = vmatprep.subr.bf16.mxu1 %v4088_v0  ;;  %v4507_v28 = vunpack.c.l.bf16 %v680_v27  ;;  %v992_v60 = vld [vmem:[%s4999_s8] sm:$0xf]  ;;  %s3276_s27 = sshll.u32 %s4210_s1, 7  ;;  %s677_s0 = scalar_lea.vmem [#allocation13], %s3202_s24 }
  0xa8   : > { %s3059_s29 = sshll.u32 %s677_s0, 4  ;;  %s5067_s26 = sld [smem:[#allocation34_spill]]  ;;  %s3060_s29 = int_to_ptr.vmem [resolvable:$true] %s3059_s29 }
  0xa9   : > { %v4436_v2 = vld [vmem:[%s5064_s18 + $0x8] sm:$0xff]   ;;  %v4449_v4 = vld [vmem:[%s5064_s18] sm:$0xff]   ;;  %s3046_s23 = scalar_lea.sflag [#allocation4], %s4392_s17  ;;  %s4000_s3 = scalar_lea.vmem %s3060_s29, 128 }
  0xaa   : > { %3388 = vmatpush3.bf16.msra.mxu0 %v4436_v2  ;;  %3398 = vmatpush3.bf16.msra.mxu1 %v4442_v3  ;;  %p4001_p2 = scmp.ne.s32.totalorder %s3060_s29, %s4000_s3  ;;  %s4093_s1 = smov [#allocation13]  }
  0xab   : > { %3389 = vmatprep.subr.bf16.mxu0 %v4088_v0  ;;  %3411 = vmatprep.subr.bf16.mxu1 %v4088_v0  ;;  %s4004_s24 = sshll.u32 %s4093_s1, 4  ;;  %s4005_s24 = int_to_ptr.vmem [resolvable:$false] %s4004_s24 }
  0xac   : > { %s4006_s22 = scalar_lea.vmem %s4005_s24, 256  ;;  %p4007_p1 = scmp.lt.s32.totalorder %s3060_s29, %s4005_s24 }
  0xad   : > { %3400 = vmatmul.mubr.msk.bf16.vlgmr.msra.gmra.mxu1 %vm712_vm1, %v4456_v6  ;;  %p4008_p4 = scmp.lt.s32.totalorder %s4006_s22, %s4000_s3 }
  0xae   : > { %3390 = vmatpush3.bf16.msra.mxu0 %v4449_v4  ;;  %3413 = vmatprep.mubr.msk.bf16.mxu1 %vm4089_vm0, %v4088_v0  ;;  %s3057_s19 = scalar_lea.hbm %s5067_s26, %s3276_s27 }
  0xaf   : > { %3403 = vmatprep.subr.bf16.mxu0 %v4088_v0  ;;  %p4009_p6 = por %p4008_p4, %p4007_p1 }
  0xb1   : > { %3392 = vmatmul.mubr.msk.bf16.vlgmr.msra.gmra.mxu0 %vm712_vm1, %v4456_v6 }
  0xb2   : > { %3407 = vmatprep.mubr.msk.bf16.mxu0 %vm4089_vm0, %v4088_v0  ;;  %3404 = vmatpush3.bf16.msra.mxu0 %v4477_v10 }
  0xb3   : > { %3405 = vmatprep.subr.bf16.mxu0 %v4088_v0 }
  0xb6   : > { %3406 = vmatpush3.bf16.msra.mxu0 %v4485_v15 }
  0xb7   : > { %3417 = vmatprep.subr.bf16.mxu0 %v4088_v0 }
  0xb9   : > { %3408 = vmatmul.mubr.msk.bf16.vlgmr.msra.gmra.mxu0 %vm712_vm1, %v4456_v6 }
  0xba   : > { %3419 = vmatprep.mubr.msk.bf16.mxu0 %vm4089_vm0, %v4088_v0 }
 0x16d   : > { %v814_v9 = vpop.f32.mrf.mxu1 }
 0x16e   : > { %v815_v11 = vadd.f32 %v4470_v7, %v814_v9  ;;  %v4537_v9 = vsel %vm945_vm3, %v992_v60, 0 }
 0x16f   : > { %v3401_v14 = vpop.f32.mrf.mxu1 }
 0x170   : > { %v820_v16 = vpack.c.bf16 %v815_v11, %v815_v11  ;;  %v1107_v11 = vld [vmem:[%s4999_s8 + $0x4] sm:$0xf] }
 0x171   : > { %v750_v12 = vpop.f32.mrf.mxu0  ;;  %v817_v18 = vpop.f32.mrf.mxu1 }
 0x172   : > { %v751_v13 = vadd.f32 %v4472_v8, %v750_v12  ;;  %v890_v19 = vsel %vm885_vm2, %v820_v16, 0  ;;  %997 = vrot.lane.b32.xlu0 %v820_v16, %s4090_s21  ;;  %v4548_v12 = vsel %vm945_vm3, %v1107_v11, 0 }
 0x173   : > { %v3393_v17 = vpop.f32.mrf.mxu0  ;;  %v3402_v22 = vpop.f32.mrf.mxu1  ;;  %3412 = vmatpush3.bf16.xpose.msra.mxu1 %v890_v19 }
 0x174   : > { %v756_v20 = vpack.c.bf16 %v751_v13, %v751_v13  ;;  %3423 = vmatprep.subr.bf16.mxu1 %v4088_v0 }
 0x175   : > { %v753_v21 = vpop.f32.mrf.mxu0 }
 0x176   : > { %994 = vrot.lane.b32.xlu0 %v756_v20, %s4090_s21 }
 0x177   : > { %v3394_v23 = vpop.f32.mrf.mxu0 }
 0x179   : > { %v878_v36 = vpop.f32.mrf.mxu0 }
 0x17a   : > { %3414 = vmatmul.mubr.msk.bf16.vlgmr.msra.gmra.mxu1 %vm885_vm2, %v756_v20  ;;  %v879_v37 = vadd.f32 %v4511_v35, %v878_v36 }
 0x17b   : > { %3425 = vmatprep.mubr.msk.bf16.mxu1 %vm4089_vm0, %v4088_v0  ;;  %v3409_v38 = vpop.f32.mrf.mxu0 }
 0x17c   : > { %v884_v39 = vpack.c.bf16 %v879_v37, %v879_v37 }
 0x17d   : > { %v881_v40 = vpop.f32.mrf.mxu0 }
 0x17e   : > { %v947_v41 = vsel %vm945_vm3, %v884_v39, 0  ;;  %1056 = vrot.lane.b32.xlu0 %v884_v39, %s4090_s21 }
 0x17f   : > { %v3410_v42 = vpop.f32.mrf.mxu0  ;;  %3418 = vmatpush3.bf16.msra.mxu0 %v947_v41 }
 0x180   : > { %3429 = vmatprep.subr.bf16.mxu0 %v4088_v0 }
 0x1e4   : > { %v998_v24 = vpop.permute.xlu0 %997 }
 0x1e5   : > { %v1003_v25 = vsel %vm885_vm2, %v998_v24, 0 }
 0x1e6   : > { %3424 = vmatpush3.bf16.xpose.msra.mxu1 %v1003_v25 }
 0x1e7   : > { %3435 = vmatprep.subr.bf16.mxu1 %v4088_v0 }
 0x1e8   : > { %v995_v26 = vpop.permute.xlu0 %994 }
 0x1ed   : > { %3426 = vmatmul.mubr.msk.bf16.vlgmr.msra.gmra.mxu1 %vm885_vm2, %v995_v26 }
 0x1ee   : > { %3437 = vmatprep.mubr.msk.bf16.mxu1 %vm4089_vm0, %v4088_v0  ;;  %3436 = vmatpush3.bf16.msra.mxu1 %v4548_v12 }
 0x1ef   : > { %3447 = vmatprep.subr.bf16.mxu1 %v4088_v0 }
 0x1f0   : > { %v1057_v52 = vpop.permute.xlu0 %1056 }
 0x1f1   : > { %v1062_v56 = vsel %vm945_vm3, %v1057_v52, 0 }
 0x23a   : > { %v926_v29 = vpop.f32.mrf.mxu1 }
 0x23b   : > { %v927_v30 = vadd.f32 %v926_v29, %v4507_v28 }
 0x23c   : > { %v3415_v31 = vpop.f32.mrf.mxu1 }
 0x23d   : > { %v932_v32 = vsel %vm885_vm2, %v927_v30, -inf }
 0x23e   : > { %933 = vmax.xlane.f32.xlu1 %v932_v32  ;;  %v929_v33 = vpop.f32.mrf.mxu1 }
 0x240   : > { %v3416_v34 = vpop.f32.mrf.mxu1 }
 0x2ad   : > { %v1039_v43 = vpop.f32.mrf.mxu1 }
 0x2ae   : > { %v1040_v44 = vadd.f32 %v1039_v43, %v4507_v28 }
 0x2af   : > { %v3427_v45 = vpop.f32.mrf.mxu1 }
 0x2b0   : > { %v1045_v46 = vsel %vm885_vm2, %v1040_v44, -inf }
 0x2b1   : > { %1046 = vmax.xlane.f32.xlu1 %v1045_v46  ;;  %v1042_v47 = vpop.f32.mrf.mxu1 }
 0x2b3   : > { %v3428_v48 = vpop.f32.mrf.mxu1 }
 0x2c7   : > { %v934_v49 = vpop.xlane.xlu1 %933 }
 0x2c8   : > { %v935_v50 = vsub.f32 %v927_v30, %v934_v49 }
 0x2ca   : > { %v936_v51 = vmul.f32 1.442695, %v935_v50 }
 0x2cc   : > { %3800 = vpow2.f32 %v936_v51 }
 0x2d9   : > { %v3801_v53 = vpop.eup %3800 }
 0x2da   : > { %v938_v54 = vsel %vm885_vm2, %v3801_v53, 0.0  ;;  %v941_v55 = vpack.c.bf16 %v3801_v53, %v3801_v53 }
 0x2db   : > { %939 = vadd.xlane.f32.xlu1 %v938_v54 }
 0x2dc   : > { %3420 = vmatmul.mubr.msk.bf16.vlgmr.msra.gmra.mxu0 %vm885_vm2, %v941_v55 }
 0x2dd   : > { %3430 = vmatpush3.bf16.msra.mxu0 %v1062_v56  ;;  %3431 = vmatprep.mubr.msk.bf16.mxu0 %vm4089_vm0, %v4088_v0 }
 0x2de   : > { %3441 = vmatprep.subr.bf16.mxu0 %v4088_v0 }
 0x2ec   : > { %1252 = vrot.lane.b32.xlu1 %v4431_v1, %s4091_s5 }
 0x2f0   : > { %1250 = vrot.lane.b32.xlu1 %v4442_v3, %s4091_s5 }
 0x2f4   : > { %1202 = vrot.lane.b32.xlu1 %v4436_v2, %s4091_s5 }
 0x2f8   : > { %1200 = vrot.lane.b32.xlu1 %v4449_v4, %s4091_s5 }
 0x2fc   : > { %1256 = vrot.lane.b32.xlu1 %v4470_v7, %s4091_s5 }
 0x300   : > { %1302 = vrot.lane.b32.xlu1 %v4477_v10, %s4091_s5 }
 0x304   : > { %1300 = vrot.lane.b32.xlu1 %v4485_v15, %s4091_s5 }
 0x33a   : > { %v1047_v57 = vpop.xlane.xlu1 %1046 }
 0x33b   : > { %v1048_v58 = vsub.f32 %v1040_v44, %v1047_v57 }
 0x33d   : > { %v1049_v59 = vmul.f32 1.442695, %v1048_v58 }
 0x33f   : > { %3802 = vpow2.f32 %v1049_v59 }
 0x34c   : > { %v3803_v61 = vpop.eup %3802 }
 0x34d   : > { %v1051_v62 = vsel %vm885_vm2, %v3803_v61, 0.0  ;;  %v1054_v63 = vpack.c.bf16 %v3803_v61, %v3803_v61 }
 0x34e   : > { %1052 = vadd.xlane.f32.xlu0 %v1051_v62 }
 0x34f   : > { %3432 = vmatmul.mubr.msk.bf16.vlgmr.msra.gmra.mxu0 %vm885_vm2, %v1054_v63 }
 0x350   : > { %3442 = vmatpush3.bf16.msra.mxu0 %v4537_v9  ;;  %3443 = vmatprep.mubr.msk.bf16.mxu0 %vm4089_vm0, %v4088_v0 }
 0x351   : > { %3455 = vmatprep.subr.bf16.mxu0 %v4088_v0 }
 0x364   : > { %1206 = vrot.lane.b32.xlu0 %v4472_v8, %s4091_s5  ;;  %v940_v13 = vpop.xlane.xlu1 %939 }
 0x365   : > { %3804 = vrcp.f32 %v940_v13 }
 0x368   : > { %1306 = vrot.lane.b32.xlu0 %v4511_v35, %s4091_s5  ;;  %v4554_v18 = vpop.permute.xlu1 %1252  ;;  %s4092_s5 = smov 96  }
 0x36c   : > { %v4560_v23 = vpop.permute.xlu1 %1250 }
 0x370   : > { %v4569_v29 = vpop.permute.xlu1 %1202 }
 0x372   : > { %v3805_v14 = vpop.eup %3804 }
 0x374   : > { %v4575_v34 = vpop.permute.xlu1 %1200 }
 0x378   : > { %v4586_v40 = vpop.permute.xlu1 %1256 }
 0x37c   : > { %v4592_v48 = vpop.permute.xlu1 %1302 }
 0x380   : > { %v4598_v51 = vpop.permute.xlu1 %1300 }
 0x39c   : > { %v983_v16 = vpop.f32.mrf.mxu0 }
 0x39d   : > { %v990_v17 = vmul.f32 %v3805_v14, %v983_v16 }
 0x39e   : > { %v3421_v19 = vpop.f32.mrf.mxu0 }
 0x39f   : > { %v991_v20 = vpack.c.bf16 %v990_v17, %v990_v17 }
 0x3a0   : > { %v986_v21 = vpop.f32.mrf.mxu0 }
 0x3a1   : > { %3444 = vmatmul.mubr.msk.bf16.vlgmr.msra.gmra.mxu0 %vm885_vm2, %v991_v20 }
 0x3a2   : > { %v3422_v22 = vpop.f32.mrf.mxu0  ;;  %3456 = vmatpush3.bf16.msra.mxu0 %v4554_v18  ;;  %3459 = vmatprep.mubr.msk.bf16.mxu0 %vm4089_vm0, %v4088_v0 }
 0x3a3   : > { %3457 = vmatprep.subr.bf16.mxu0 %v4088_v0 }
 0x3a6   : > { %3458 = vmatpush3.bf16.msra.mxu0 %v4560_v23 }
 0x3a7   : > { %3471 = vmatprep.subr.bf16.mxu0 %v4088_v0 }
 0x3a9   : > { %3460 = vmatmul.mubr.msk.bf16.vlgmr.msra.gmra.mxu0 %vm712_vm1, %v4456_v6 }
 0x3aa   : > { %3473 = vmatprep.mubr.msk.bf16.mxu0 %vm4089_vm0, %v4088_v0 }
 0x3d7   : > { %v1053_v24 = vpop.xlane.xlu0 %1052 }
 0x3d8   : > { %3806 = vrcp.f32 %v1053_v24 }
 0x3db   : > { %v4602_v54 = vpop.permute.xlu0 %1206 }
 0x3df   : > { %v4615_v14 = vpop.permute.xlu0 %1306 }
 0x3e5   : > { %v3807_v25 = vpop.eup %3806 }
 0x40f   : > { %v1098_v26 = vpop.f32.mrf.mxu0 }
 0x410   : > { %v1105_v27 = vmul.f32 %v3807_v25, %v1098_v26 }
 0x411   : > { %v3433_v30 = vpop.f32.mrf.mxu0 }
 0x412   : > { %v1106_v31 = vpack.c.bf16 %v1105_v27, %v1105_v27 }
 0x413   : > { %v1101_v32 = vpop.f32.mrf.mxu0 }
 0x414   : > { %3438 = vmatmul.mubr.msk.bf16.vlgmr.msra.gmra.mxu1 %vm885_vm2, %v1106_v31 }
 0x415   : > { %v3434_v33 = vpop.f32.mrf.mxu0  ;;  %3448 = vmatpush3.bf16.msra.mxu1 %v4569_v29  ;;  %3451 = vmatprep.mubr.msk.bf16.mxu1 %vm4089_vm0, %v4088_v0 }
 0x416   : > { %3449 = vmatprep.subr.bf16.mxu1 %v4088_v0 }
 0x419   : > { %3450 = vmatpush3.bf16.msra.mxu1 %v4575_v34 }
 0x41a   : > { %3463 = vmatprep.subr.bf16.mxu1 %v4088_v0 }
 0x41c   : > { %3452 = vmatmul.mubr.msk.bf16.vlgmr.msra.gmra.mxu1 %vm712_vm1, %v4456_v6 }
 0x41d   : > { %3467 = vmatprep.mubr.msk.bf16.mxu1 %vm4089_vm0, %v4088_v0  ;;  %3464 = vmatpush3.bf16.msra.mxu1 %v4592_v48 }
 0x41e   : > { %3465 = vmatprep.subr.bf16.mxu1 %v4088_v0 }
 0x421   : > { %3466 = vmatpush3.bf16.msra.mxu1 %v4598_v51 }
 0x422   : > { %3477 = vmatprep.subr.bf16.mxu1 %v4088_v0 }
 0x424   : > { %3468 = vmatmul.mubr.msk.bf16.vlgmr.msra.gmra.mxu1 %vm712_vm1, %v4456_v6 }
 0x425   : > { %3479 = vmatprep.mubr.msk.bf16.mxu1 %vm4089_vm0, %v4088_v0 }
 0x461   : > { %v4584_v36 = vpop.f32.mrf.mxu0 }
 0x463   : > { %v3445_v37 = vpop.f32.mrf.mxu0 }
 0x465   : > { %v1197_v38 = vpop.f32.mrf.mxu0 }
 0x467   : > { %v3446_v39 = vpop.f32.mrf.mxu0 }
 0x468   : > { %v1455_v39 = vld [vmem:[%s4999_s8 + $0x8] sm:$0xf] }
 0x469   : > { %v1293_v41 = vpop.f32.mrf.mxu0 }
 0x46a   : > { %v1294_v42 = vadd.f32 %v1293_v41, %v4586_v40  ;;  %v4633_v41 = vsel %vm945_vm3, %v1455_v39, 0 }
 0x46b   : > { %v3461_v43 = vpop.f32.mrf.mxu0 }
 0x46c   : > { %v1299_v44 = vpack.c.bf16 %v1294_v42, %v1294_v42 }
 0x46d   : > { %v1296_v45 = vpop.f32.mrf.mxu0 }
 0x46e   : > { %1507 = vrot.lane.b32.xlu0 %v1299_v44, %s4090_s21  ;;  %v1354_v46 = vsel %vm885_vm2, %v1299_v44, 0 }
 0x46f   : > { %v3462_v47 = vpop.f32.mrf.mxu0  ;;  %3472 = vmatpush3.bf16.xpose.msra.mxu0 %v1354_v46 }
 0x470   : > { %3483 = vmatprep.subr.bf16.mxu0 %v4088_v0 }
 0x4d4   : > { %v4594_v49 = vpop.f32.mrf.mxu1 }
 0x4d6   : > { %v3439_v50 = vpop.f32.mrf.mxu1 }
 0x4d8   : > { %v1151_v52 = vpop.f32.mrf.mxu1 }
 0x4da   : > { %v3440_v53 = vpop.f32.mrf.mxu1 }
 0x4dc   : > { %v1243_v55 = vpop.f32.mrf.mxu1 }
 0x4dd   : > { %v1244_v56 = vadd.f32 %v1243_v55, %v4602_v54 }
 0x4de   : > { %v3453_v57 = vpop.f32.mrf.mxu1 }
 0x4df   : > { %v1249_v58 = vpack.c.bf16 %v1244_v56, %v1244_v56 }
 0x4e0   : > { %v1246_v59 = vpop.f32.mrf.mxu1  ;;  %v1508_v31 = vpop.permute.xlu0 %1507 }
 0x4e1   : > { %1504 = vrot.lane.b32.xlu0 %v1249_v58, %s4090_s21  ;;  %3474 = vmatmul.mubr.msk.bf16.vlgmr.msra.gmra.mxu0 %vm885_vm2, %v1249_v58  ;;  %v1513_v37 = vsel %vm885_vm2, %v1508_v31, 0 }
 0x4e2   : > { %v3454_v60 = vpop.f32.mrf.mxu1  ;;  %3485 = vmatprep.mubr.msk.bf16.mxu0 %vm4089_vm0, %v4088_v0  ;;  %3484 = vmatpush3.bf16.msra.mxu0 %v4633_v41 }
 0x4e3   : > { %3495 = vmatprep.subr.bf16.mxu0 %v4088_v0 }
 0x4e4   : > { %v1343_v16 = vpop.f32.mrf.mxu1 }
 0x4e5   : > { %v1344_v17 = vadd.f32 %v1343_v16, %v4615_v14 }
 0x4e6   : > { %v3469_v19 = vpop.f32.mrf.mxu1 }
 0x4e7   : > { %v1349_v20 = vpack.c.bf16 %v1344_v17, %v1344_v17  ;;  %v1617_v17 = vld [vmem:[%s4999_s8 + $0xc] sm:$0xf] }
 0x4e8   : > { %v1346_v21 = vpop.f32.mrf.mxu1  ;;  %v4653_v19 = vsel %vm945_vm3, %v1617_v17, 0  ;;  %v4706_v17 = vld [vmem:[%s5002_s11] ss:$0 sm:$0xff] }
 0x4e9   : > { %v1410_v22 = vsel %vm945_vm3, %v1349_v20, 0 }
 0x4ea   : > { %v3470_v24 = vpop.f32.mrf.mxu1  ;;  %3478 = vmatpush3.bf16.msra.mxu1 %v1410_v22 }
 0x4eb   : > { %3489 = vmatprep.subr.bf16.mxu1 %v4088_v0 }
 0x553   : > { %v1505_v38 = vpop.permute.xlu0 %1504 }
 0x5a1   : > { %v1390_v61 = vpop.f32.mrf.mxu0 }
 0x5a2   : > { %v1391_v6 = vadd.f32 %v1390_v61, %v4507_v28 }
 0x5a3   : > { %v3475_v62 = vpop.f32.mrf.mxu0 }
 0x5a4   : > { %v1396_v63 = vsel %vm885_vm2, %v1391_v6, -inf }
 0x5a5   : > { %1397 = vmax.xlane.f32.xlu1 %v1396_v63  ;;  %v1393_v11 = vpop.f32.mrf.mxu0 }
 0x5a7   : > { %v3476_v13 = vpop.f32.mrf.mxu0 }
 0x62e   : > { %v1398_v25 = vpop.xlane.xlu1 %1397 }
 0x62f   : > { %v1399_v26 = vsub.f32 %v1391_v6, %v1398_v25 }
 0x631   : > { %v1400_v27 = vmul.f32 1.442695, %v1399_v26 }
 0x633   : > { %3808 = vpow2.f32 %v1400_v27 }
 0x640   : > { %v3809_v30 = vpop.eup %3808 }
 0x641   : > { %v1402_v32 = vsel %vm885_vm2, %v3809_v30, 0.0  ;;  %v1405_v33 = vpack.c.bf16 %v3809_v30, %v3809_v30 }
 0x642   : > { %1403 = vadd.xlane.f32.xlu0 %v1402_v32 }
 0x643   : > { %3480 = vmatmul.mubr.msk.bf16.vlgmr.msra.gmra.mxu1 %vm885_vm2, %v1405_v33 }
 0x644   : > { %3490 = vmatpush3.bf16.xpose.msra.mxu1 %v1513_v37  ;;  %3491 = vmatprep.mubr.msk.bf16.mxu1 %vm4089_vm0, %v4088_v0 }
 0x645   : > { %3501 = vmatprep.subr.bf16.mxu1 %v4088_v0 }
 0x64b   : > { %3492 = vmatmul.mubr.msk.bf16.vlgmr.msra.gmra.mxu1 %vm885_vm2, %v1505_v38 }
 0x64c   : > { %3503 = vmatprep.mubr.msk.bf16.mxu1 %vm4089_vm0, %v4088_v0  ;;  %3502 = vmatpush3.bf16.msra.mxu1 %v4653_v19 }
 0x64d   : > { %3515 = vmatprep.subr.bf16.mxu1 %v4088_v0 }
 0x6cb   : > { %v1404_v42 = vpop.xlane.xlu0 %1403 }
 0x6cc   : > { %3810 = vrcp.f32 %v1404_v42 }
 0x6d9   : > { %v3811_v43 = vpop.eup %3810 }
 0x703   : > { %v1446_v44 = vpop.f32.mrf.mxu1 }
 0x704   : > { %v1453_v45 = vmul.f32 %v3811_v43, %v1446_v44  ;;  %v4662_v43 = vld [vmem:[#allocation11] ss:$0 sm:$0xff] }
 0x705   : > { %v3481_v46 = vpop.f32.mrf.mxu1 }
 0x706   : > { %v1454_v47 = vpack.c.bf16 %v1453_v45, %v1453_v45 }
 0x707   : > { %v1449_v50 = vpop.f32.mrf.mxu1 }
 0x708   : > { %3486 = vmatmul.mubr.msk.bf16.vlgmr.msra.gmra.mxu0 %vm885_vm2, %v1454_v47 }
 0x709   : > { %v3482_v52 = vpop.f32.mrf.mxu1  ;;  %3497 = vmatprep.mubr.msk.bf16.mxu0 %vm4089_vm0, %v4088_v0 }
 0x70a   : > { %v4670_v52 = vld [vmem:[%s5003_s12 + $0x8] sm:$0xff]  }
 0x70b   : > { %v1549_v53 = vpop.f32.mrf.mxu1 }
 0x70c   : > { %v1550_v55 = vadd.f32 %v1549_v53, %v4507_v28 }
 0x70d   : > { %v3493_v56 = vpop.f32.mrf.mxu1 }
 0x70e   : > { %v1555_v57 = vsel %vm885_vm2, %v1550_v55, -inf }
 0x70f   : > { %1556 = vmax.xlane.f32.xlu1 %v1555_v57  ;;  %v1552_v58 = vpop.f32.mrf.mxu1 }
 0x711   : > { %v3494_v59 = vpop.f32.mrf.mxu1 }
 0x712   : > { %v4687_v59 = vld [vmem:[%s5004_s13] ss:$0 sm:$0xff] }
 0x720   : > { %1566 = vrot.lane.b32.xlu1 %v1349_v20, %s4090_s21  ;;  %v1195_v20 = vadd.f32 %v4584_v36, %v4594_v49 }
 0x798   : > { %v1557_v60 = vpop.xlane.xlu1 %1556 }
 0x799   : > { %v1558_v61 = vsub.f32 %v1550_v55, %v1557_v60 }
 0x79b   : > { %v1559_v6 = vmul.f32 1.442695, %v1558_v61 }
 0x79c   : > { %v1567_v62 = vpop.permute.xlu1 %1566 }
 0x79d   : > { %3812 = vpow2.f32 %v1559_v6  ;;  %v1572_v63 = vsel %vm945_vm3, %v1567_v62, 0 }
 0x79e   : > { %3496 = vmatpush3.bf16.msra.mxu0 %v1572_v63 }
 0x79f   : > { %3507 = vmatprep.subr.bf16.mxu0 %v4088_v0 }
 0x7aa   : > { %v3813_v11 = vpop.eup %3812 }
 0x7ab   : > { %v1561_v13 = vsel %vm885_vm2, %v3813_v11, 0.0  ;;  %v1564_v16 = vpack.c.bf16 %v3813_v11, %v3813_v11 }
 0x7ac   : > { %1562 = vadd.xlane.f32.xlu0 %v1561_v13  ;;  %v4701_v13 = vld [vmem:[%s5001_s10] ss:$0 sm:$0xff] }
 0x7ad   : > { %3498 = vmatmul.mubr.msk.bf16.vlgmr.msra.gmra.mxu0 %vm885_vm2, %v1564_v16 }
 0x7ae   : > { %3511 = vmatprep.mubr.msk.bf16.mxu0 %vm4089_vm0, %v4088_v0  ;;  %3508 = vmatpush3.bf16.msra.mxu0 %v4670_v52 }
 0x7af   : > { %3509 = vmatprep.subr.bf16.mxu0 %v4088_v0 }
 0x7c8   : > { %v1496_v21 = vpop.f32.mrf.mxu0 }
 0x7c9   : > { %v1502_v22 = vadd.f32 %v1496_v21, %v1195_v20 }
 0x7ca   : > { %v3487_v24 = vpop.f32.mrf.mxu0 }
 0x7cb   : > { %v4718_v24 = vld [vmem:[%s5005_s14 + $0x8] sm:$0xff]  }
 0x7cc   : > { %v1499_v25 = vpop.f32.mrf.mxu0 }
 0x7ce   : > { %v3488_v26 = vpop.f32.mrf.mxu0 }
 0x7cf   : > { %v4733_v26 = vld [vmem:[%s5005_s14 + $0x10] sm:$0xff]  }
 0x835   : > { %v1563_v27 = vpop.xlane.xlu0 %1562 }
 0x836   : > { %3814 = vrcp.f32 %v1563_v27  ;;  %v4738_v27 = vld [vmem:[%s5005_s14] sm:$0xff]  }
 0x843   : > { %v3815_v30 = vpop.eup %3814 }
 0x86d   : > { %v1608_v31 = vpop.f32.mrf.mxu0 }
 0x86e   : > { %v1615_v32 = vmul.f32 %v3815_v30, %v1608_v31 }
 0x86f   : > { %v3499_v33 = vpop.f32.mrf.mxu0 }
 0x870   : > { %v1616_v37 = vpack.c.bf16 %v1615_v32, %v1615_v32 }
 0x871   : > { %v1611_v38 = vpop.f32.mrf.mxu0 }
 0x872   : > { %3504 = vmatmul.mubr.msk.bf16.vlgmr.msra.gmra.mxu1 %vm885_vm2, %v1616_v37 }
 0x873   : > { %v3500_v39 = vpop.f32.mrf.mxu0  ;;  %3519 = vmatprep.mubr.msk.bf16.mxu1 %vm4089_vm0, %v4088_v0 }
 0x932   : > { %v1658_v36 = vpop.f32.mrf.mxu1 }
 0x933   : > { %v1664_v49 = vadd.f32 %v1658_v36, %v1502_v22  ;;  %v4713_v22 = vld [vmem:[%s5005_s14 + $0x18] sm:$0xff]  }
 0x934   : > { %v3505_v42 = vpop.f32.mrf.mxu1 }
 0x935   : > { %v1665_v44 = vadd.f32 %v1664_v49, %v4452_v5  ;;  %v4677_v5 = vld [vmem:[%s5003_s12] sm:$0xff]  }
 0x936   : > { %v1661_v45 = vpop.f32.mrf.mxu1  ;;  %3510 = vmatpush3.bf16.msra.mxu0 %v4677_v5 }
 0x937   : > { %v1672_v46 = vadd.f32 %v4662_v43, %v1665_v44  ;;  %3523 = vmatprep.subr.bf16.mxu0 %v4088_v0 }
 0x938   : > { %v3506_v47 = vpop.f32.mrf.mxu1 }
 0x939   : > { %v1673_v50 = vsel %vm712_vm1, %v1672_v46, 0.0 }
 0x93a   : > { %1674 = vadd.xlane.f32.xlu1 %v1673_v50 }
 0x9c3   : > { %v1675_v53 = vpop.xlane.xlu1 %1674 }
 0x9c4   : > { %v1677_v55 = vmul.f32 0.03125, %v1675_v53 }
 0x9c6   : > { %v1678_v56 = vsub.f32 %v1672_v46, %v1677_v55 }
 0x9c8   : > { %v1679_v57 = vmul.f32 %v1678_v56, %v1678_v56 }
 0x9ca   : > { %v1680_v58 = vsel %vm712_vm1, %v1679_v57, 0.0  ;;  %v4765_v57 = vld [vmem:[%s5006_s15] ss:$0 sm:$0xff] }
 0x9cb   : > { %1681 = vadd.xlane.f32.xlu0 %v1680_v58 }
 0x9e1   : > { %1776 = vrot.lane.b32.xlu0 %v4670_v52, %s4092_s5 }
 0x9e5   : > { %1774 = vrot.lane.b32.xlu0 %v4677_v5, %s4092_s5 }
 0x9e9   : > { %1780 = vrot.lane.b32.xlu0 %v4687_v59, %s4092_s5 }
 0xa54   : > { %v1682_v60 = vpop.xlane.xlu0 %1681 }
 0xa55   : > { %v1683_v61 = vmul.f32 0.03125, %v1682_v60 }
 0xa57   : > { %v1684_v6 = vadd.f32 1e-05, %v1683_v61 }
 0xa58   : > { %v4690_v62 = vpop.permute.xlu0 %1776 }
 0xa59   : > { %3816 = vrsqrt.f32 %v1684_v6  ;;  %3516 = vmatpush3.bf16.msra.mxu1 %v4690_v62 }
 0xa5a   : > { %3517 = vmatprep.subr.bf16.mxu1 %v4088_v0 }
 0xa5c   : > { %v4694_v63 = vpop.permute.xlu0 %1774 }
 0xa5d   : > { %3518 = vmatpush3.bf16.msra.mxu1 %v4694_v63 }
 0xa5e   : > { %3531 = vmatprep.subr.bf16.mxu1 %v4088_v0 }
 0xa60   : > { %v4744_v30 = vpop.permute.xlu0 %1780 }
 0xa66   : > { %v3817_v11 = vpop.eup %3816 }
 0xa67   : > { %v1686_v16 = vmul.f32 %v3817_v11, %v1678_v56 }
 0xa69   : > { %v1693_v20 = vmul.f32 %v4701_v13, %v1686_v16 }
 0xa6b   : > { %v1700_v21 = vadd.f32 %v4706_v17, %v1693_v20 }
 0xa6d   : > { %v1701_v25 = vpack.c.bf16 %v1700_v21, %v1700_v21 }
 0xa6f   : > { %3512 = vmatmul.mubr.msk.bf16.vlgmr.msra.gmra.mxu0 %vm712_vm1, %v1701_v25  ;;  %3520 = vmatmul.mubr.msk.bf16.vlgmr.msra.gmra.mxu1 %vm712_vm1, %v1701_v25 }
 0xa70   : > { %3524 = vmatpush3.bf16.msra.mxu0 %v4713_v22  ;;  %3532 = vmatpush3.bf16.msra.mxu1 %v4718_v24 }
 0xa71   : > { %3525 = vmatprep.subr.bf16.mxu0 %v4088_v0  ;;  %3533 = vmatprep.subr.bf16.mxu1 %v4088_v0 }
 0xa72   : > { %3527 = vmatprep.mubr.msk.bf16.mxu0 %vm4089_vm0, %v4088_v0  ;;  %3535 = vmatprep.mubr.msk.bf16.mxu1 %vm4089_vm0, %v4088_v0 }
 0xa74   : > { %3526 = vmatpush3.bf16.msra.mxu0 %v4733_v26  ;;  %3534 = vmatpush3.bf16.msra.mxu1 %v4738_v27 }
 0xa75   : > { %3539 = vmatprep.subr.bf16.mxu0 %v4088_v0  ;;  %3547 = vmatprep.subr.bf16.mxu1 %v4088_v0 }
 0xb2f   : > { %v1762_v31 = vpop.f32.mrf.mxu0  ;;  %v1817_v32 = vpop.f32.mrf.mxu1 }
 0xb30   : > { %v1763_v33 = vadd.f32 %v4687_v59, %v1762_v31  ;;  %v1818_v37 = vadd.f32 %v1817_v32, %v4744_v30 }
 0xb31   : > { %v3513_v38 = vpop.f32.mrf.mxu0  ;;  %v3521_v39 = vpop.f32.mrf.mxu1 }
 0xb32   : > { %v1768_v36 = vmax.f32 %v1763_v33, 0.0  ;;  %v1823_v49 = vmax.f32 %v1818_v37, 0.0  ;;  %v4773_v39 = vld [vmem:[%s5007_s16] ss:$0 sm:$0xff] }
 0xb33   : > { %v1765_v42 = vpop.f32.mrf.mxu0  ;;  %v1820_v44 = vpop.f32.mrf.mxu1 }
 0xb34   : > { %v1769_v45 = vpack.c.bf16 %v1768_v36, %v1768_v36  ;;  %v1824_v46 = vpack.c.bf16 %v1823_v49, %v1823_v49  ;;  %v4778_v49 = vld [vmem:[%s5065_s9] ss:$0 sm:$0xff] }
 0xb35   : > { %v3514_v47 = vpop.f32.mrf.mxu0  ;;  %v3522_v50 = vpop.f32.mrf.mxu1 }
 0xb36   : > { %3528 = vmatmul.mubr.msk.bf16.vlgmr.msra.gmra.mxu0 %vm712_vm1, %v1824_v46  ;;  %3536 = vmatmul.mubr.msk.bf16.vlgmr.msra.gmra.mxu1 %vm712_vm1, %v1769_v45 }
 0xb37   : > { %3540 = vmatpush3.bf16.msra.mxu0 %v4436_v2  ;;  %3548 = vmatpush3.bf16.msra.mxu1 %v4431_v1 }
 0xb38   : > { %3541 = vmatprep.subr.bf16.mxu0 %v4088_v0  ;;  %3549 = vmatprep.subr.bf16.mxu1 %v4088_v0 }
 0xb39   : > { %3543 = vmatprep.mubr.msk.bf16.mxu0 %vm4089_vm0, %v4088_v0  ;;  %3551 = vmatprep.mubr.msk.bf16.mxu1 %vm4089_vm0, %v4088_v0 }
 0xb3b   : > { %3542 = vmatpush3.bf16.msra.mxu0 %v4449_v4  ;;  %3550 = vmatpush3.bf16.msra.mxu1 %v4442_v3 }
 0xb3c   : > { %3555 = vmatprep.subr.bf16.mxu0 %v4088_v0  ;;  %3563 = vmatprep.subr.bf16.mxu1 %v4088_v0 }
 0xbf6   : > { %v1878_v2 = vpop.f32.mrf.mxu0  ;;  %v1933_v1 = vpop.f32.mrf.mxu1 }
 0xbf7   : > { %v1934_v53 = vadd.f32 %v1933_v1, %v1878_v2 }
 0xbf8   : > { %v3529_v55 = vpop.f32.mrf.mxu0  ;;  %v3537_v56 = vpop.f32.mrf.mxu1 }
 0xbf9   : > { %v1939_v58 = vadd.f32 %v1934_v53, %v1700_v21 }
 0xbfa   : > { %v1881_v60 = vpop.f32.mrf.mxu0  ;;  %v1936_v61 = vpop.f32.mrf.mxu1 }
 0xbfb   : > { %v1946_v4 = vadd.f32 %v4765_v57, %v1939_v58 }
 0xbfc   : > { %v3530_v3 = vpop.f32.mrf.mxu0  ;;  %v3538_v6 = vpop.f32.mrf.mxu1 }
 0xbfd   : > { %v1947_v11 = vsel %vm712_vm1, %v1946_v4, 0.0 }
 0xbfe   : > { %1948 = vadd.xlane.f32.xlu0 %v1947_v11 }
 0xc87   : > { %v1949_v16 = vpop.xlane.xlu0 %1948 }
 0xc88   : > { %v1950_v20 = vmul.f32 0.03125, %v1949_v16 }
 0xc8a   : > { %v1951_v25 = vsub.f32 %v1946_v4, %v1950_v20 }
 0xc8c   : > { %v1952_v31 = vmul.f32 %v1951_v25, %v1951_v25 }
 0xc8e   : > { %v1953_v32 = vsel %vm712_vm1, %v1952_v31, 0.0 }
 0xc8f   : > { %1954 = vadd.xlane.f32.xlu1 %v1953_v32 }
 0xd18   : > { %v1955_v33 = vpop.xlane.xlu1 %1954 }
 0xd19   : > { %v1956_v37 = vmul.f32 0.03125, %v1955_v33 }
 0xd1b   : > { %v1957_v38 = vadd.f32 1e-05, %v1956_v37 }
 0xd1d   : > { %3818 = vrsqrt.f32 %v1957_v38 }
 0xd2a   : > { %v3819_v21 = vpop.eup %3818 }
 0xd2b   : > { %v1959_v36 = vmul.f32 %v3819_v21, %v1951_v25 }
 0xd2d   : > { %v1966_v42 = vmul.f32 %v4773_v39, %v1959_v36 }
 0xd2f   : > { %v4782_v44 = vadd.f32 %v4778_v49, %v1966_v42 }
 0xd31   : > { %v4786_v45 = vpack.c.bf16 %v4782_v44, %v4782_v44 }
 0xd33   : > { %3544 = vmatmul.mubr.msk.bf16.vlgmr.msra.gmra.mxu0 %vm712_vm1, %v4786_v45  ;;  %3552 = vmatmul.mubr.msk.bf16.vlgmr.msra.gmra.mxu1 %vm712_vm1, %v4786_v45 }
 0xd34   : > { %3556 = vmatpush3.bf16.msra.mxu0 %v4477_v10  ;;  %3559 = vmatprep.mubr.msk.bf16.mxu0 %vm4089_vm0, %v4088_v0 }
 0xd35   : > { %3557 = vmatprep.subr.bf16.mxu0 %v4088_v0  ;;  %3565 = vmatprep.mubr.msk.bf16.mxu1 %vm4089_vm0, %v4088_v0 }
 0xd38   : > { %3558 = vmatpush3.bf16.msra.mxu0 %v4485_v15 }
 0xd39   : > { %3569 = vmatprep.subr.bf16.mxu0 %v4088_v0 }
 0xd3b   : > { %3560 = vmatmul.mubr.msk.bf16.vlgmr.msra.gmra.mxu0 %vm712_vm1, %v4786_v45 }
 0xd3c   : > { %3571 = vmatprep.mubr.msk.bf16.mxu0 %vm4089_vm0, %v4088_v0 }
 0xdf3   : > { %v2012_v46 = vpop.f32.mrf.mxu0  ;;  %v2053_v10 = vpop.f32.mrf.mxu1 }
 0xdf4   : > { %v2054_v47 = vadd.f32 %v4470_v7, %v2053_v10  ;;  %v2013_v1 = vadd.f32 %v4472_v8, %v2012_v46 }
 0xdf5   : > { %v3545_v50 = vpop.f32.mrf.mxu0  ;;  %v3553_v2 = vpop.f32.mrf.mxu1 }
 0xdf6   : > { %v2059_v53 = vpack.c.bf16 %v2054_v47, %v2054_v47  ;;  %v2018_v61 = vpack.c.bf16 %v2013_v1, %v2013_v1 }
 0xdf7   : > { %v2015_v55 = vpop.f32.mrf.mxu0  ;;  %v2056_v56 = vpop.f32.mrf.mxu1 }
 0xdf8   : > { %v2105_v15 = vsel %vm885_vm2, %v2059_v53, 0  ;;  %2210 = vrot.lane.b32.xlu1 %v2059_v53, %s4090_s21 }
 0xdf9   : > { %v3546_v58 = vpop.f32.mrf.mxu0  ;;  %v3554_v60 = vpop.f32.mrf.mxu1  ;;  %3564 = vmatpush3.bf16.xpose.msra.mxu1 %v2105_v15 }
 0xdfa   : > { %3575 = vmatprep.subr.bf16.mxu1 %v4088_v0 }
 0xdfb   : > { %v2094_v4 = vpop.f32.mrf.mxu0 }
 0xdfc   : > { %v2095_v7 = vadd.f32 %v4511_v35, %v2094_v4  ;;  %2207 = vrot.lane.b32.xlu1 %v2018_v61, %s4090_s21 }
 0xdfd   : > { %v3561_v3 = vpop.f32.mrf.mxu0 }
 0xdfe   : > { %v2100_v8 = vpack.c.bf16 %v2095_v7, %v2095_v7 }
 0xdff   : > { %v2097_v6 = vpop.f32.mrf.mxu0 }
 0xe00   : > { %v2161_v11 = vsel %vm945_vm3, %v2100_v8, 0  ;;  %3566 = vmatmul.mubr.msk.bf16.vlgmr.msra.gmra.mxu1 %vm885_vm2, %v2018_v61 }
 0xe01   : > { %v3562_v16 = vpop.f32.mrf.mxu0  ;;  %3570 = vmatpush3.bf16.msra.mxu0 %v2161_v11  ;;  %3577 = vmatprep.mubr.msk.bf16.mxu1 %vm4089_vm0, %v4088_v0 }
 0xe02   : > { %3581 = vmatprep.subr.bf16.mxu0 %v4088_v0 }
 0xe6a   : > { %v2211_v20 = vpop.permute.xlu1 %2210 }
 0xe6b   : > { %v2216_v25 = vsel %vm885_vm2, %v2211_v20, 0 }
 0xe6c   : > { %3576 = vmatpush3.bf16.xpose.msra.mxu1 %v2216_v25 }
 0xe6d   : > { %3587 = vmatprep.subr.bf16.mxu1 %v4088_v0 }
 0xe6e   : > { %v2208_v35 = vpop.permute.xlu1 %2207 }
 0xe73   : > { %3578 = vmatmul.mubr.msk.bf16.vlgmr.msra.gmra.mxu1 %vm885_vm2, %v2208_v35 }
 0xe74   : > { %3588 = vmatpush3.bf16.msra.mxu1 %v4548_v12  ;;  %3589 = vmatprep.mubr.msk.bf16.mxu1 %vm4089_vm0, %v4088_v0 }
 0xe75   : > { %3599 = vmatprep.subr.bf16.mxu1 %v4088_v0 }
 0xec0   : > { %v2141_v31 = vpop.f32.mrf.mxu1 }
 0xec1   : > { %v2142_v32 = vadd.f32 %v2141_v31, %v4507_v28 }
 0xec2   : > { %v3567_v33 = vpop.f32.mrf.mxu1 }
 0xec3   : > { %v2147_v37 = vsel %vm885_vm2, %v2142_v32, -inf }
 0xec4   : > { %2148 = vmax.xlane.f32.xlu1 %v2147_v37  ;;  %v2144_v38 = vpop.f32.mrf.mxu1 }
 0xec6   : > { %v3568_v21 = vpop.f32.mrf.mxu1 }
 0xf33   : > { %v2252_v36 = vpop.f32.mrf.mxu1 }
 0xf34   : > { %v2253_v42 = vadd.f32 %v2252_v36, %v4507_v28 }
 0xf35   : > { %v3579_v46 = vpop.f32.mrf.mxu1 }
 0xf36   : > { %v2258_v12 = vsel %vm885_vm2, %v2253_v42, -inf }
 0xf37   : > { %2259 = vmax.xlane.f32.xlu0 %v2258_v12  ;;  %v2255_v10 = vpop.f32.mrf.mxu1 }
 0xf39   : > { %v3580_v47 = vpop.f32.mrf.mxu1 }
 0xf4d   : > { %v2149_v50 = vpop.xlane.xlu1 %2148  ;;  %2269 = vrot.lane.b32.xlu0 %v2100_v8, %s4090_s21 }
 0xf4e   : > { %v2150_v2 = vsub.f32 %v2142_v32, %v2149_v50 }
 0xf50   : > { %v2151_v1 = vmul.f32 1.442695, %v2150_v2 }
 0xf52   : > { %3820 = vpow2.f32 %v2151_v1 }
 0xf5f   : > { %v3821_v53 = vpop.eup %3820 }
 0xf60   : > { %v2156_v55 = vpack.c.bf16 %v3821_v53, %v3821_v53  ;;  %v2153_v56 = vsel %vm885_vm2, %v3821_v53, 0.0 }
 0xf62   : > { %3572 = vmatmul.mubr.msk.bf16.vlgmr.msra.gmra.mxu0 %vm885_vm2, %v2156_v55 }
 0xf63   : > { %3583 = vmatprep.mubr.msk.bf16.mxu0 %vm4089_vm0, %v4088_v0 }
 0xf6c   : > { %2154 = vadd.xlane.f32.xlu0 %v2153_v56 }
 0xfc0   : > { %v2260_v15 = vpop.xlane.xlu0 %2259 }
 0xfc1   : > { %v2261_v58 = vsub.f32 %v2253_v42, %v2260_v15 }
 0xfc3   : > { %v2262_v60 = vmul.f32 1.442695, %v2261_v58 }
 0xfc4   : > { %v2270_v61 = vpop.permute.xlu0 %2269 }
 0xfc5   : > { %3822 = vpow2.f32 %v2262_v60  ;;  %v2275_v4 = vsel %vm945_vm3, %v2270_v61, 0 }
 0xfc6   : > { %3582 = vmatpush3.bf16.msra.mxu0 %v2275_v4 }
 0xfc7   : > { %3593 = vmatprep.subr.bf16.mxu0 %v4088_v0 }
 0xfd2   : > { %v3823_v7 = vpop.eup %3822 }
 0xfd3   : > { %v2264_v3 = vsel %vm885_vm2, %v3823_v7, 0.0  ;;  %v2267_v8 = vpack.c.bf16 %v3823_v7, %v3823_v7 }
 0xfd4   : > { %2265 = vadd.xlane.f32.xlu1 %v2264_v3 }
 0xfd5   : > { %3584 = vmatmul.mubr.msk.bf16.vlgmr.msra.gmra.mxu0 %vm885_vm2, %v2267_v8 }
 0xfd6   : > { %3594 = vmatpush3.bf16.msra.mxu0 %v4537_v9  ;;  %3595 = vmatprep.mubr.msk.bf16.mxu0 %vm4089_vm0, %v4088_v0 }
 0xfd7   : > { %3607 = vmatprep.subr.bf16.mxu0 %v4088_v0 }
 0xff5   : > { %v2155_v6 = vpop.xlane.xlu0 %2154 }
 0xff6   : > { %3824 = vrcp.f32 %v2155_v6 }
0x1003   : > { %v3825_v11 = vpop.eup %3824 }
0x1022   : > { %v2197_v16 = vpop.f32.mrf.mxu0 }
0x1023   : > { %v2204_v20 = vmul.f32 %v3825_v11, %v2197_v16 }
0x1024   : > { %v3573_v25 = vpop.f32.mrf.mxu0 }
0x1025   : > { %v2205_v35 = vpack.c.bf16 %v2204_v20, %v2204_v20 }
0x1026   : > { %v2200_v31 = vpop.f32.mrf.mxu0 }
0x1027   : > { %3596 = vmatmul.mubr.msk.bf16.vlgmr.msra.gmra.mxu0 %vm885_vm2, %v2205_v35 }
0x1028   : > { %3608 = vmatpush3.bf16.msra.mxu0 %v4554_v18  ;;  %v3574_v32 = vpop.f32.mrf.mxu0  ;;  %3611 = vmatprep.mubr.msk.bf16.mxu0 %vm4089_vm0, %v4088_v0 }
0x1029   : > { %3609 = vmatprep.subr.bf16.mxu0 %v4088_v0 }
0x102c   : > { %3610 = vmatpush3.bf16.msra.mxu0 %v4560_v23 }
0x102d   : > { %3623 = vmatprep.subr.bf16.mxu0 %v4088_v0 }
0x102f   : > { %3612 = vmatmul.mubr.msk.bf16.vlgmr.msra.gmra.mxu0 %vm712_vm1, %v4786_v45 }
0x1030   : > { %3625 = vmatprep.mubr.msk.bf16.mxu0 %vm4089_vm0, %v4088_v0 }
0x105d   : > { %v2266_v9 = vpop.xlane.xlu1 %2265 }
0x105e   : > { %3826 = vrcp.f32 %v2266_v9 }
0x106b   : > { %v3827_v33 = vpop.eup %3826 }
0x1095   : > { %v2311_v18 = vpop.f32.mrf.mxu0 }
0x1096   : > { %v2318_v37 = vmul.f32 %v3827_v33, %v2311_v18 }
0x1097   : > { %v3585_v38 = vpop.f32.mrf.mxu0 }
0x1098   : > { %v2319_v21 = vpack.c.bf16 %v2318_v37, %v2318_v37 }
0x1099   : > { %v2314_v36 = vpop.f32.mrf.mxu0 }
0x109a   : > { %3590 = vmatmul.mubr.msk.bf16.vlgmr.msra.gmra.mxu1 %vm885_vm2, %v2319_v21 }
0x109b   : > { %3600 = vmatpush3.bf16.msra.mxu1 %v4569_v29  ;;  %v3586_v23 = vpop.f32.mrf.mxu0  ;;  %3603 = vmatprep.mubr.msk.bf16.mxu1 %vm4089_vm0, %v4088_v0 }
0x109c   : > { %3601 = vmatprep.subr.bf16.mxu1 %v4088_v0 }
0x109f   : > { %3602 = vmatpush3.bf16.msra.mxu1 %v4575_v34 }
0x10a0   : > { %3615 = vmatprep.subr.bf16.mxu1 %v4088_v0 }
0x10a2   : > { %3604 = vmatmul.mubr.msk.bf16.vlgmr.msra.gmra.mxu1 %vm712_vm1, %v4786_v45 }
0x10a3   : > { %3616 = vmatpush3.bf16.msra.mxu1 %v4592_v48  ;;  %3619 = vmatprep.mubr.msk.bf16.mxu1 %vm4089_vm0, %v4088_v0 }
0x10a4   : > { %3617 = vmatprep.subr.bf16.mxu1 %v4088_v0 }
0x10a7   : > { %3618 = vmatpush3.bf16.msra.mxu1 %v4598_v51 }
0x10a8   : > { %3629 = vmatprep.subr.bf16.mxu1 %v4088_v0 }
0x10aa   : > { %3620 = vmatmul.mubr.msk.bf16.vlgmr.msra.gmra.mxu1 %vm712_vm1, %v4786_v45 }
0x10ab   : > { %3631 = vmatprep.mubr.msk.bf16.mxu1 %vm4089_vm0, %v4088_v0 }
0x10e7   : > { %v4870_v29 = vpop.f32.mrf.mxu0 }
0x10e9   : > { %v3597_v34 = vpop.f32.mrf.mxu0 }
0x10eb   : > { %v2403_v42 = vpop.f32.mrf.mxu0 }
0x10ed   : > { %v3598_v48 = vpop.f32.mrf.mxu0 }
0x10ef   : > { %v2481_v46 = vpop.f32.mrf.mxu0 }
0x10f0   : > { %v2482_v12 = vadd.f32 %v2481_v46, %v4586_v40 }
0x10f1   : > { %v3613_v10 = vpop.f32.mrf.mxu0 }
0x10f2   : > { %v2487_v47 = vpack.c.bf16 %v2482_v12, %v2482_v12 }
0x10f3   : > { %v2484_v50 = vpop.f32.mrf.mxu0 }
0x10f4   : > { %v2533_v51 = vsel %vm885_vm2, %v2487_v47, 0 }
0x10f5   : > { %v3614_v2 = vpop.f32.mrf.mxu0  ;;  %3624 = vmatpush3.bf16.xpose.msra.mxu0 %v2533_v51 }
0x10f6   : > { %3635 = vmatprep.subr.bf16.mxu0 %v4088_v0 }
0x115a   : > { %v4875_v45 = vpop.f32.mrf.mxu1 }
0x115c   : > { %v3591_v1 = vpop.f32.mrf.mxu1 }
0x115e   : > { %v2360_v53 = vpop.f32.mrf.mxu1 }
0x1160   : > { %v3592_v55 = vpop.f32.mrf.mxu1 }
0x1162   : > { %v2440_v56 = vpop.f32.mrf.mxu1 }
0x1163   : > { %v2441_v15 = vadd.f32 %v2440_v56, %v4602_v54 }
0x1164   : > { %v3605_v58 = vpop.f32.mrf.mxu1 }
0x1165   : > { %v2446_v60 = vpack.c.bf16 %v2441_v15, %v2441_v15 }
0x1166   : > { %v2443_v40 = vpop.f32.mrf.mxu1 }
0x1167   : > { %3626 = vmatmul.mubr.msk.bf16.vlgmr.msra.gmra.mxu0 %vm885_vm2, %v2446_v60 }
0x1168   : > { %v3606_v61 = vpop.f32.mrf.mxu1  ;;  %3636 = vmatpush3.bf16.msra.mxu0 %v4633_v41  ;;  %3637 = vmatprep.mubr.msk.bf16.mxu0 %vm4089_vm0, %v4088_v0 }
0x1169   : > { %3647 = vmatprep.subr.bf16.mxu0 %v4088_v0 }
0x116a   : > { %v2522_v4 = vpop.f32.mrf.mxu1 }
0x116b   : > { %v2523_v7 = vadd.f32 %v2522_v4, %v4615_v14 }
0x116c   : > { %v3621_v3 = vpop.f32.mrf.mxu1 }
0x116d   : > { %v2528_v8 = vpack.c.bf16 %v2523_v7, %v2523_v7 }
0x116e   : > { %v2525_v6 = vpop.f32.mrf.mxu1 }
0x116f   : > { %v2589_v54 = vsel %vm945_vm3, %v2528_v8, 0 }
0x1170   : > { %v3622_v11 = vpop.f32.mrf.mxu1  ;;  %3630 = vmatpush3.bf16.msra.mxu1 %v2589_v54 }
0x1171   : > { %3641 = vmatprep.subr.bf16.mxu1 %v4088_v0 }
0x1227   : > { %v2569_v16 = vpop.f32.mrf.mxu0 }
0x1228   : > { %v2570_v41 = vadd.f32 %v2569_v16, %v4507_v28 }
0x1229   : > { %v3627_v20 = vpop.f32.mrf.mxu0 }
0x122a   : > { %v2575_v25 = vsel %vm885_vm2, %v2570_v41, -inf }
0x122b   : > { %2576 = vmax.xlane.f32.xlu1 %v2575_v25  ;;  %v2572_v35 = vpop.f32.mrf.mxu0 }
0x122d   : > { %v3628_v31 = vpop.f32.mrf.mxu0 }
0x123c   : > { %2682 = vrot.lane.b32.xlu1 %v2487_v47, %s4090_s21 }
0x1240   : > { %2679 = vrot.lane.b32.xlu1 %v2446_v60, %s4090_s21 }
0x12b4   : > { %v2577_v14 = vpop.xlane.xlu1 %2576 }
0x12b5   : > { %v2578_v32 = vsub.f32 %v2570_v41, %v2577_v14 }
0x12b7   : > { %v2579_v9 = vmul.f32 1.442695, %v2578_v32 }
0x12b8   : > { %v2683_v18 = vpop.permute.xlu1 %2682 }
0x12b9   : > { %3828 = vpow2.f32 %v2579_v9  ;;  %v2688_v21 = vsel %vm885_vm2, %v2683_v18, 0 }
0x12bc   : > { %v2680_v36 = vpop.permute.xlu1 %2679 }
0x12c6   : > { %v3829_v33 = vpop.eup %3828 }
0x12c7   : > { %v2581_v37 = vsel %vm885_vm2, %v3829_v33, 0.0  ;;  %v2584_v38 = vpack.c.bf16 %v3829_v33, %v3829_v33 }
0x12c8   : > { %2582 = vadd.xlane.f32.xlu0 %v2581_v37 }
0x12c9   : > { %3632 = vmatmul.mubr.msk.bf16.vlgmr.msra.gmra.mxu1 %vm885_vm2, %v2584_v38 }
0x12ca   : > { %3642 = vmatpush3.bf16.xpose.msra.mxu1 %v2688_v21  ;;  %3643 = vmatprep.mubr.msk.bf16.mxu1 %vm4089_vm0, %v4088_v0 }
0x12cb   : > { %3653 = vmatprep.subr.bf16.mxu1 %v4088_v0 }
0x12d1   : > { %3644 = vmatmul.mubr.msk.bf16.vlgmr.msra.gmra.mxu1 %vm885_vm2, %v2680_v36 }
0x12d2   : > { %3654 = vmatpush3.bf16.msra.mxu1 %v4653_v19  ;;  %3655 = vmatprep.mubr.msk.bf16.mxu1 %vm4089_vm0, %v4088_v0 }
0x12d3   : > { %3667 = vmatprep.subr.bf16.mxu1 %v4088_v0 }
0x12de   : > { %2741 = vrot.lane.b32.xlu0 %v2528_v8, %s4090_s21  ;;  %s5066_s21 = sld [smem:[#allocation24_spill]] }
0x12e4   : > { %p5068_p9 = scmp.ne.s32.totalorder %s5066_s21, 0 }
0x12e6   : > { %p4002_p11 = pnand %p4001_p2, %p5068_p9 }
0x12e8   : > { %p4003_p12 = pneg %p4002_p11 }
0x12ea   : > { %p4010_p10 = pnand %p4009_p6, %p4003_p12 }
0x1351   : > { %v2583_v23 = vpop.xlane.xlu0 %2582 }
0x1352   : > { %3830 = vrcp.f32 %v2583_v23 }
0x1355   : > { %v2742_v46 = vpop.permute.xlu0 %2741 }
0x1356   : > { %v2747_v50 = vsel %vm945_vm3, %v2742_v46, 0 }
0x135f   : > { %v3831_v34 = vpop.eup %3830 }
0x1389   : > { %v2625_v42 = vpop.f32.mrf.mxu1 }
0x138a   : > { %v2632_v48 = vmul.f32 %v3831_v34, %v2625_v42 }
0x138b   : > { %v3633_v12 = vpop.f32.mrf.mxu1 }
0x138c   : > { %v2633_v10 = vpack.c.bf16 %v2632_v48, %v2632_v48 }
0x138d   : > { %v2628_v47 = vpop.f32.mrf.mxu1 }
0x138e   : > { %3638 = vmatmul.mubr.msk.bf16.vlgmr.msra.gmra.mxu0 %vm885_vm2, %v2633_v10 }
0x138f   : > { %3648 = vmatpush3.bf16.msra.mxu0 %v2747_v50  ;;  %v3634_v19 = vpop.f32.mrf.mxu1  ;;  %3649 = vmatprep.mubr.msk.bf16.mxu0 %vm4089_vm0, %v4088_v0 }
0x1390   : > { %3659 = vmatprep.subr.bf16.mxu0 %v4088_v0 }
0x1391   : > { %v2724_v51 = vpop.f32.mrf.mxu1 }
0x1392   : > { %v2725_v2 = vadd.f32 %v2724_v51, %v4507_v28  ;;  %v2401_v28 = vadd.f32 %v4870_v29, %v4875_v45 }
0x1393   : > { %v3645_v1 = vpop.f32.mrf.mxu1 }
0x1394   : > { %v2730_v53 = vsel %vm885_vm2, %v2725_v2, -inf }
0x1395   : > { %2731 = vmax.xlane.f32.xlu1 %v2730_v53  ;;  %v2727_v55 = vpop.f32.mrf.mxu1 }
0x1397   : > { %v3646_v56 = vpop.f32.mrf.mxu1 }
0x141e   : > { %v2732_v15 = vpop.xlane.xlu1 %2731 }
0x141f   : > { %v2733_v58 = vsub.f32 %v2725_v2, %v2732_v15 }
0x1421   : > { %v2734_v60 = vmul.f32 1.442695, %v2733_v58 }
0x1423   : > { %3832 = vpow2.f32 %v2734_v60 }
0x1430   : > { %v3833_v40 = vpop.eup %3832 }
0x1431   : > { %v2736_v61 = vsel %vm885_vm2, %v3833_v40, 0.0  ;;  %v2739_v4 = vpack.c.bf16 %v3833_v40, %v3833_v40 }
0x1432   : > { %2737 = vadd.xlane.f32.xlu0 %v2736_v61 }
0x1433   : > { %3650 = vmatmul.mubr.msk.bf16.vlgmr.msra.gmra.mxu0 %vm885_vm2, %v2739_v4 }
0x1434   : > { %3660 = vmatpush3.bf16.msra.mxu0 %v4670_v52  ;;  %3663 = vmatprep.mubr.msk.bf16.mxu0 %vm4089_vm0, %v4088_v0 }
0x1435   : > { %3661 = vmatprep.subr.bf16.mxu0 %v4088_v0 }
0x1438   : > { %3662 = vmatpush3.bf16.msra.mxu0 %v4677_v5 }
0x1439   : > { %3675 = vmatprep.subr.bf16.mxu0 %v4088_v0 }
0x144e   : > { %v2671_v7 = vpop.f32.mrf.mxu0 }
0x144f   : > { %v2677_v3 = vadd.f32 %v2671_v7, %v2401_v28 }
0x1450   : > { %v3639_v8 = vpop.f32.mrf.mxu0 }
0x1452   : > { %v2674_v6 = vpop.f32.mrf.mxu0 }
0x1454   : > { %v3640_v54 = vpop.f32.mrf.mxu0 }
0x14bb   : > { %v2738_v11 = vpop.xlane.xlu0 %2737 }
0x14bc   : > { %3834 = vrcp.f32 %v2738_v11 }
0x14c9   : > { %v3835_v52 = vpop.eup %3834 }
0x14f3   : > { %v2783_v16 = vpop.f32.mrf.mxu0 }
0x14f4   : > { %v2790_v41 = vmul.f32 %v3835_v52, %v2783_v16 }
0x14f5   : > { %v3651_v20 = vpop.f32.mrf.mxu0 }
0x14f6   : > { %v2791_v25 = vpack.c.bf16 %v2790_v41, %v2790_v41 }
0x14f7   : > { %v2786_v35 = vpop.f32.mrf.mxu0 }
0x14f8   : > { %3656 = vmatmul.mubr.msk.bf16.vlgmr.msra.gmra.mxu1 %vm885_vm2, %v2791_v25 }
0x14f9   : > { %3668 = vmatpush3.bf16.msra.mxu1 %v4690_v62  ;;  %v3652_v5 = vpop.f32.mrf.mxu0  ;;  %3671 = vmatprep.mubr.msk.bf16.mxu1 %vm4089_vm0, %v4088_v0 }
0x14fa   : > { %3669 = vmatprep.subr.bf16.mxu1 %v4088_v0 }
0x14fd   : > { %3670 = vmatpush3.bf16.msra.mxu1 %v4694_v63 }
0x14fe   : > { %3683 = vmatprep.subr.bf16.mxu1 %v4088_v0 }
0x15b8   : > { %v2829_v29 = vpop.f32.mrf.mxu1 }
0x15b9   : > { %v2835_v45 = vadd.f32 %v2829_v29, %v2677_v3 }
0x15ba   : > { %v3657_v31 = vpop.f32.mrf.mxu1 }
0x15bb   : > { %v2836_v14 = vadd.f32 %v2835_v45, %v4782_v44 }
0x15bc   : > { %v2832_v32 = vpop.f32.mrf.mxu1 }
0x15bd   : > { %v2837_v9 = vadd.f32 %v4662_v43, %v2836_v14 }
0x15be   : > { %v3658_v33 = vpop.f32.mrf.mxu1 }
0x15bf   : > { %v2838_v62 = vsel %vm712_vm1, %v2837_v9, 0.0 }
0x15c0   : > { %2839 = vadd.xlane.f32.xlu1 %v2838_v62 }
0x1649   : > { %v2840_v18 = vpop.xlane.xlu1 %2839 }
0x164a   : > { %v2841_v37 = vmul.f32 0.03125, %v2840_v18 }
0x164c   : > { %v2842_v38 = vsub.f32 %v2837_v9, %v2841_v37 }
0x164e   : > { %v2843_v21 = vmul.f32 %v2842_v38, %v2842_v38 }
0x1650   : > { %v2844_v63 = vsel %vm712_vm1, %v2843_v21, 0.0 }
0x1651   : > { %2845 = vadd.xlane.f32.xlu1 %v2844_v63 }
0x16da   : > { %v2846_v36 = vpop.xlane.xlu1 %2845 }
0x16db   : > { %v2847_v23 = vmul.f32 0.03125, %v2846_v36 }
0x16dd   : > { %v2848_v34 = vadd.f32 1e-05, %v2847_v23 }
0x16df   : > { %3836 = vrsqrt.f32 %v2848_v34 }
0x16ec   : > { %v3837_v42 = vpop.eup %3836 }
0x16ed   : > { %v2850_v44 = vmul.f32 %v3837_v42, %v2842_v38 }
0x16ef   : > { %v2851_v48 = vmul.f32 %v4701_v13, %v2850_v44 }
0x16f1   : > { %v2852_v43 = vadd.f32 %v4706_v17, %v2851_v48 }
0x16f3   : > { %v2853_v46 = vpack.c.bf16 %v2852_v43, %v2852_v43 }
0x16f5   : > { %3664 = vmatmul.mubr.msk.bf16.vlgmr.msra.gmra.mxu0 %vm712_vm1, %v2853_v46  ;;  %3672 = vmatmul.mubr.msk.bf16.vlgmr.msra.gmra.mxu1 %vm712_vm1, %v2853_v46 }
0x16f6   : > { %3676 = vmatpush3.bf16.msra.mxu0 %v4713_v22  ;;  %3684 = vmatpush3.bf16.msra.mxu1 %v4718_v24 }
0x16f7   : > { %3677 = vmatprep.subr.bf16.mxu0 %v4088_v0  ;;  %3685 = vmatprep.subr.bf16.mxu1 %v4088_v0 }
0x16f8   : > { %3679 = vmatprep.mubr.msk.bf16.mxu0 %vm4089_vm0, %v4088_v0  ;;  %3687 = vmatprep.mubr.msk.bf16.mxu1 %vm4089_vm0, %v4088_v0 }
0x16fa   : > { %3678 = vmatpush3.bf16.msra.mxu0 %v4733_v26  ;;  %3686 = vmatpush3.bf16.msra.mxu1 %v4738_v27 }
0x17b5   : > { %v2891_v13 = vpop.f32.mrf.mxu0  ;;  %v2933_v17 = vpop.f32.mrf.mxu1 }
0x17b6   : > { %v2892_v22 = vadd.f32 %v4687_v59, %v2891_v13  ;;  %v2934_v24 = vadd.f32 %v2933_v17, %v4744_v30 }
0x17b7   : > { %v3665_v12 = vpop.f32.mrf.mxu0  ;;  %v3673_v10 = vpop.f32.mrf.mxu1 }
0x17b8   : > { %v2897_v47 = vmax.f32 %v2892_v22, 0.0  ;;  %v2939_v50 = vmax.f32 %v2934_v24, 0.0 }
0x17b9   : > { %v2894_v19 = vpop.f32.mrf.mxu0  ;;  %v2936_v51 = vpop.f32.mrf.mxu1 }
0x17ba   : > { %v2898_v2 = vpack.c.bf16 %v2897_v47, %v2897_v47  ;;  %v2940_v1 = vpack.c.bf16 %v2939_v50, %v2939_v50 }
0x17bb   : > { %v3666_v53 = vpop.f32.mrf.mxu0  ;;  %v3674_v0 = vpop.f32.mrf.mxu1 }
0x17bc   : > { %3680 = vmatmul.mubr.msk.bf16.vlgmr.msra.gmra.mxu0 %vm712_vm1, %v2940_v1  ;;  %3688 = vmatmul.mubr.msk.bf16.vlgmr.msra.gmra.mxu1 %vm712_vm1, %v2898_v2 }
0x187c   : > { %v2978_v26 = vpop.f32.mrf.mxu0  ;;  %v3021_v27 = vpop.f32.mrf.mxu1 }
0x187d   : > { %v3022_v55 = vadd.f32 %v3021_v27, %v2978_v26 }
0x187e   : > { %v3681_v59 = vpop.f32.mrf.mxu0  ;;  %v3689_v56 = vpop.f32.mrf.mxu1 }
0x187f   : > { %v3027_v30 = vadd.f32 %v3022_v55, %v2852_v43 }
0x1880   : > { %v2981_v15 = vpop.f32.mrf.mxu0  ;;  %v3024_v58 = vpop.f32.mrf.mxu1 }
0x1881   : > { %v3028_v60 = vadd.f32 %v4765_v57, %v3027_v30 }
0x1882   : > { %v3682_v40 = vpop.f32.mrf.mxu0  ;;  %v3690_v61 = vpop.f32.mrf.mxu1 }
0x1883   : > { %v3029_v4 = vsel %vm712_vm1, %v3028_v60, 0.0 }
0x1884   : > { %3030 = vadd.xlane.f32.xlu1 %v3029_v4 }
0x190d   : > { %v3031_v28 = vpop.xlane.xlu1 %3030 }
0x190e   : > { %v3032_v7 = vmul.f32 0.03125, %v3031_v28 }
0x1910   : > { %v3033_v3 = vsub.f32 %v3028_v60, %v3032_v7 }
0x1912   : > { %v3034_v8 = vmul.f32 %v3033_v3, %v3033_v3 }
0x1914   : > { %v3035_v6 = vsel %vm712_vm1, %v3034_v8, 0.0 }
0x1915   : > { %3036 = vadd.xlane.f32.xlu1 %v3035_v6 }
0x199e   : > { %v3037_v54 = vpop.xlane.xlu1 %3036 }
0x199f   : > { %v3038_v11 = vmul.f32 0.03125, %v3037_v54 }
0x19a1   : > { %v3039_v52 = vadd.f32 1e-05, %v3038_v11 }
0x19a3   : > { %3838 = vrsqrt.f32 %v3039_v52 }
0x19b0   : > { %v3839_v57 = vpop.eup %3838 }
0x19b1   : > { %v3041_v16 = vmul.f32 %v3839_v57, %v3033_v3 }
0x19b3   : > { %v3042_v41 = vmul.f32 %v4773_v39, %v3041_v16 }
0x19b5   : > { %v3043_v20 = vadd.f32 %v4778_v49, %v3042_v41 }
0x19b7   : > { %3044 = vst.msk [vmem:[%s677_s0] sm:$0xff] %vm712_vm1, %v3043_v20 }
0x19b8   : > { %4013 = shalt.err (!%p4010_p10)
}
0x19b9   : > { %s4014_s7 = scalar_lea.hbm %s3057_s19, 128  ;;  %s4018_s9 = scalar_lea.hbm %s5067_s26, 256 }
0x19ba   : > { %p4015_p3 = scmp.ne.s32.totalorder %s3057_s19, %s4014_s7  ;;  %p4019_p8 = scmp.lt.s32.totalorder %s3057_s19, %s5067_s26 }
0x19bb   : > { %p4020_p13 = scmp.lt.s32.totalorder %s4018_s9, %s4014_s7 }
0x19bc   : > { %p4016_p7 = pnand %p4015_p3, %p5068_p9 }
0x19bd   : > { %p4021_p0 = por %p4020_p13, %p4019_p8 }
0x19be   : > { %p4017_p5 = pneg %p4016_p7 }
0x19c0   : > { %p4022_p2 = pnand %p4021_p0, %p4017_p5 }
0x19c2   : > { %4025 = shalt.err (!%p4022_p2)
}
0x19c3   : > { %3711 = dma.vmem_to_hbm [thread:$0]  (%p5068_p9), %s3060_s29, 128, %s3057_s19, %s3046_s23  }
0x19c4 PF: > { %s5069_s20 = sld [smem:[#allocation20_spill]]  ;;  %p5072_p12 = scmp.ge.s32.totalorder %s4080_s30, 2 }
0x19c5   : > { %s5070_s5 = sld [smem:[#allocation25_spill]] }
0x19ca   : > { %s3071_s3 = sand.u32 1, %s5069_s20  }
0x19cb   : > { %p5071_p11 = scmp.ne.s32.totalorder %s5070_s5, 0  ;;  %s3072_s1 = scalar_lea.sflag [#allocation4], %s3071_s3 }
0x19cd   : > { %p3734_p1 = pnand %p5072_p12, %p5071_p11 }
0x19cf   : > { %p3735_p4 = pneg %p3734_p1 }
0x19d1   : > { %4063 = dma.done.wait (%p3735_p4), %s3072_s1, 128  }
0x19d2   : > { %4065 = vsyncadd (%p3735_p4), %s3072_s1, 4294967168  ;;  %s5073_s30 = sld [smem:[#allocation22_spill]]  ;;  %s5076_s27 = smov %s4072_s28 }
0x19d3   : > { %s5074_s24 = sld [smem:[#allocation21_spill]] }
0x19d4   : > { %s5075_s29 = sld [smem:[#allocation23_spill]] }
0x19d8   : > { %p36_p6 = scmp.ge.s32.totalorder %s5073_s30, 4  }
0x19d9   : > { %s5077_s28 = smov %s5074_s24 }
0x19da   :  { %38 = sbr.rel (!%p36_p6) target bundleno = 19 (0x13), region = 166 }
0x19df   :  { %3077 = vsyncpa [#allocation3], 1 }
0x19e0   :  { %3079 = vsyncpa [#allocation3 + $0x1], 1 }
0x19e1   :  { %3080 = vsyncpa [#allocation6], 1 }
0x19e2   :  { %3082 = vsyncpa [#allocation6 + $0x1], 1 }
0x19e3   :  { %3083 = vsyncpa [#allocation9], 1 }
0x19e4   :  { %3084 = vsyncpa [#allocation12], 1 }
0x19e5   :  { %3085 = vsyncpa [#allocation4], 1 }
0x19e6   :  { %3087 = vsyncpa [#allocation4 + $0x1], 1 }

// kernel: tpu_custom_call.1
= control target key start
LH: loop header
LB: loop body
LE: loop exit
PB: predicated region body
PF: predicated region fallthrough
CT: control target
= control target key end

     0   :  { %s4991_s0 = inlined_call_operand.hbm [shape: f32[2,8,32], index: 0, kind: input, shape index: {}, may-alias: {0,18}]   ;;  %s4992_s1 = inlined_call_operand.hbm [shape: bf16[2,8,8], index: 1, kind: input, shape index: {}]   ;;  %s4993_s2 = inlined_call_operand.vmem [shape: bf16[32,32], index: 2, kind: input, shape index: {}]   ;;  %s4994_s3 = inlined_call_operand.hbm [shape: f32[1,32], index: 3, kind: input, shape index: {}]   ;;  %s4995_s4 = inlined_call_operand.vmem [shape: bf16[32,32], index: 4, kind: input, shape index: {}]   ;;  %s4996_s5 = inlined_call_operand.hbm [shape: f32[1,32], index: 5, kind: input, shape index: {}]   ;;  %s4997_s6 = inlined_call_operand.vmem [shape: bf16[32,32], index: 6, kind: input, shape index: {}]   ;;  %s4998_s7 = inlined_call_operand.hbm [shape: f32[1,32], index: 7, kind: input, shape index: {}]   ;;  %s4999_s8 = inlined_call_operand.vmem [shape: bf16[32,32], index: 8, kind: input, shape index: {}]   ;;  %s5000_s9 = inlined_call_operand.hbm [shape: f32[1,32], index: 9, kind: input, shape index: {}]   ;;  %s5001_s10 = inlined_call_operand.vmem [shape: f32[1,32], index: 10, kind: input, shape index: {}]   ;;  %s5002_s11 = inlined_call_operand.vmem [shape: f32[1,32], index: 11, kind: input, shape index: {}]   ;;  %s5003_s12 = inlined_call_operand.vmem [shape: bf16[32,64], index: 12, kind: input, shape index: {}]   ;;  %s5004_s13 = inlined_call_operand.vmem [shape: f32[1,64], index: 13, kind: input, shape index: {}]   ;;  %s5005_s14 = inlined_call_operand.vmem [shape: bf16[64,32], index: 14, kind: input, shape index: {}]   ;;  %s5006_s15 = inlined_call_operand.vmem [shape: f32[1,32], index: 15, kind: input, shape index: {}]   ;;  %s5007_s16 = inlined_call_operand.vmem [shape: f32[1,32], index: 16, kind: input, shape index: {}]   ;;  %s5008_s17 = inlined_call_operand.vmem [shape: f32[1,32], index: 17, kind: input, shape index: {}]   ;;  %s5009_s18 = inlined_call_operand.hbm [shape: f32[2,8,32], index: 18, kind: output, shape index: {}, may-alias: {0,18}]  }
   0x1   :  { %5026 = sst [smem:[#allocation26_spill]] %s4991_s0 }
   0x2   :  { %5027 = sst [smem:[#allocation27_spill]] %s4992_s1 }
   0x3   :  { %5028 = sst [smem:[#allocation28_spill]] %s4993_s2 }
   0x4   :  { %5029 = sst [smem:[#allocation29_spill]] %s4994_s3 }
   0x5   :  { %5030 = sst [smem:[#allocation30_spill]] %s4996_s5 }
   0x6   :  { %5031 = sst [smem:[#allocation31_spill]] %s4998_s7 }
   0x7   :  { %5032 = sst [smem:[#allocation32_spill]] %s5000_s9 }
   0x8   :  { %5033 = sst [smem:[#allocation33_spill]] %s5008_s17 }
   0x9   :  { %5034 = sst [smem:[#allocation34_spill]] %s5009_s18 }
   0xa   :  { %23 = vsyncpa [#allocation3], 0 }
   0xb   :  { %25 = vsyncpa [#allocation3 + $0x1], 0 }
   0xc   :  { %26 = vsyncpa [#allocation6], 0 }
   0xd   :  { %28 = vsyncpa [#allocation6 + $0x1], 0 }
   0xe   :  { %29 = vsyncpa [#allocation9], 0 }
   0xf   :  { %30 = vsyncpa [#allocation12], 0 }
  0x10   :  { %31 = vsyncpa [#allocation4], 0 }
  0x11   :  { %33 = vsyncpa [#allocation4 + $0x1], 0  ;;  %s4189_s27 = smov 0   ;;  %s4191_s28 = smov 0  }
  0x12   :  { %s4193_s29 = smov 0   ;;  %s4195_s30 = smov 0  }
  0x13 LB: > { %5035 = sst [smem:[#allocation20_spill]] %s4068_s27  ;;  %s4082_s0 = smov [#allocation7]   ;;  %s4080_s30 = sphi %s4195_s30, %s5073_s30   ;;  %s4076_s29 = sphi %s4193_s29, %s5075_s29   ;;  %s4072_s28 = sphi %s4191_s28, %s5077_s28   ;;  %s4068_s27 = sphi %s4189_s27, %s5076_s27  }
  0x14   : > { %5036 = sst [smem:[#allocation21_spill]] %s4076_s29  ;;  %s474_s19 = sshll.u32 %s4082_s0, 4  ;;  %s475_s19 = int_to_ptr.vmem [resolvable:$true] %s474_s19 }
  0x15   : > { %s4210_s1 = sadd.s32 4294967295, %s4080_s30   ;;  %p3191_p0 = scmp.ge.s32.totalorder %s4080_s30, 1 }
  0x16   : > { %p5019_p1 = scmp.eq.s32.totalorder %s4210_s1, 0  ;;  %p458_p2 = scmp.lt.s32.totalorder %s4080_s30, 3 }
  0x17   : > { %s4083_s21 = smov [#allocation8]   ;;  %s4084_s2 = smov [#allocation10]  }
  0x18   : > { %p4215_p3 = pnand %p3191_p0, %p458_p2  ;;  %s488_s22 = sshll.u32 %s4083_s21, 4  ;;  %s4222_s22 = int_to_ptr.vmem [resolvable:$true] %s488_s22 }
  0x19   : > { %s502_s23 = sshll.u32 %s4084_s2, 4  ;;  %s4085_s25 = smov [#allocation11]   ;;  %s4230_s23 = int_to_ptr.vmem [resolvable:$true] %s502_s23 }
  0x1a   : > { %s5037_s20 = scalar_select %p4215_p3, 1, 0 }
  0x1b   : > { %p3713_p5 = pneg %p4215_p3  ;;  %s4232_s26 = sshll.u32 %s4085_s25, 4  ;;  %s517_s26 = int_to_ptr.vmem [resolvable:$true] %s4232_s26 }
  0x1c   : > { %s3851_s0 = scalar_lea.vmem %s475_s19, 16  ;;  %s3858_s21 = scalar_lea.vmem %s475_s19, 32 }
  0x1d   : > { %p4226_p6 = pnand %p3713_p5, %p5019_p1  ;;  %p3852_p8 = scmp.ne.s32.totalorder %s475_s19, %s3851_s0 }
  0x1e   : > { %p3859_p11 = scmp.lt.s32.totalorder %s475_s19, %s475_s19  ;;  %p3860_p12 = scmp.lt.s32.totalorder %s3858_s21, %s3851_s0 }
  0x1f   : > { %p3842_p7 = pneg %p4226_p6 }
  0x20   : > { %p3861_p13 = por %p3860_p12, %p3859_p11 }
  0x21   : > { %p3854_p9 = pnand %p3852_p8, %p3842_p7 }
  0x23   : > { %p3855_p10 = pneg %p3854_p9 }
  0x25   : > { %p3862_p0 = pnand %p3861_p13, %p3855_p10 }
  0x27   : > { %3865 = shalt.err (!%p3862_p0)
}
  0x28   : > { %s5039_s3 = sld [smem:[#allocation29_spill]]  ;;  %s3877_s25 = scalar_lea.vmem %s4222_s22, 16 }
  0x29   : > { %p3878_p2 = scmp.ne.s32.totalorder %s4222_s22, %s3877_s25  ;;  %s3884_s0 = scalar_lea.vmem %s4222_s22, 32 }
  0x2a   : > { %p3885_p9 = scmp.lt.s32.totalorder %s4222_s22, %s4222_s22  ;;  %p3886_p10 = scmp.lt.s32.totalorder %s3884_s0, %s3877_s25 }
  0x2b   : > { %p3880_p5 = pnand %p3878_p2, %p3842_p7 }
  0x2c   : > { %p3887_p11 = por %p3886_p10, %p3885_p9 }
  0x2d   : > { %p3881_p8 = pneg %p3880_p5 }
  0x2e   : > { %3716 = dma.hbm_to_vmem [thread:$0]  (!%p4226_p6), %s5039_s3, 16, %s475_s19, [#allocation6]  }
  0x2f   : > { %p3888_p12 = pnand %p3887_p11, %p3881_p8 }
  0x31   : > { %3891 = shalt.err (!%p3888_p12)
}
  0x32   : > { %s5040_s5 = sld [smem:[#allocation30_spill]]  ;;  %s3903_s19 = scalar_lea.vmem %s4230_s23, 16 }
  0x33   : > { %p3904_p13 = scmp.ne.s32.totalorder %s4230_s23, %s3903_s19  ;;  %s3910_s2 = scalar_lea.vmem %s4230_s23, 32 }
  0x34   : > { %p3911_p5 = scmp.lt.s32.totalorder %s4230_s23, %s4230_s23  ;;  %p3912_p8 = scmp.lt.s32.totalorder %s3910_s2, %s3903_s19 }
  0x35   : > { %p3906_p0 = pnand %p3904_p13, %p3842_p7 }
  0x36   : > { %p3913_p9 = por %p3912_p8, %p3911_p5 }
  0x37   : > { %p3907_p2 = pneg %p3906_p0 }
  0x38   : > { %3719 = dma.hbm_to_vmem [thread:$0]  (!%p4226_p6), %s5040_s5, 16, %s4222_s22, [#allocation9]  }
  0x39   : > { %p3914_p10 = pnand %p3913_p9, %p3907_p2 }
  0x3b   : > { %3917 = shalt.err (!%p3914_p10)
}
  0x3c   : > { %s5041_s7 = sld [smem:[#allocation31_spill]]  ;;  %s3929_s22 = scalar_lea.vmem %s517_s26, 16 }
  0x3d   : > { %p3930_p11 = scmp.ne.s32.totalorder %s517_s26, %s3929_s22  ;;  %s3936_s18 = scalar_lea.vmem %s517_s26, 32 }
  0x3e   : > { %p3937_p0 = scmp.lt.s32.totalorder %s517_s26, %s517_s26  ;;  %p3938_p2 = scmp.lt.s32.totalorder %s3936_s18, %s3929_s22 }
  0x3f   : > { %p3932_p12 = pnand %p3930_p11, %p3842_p7 }
  0x40   : > { %p3939_p5 = por %p3938_p2, %p3937_p0 }
  0x41   : > { %p3933_p13 = pneg %p3932_p12 }
  0x42   : > { %3722 = dma.hbm_to_vmem [thread:$0]  (!%p4226_p6), %s5041_s7, 16, %s4230_s23, [#allocation9]  }
  0x43   : > { %p3940_p8 = pnand %p3939_p5, %p3933_p13 }
  0x45   : > { %3943 = shalt.err (!%p3940_p8)
}
  0x46   : > { %s5042_s9 = sld [smem:[#allocation32_spill]]  ;;  %s3190_s23 = sadd.s32 4294967294, %s4080_s30  }
  0x47   : > { %s4283_s24 = sadd.s32 1, %s4080_s30   ;;  %s46_s25 = sadd.s32 1, %s4076_s29 }
  0x48   : > { %5043 = sst [smem:[#allocation22_spill]] %s4283_s24  ;;  %s43_s2 = ssub.s32 %s4080_s30, %s4283_s24 }
  0x49   : > { %p44_p7 = scmp.eq.s32.totalorder %s43_s2, 0  ;;  %p53_p9 = scmp.ne.s32.totalorder %s4076_s29, %s4072_s28 }
  0x4a   : > { %p54_p10 = scmp.eq.s32.totalorder %s4080_s30, 0  ;;  %p59_p11 = scmp.ne.s32.totalorder %s4072_s28, %s4068_s27 }
  0x4b   : > { %s4294_s0 = scalar_select %p44_p7, %s4076_s29, %s46_s25  }
  0x4c   : > { %3725 = dma.hbm_to_vmem [thread:$0]  (!%p4226_p6), %s5042_s9, 16, %s517_s26, [#allocation12]  }
  0x4d   : > { %5044 = sst [smem:[#allocation23_spill]] %s4294_s0  ;;  %p4296_p12 = por %p54_p10, %p53_p9 }
  0x4e   : > { %p4302_p6 = por %p5019_p1, %p59_p11  ;;  %p445_p13 = scmp.eq.s32.totalorder %s4210_s1, 1 }
  0x4f   : > { %p451_p0 = scmp.eq.s32.totalorder %s3190_s23, 1  ;;  %p3741_p2 = scmp.lt.s32.totalorder %s4080_s30, 2 }
  0x50   : > { %s5046_s26 = scalar_select %p4302_p6, 1, 0 }
  0x51   : > { %s4309_s18 = sand.u32 1, %s4076_s29   ;;  %p4311_p5 = por %p445_p13, %p53_p9 }
  0x52   : > { %p4315_p8 = por %p451_p0, %p59_p11  ;;  %s3197_s2 = sshll.u32 %s4309_s18, 3 }
  0x53   : > { %s5047_s21 = scalar_select %p4311_p5, 1, 0 }
  0x54   : > { %s5049_s19 = scalar_select %p4315_p8, 1, 0 }
  0x55   : > { %5048 = sst [smem:[#allocation24_spill]] %s5047_s21  ;;  %s3198_s25 = sshll.u32 %s4080_s30, 7 }
  0x56   : > { %5050 = sst [smem:[#allocation25_spill]] %s5049_s19  ;;  %s555_s9 = scalar_lea.vmem [#allocation2], %s3197_s2 }
  0x57   : > { %s5051_s7 = sld [smem:[#allocation26_spill]]  ;;  %s562_s0 = sshll.u32 %s555_s9, 4  ;;  %s4326_s0 = int_to_ptr.vmem [resolvable:$true] %s562_s0 }
  0x58   : > { %p4330_p7 = pnand %p3741_p2, %p4296_p12  ;;  %s552_s27 = scalar_lea.sflag [#allocation3], %s4309_s18 }
  0x5a   : > { %p3946_p10 = pneg %p4330_p7 }
  0x5d   : > { %s4324_s23 = scalar_lea.hbm %s5051_s7, %s3198_s25  ;;  %s3949_s22 = scalar_lea.hbm %s5051_s7, 256 }
  0x5e   : > { %s3944_s3 = scalar_lea.hbm %s4324_s23, 128  ;;  %p3950_p12 = scmp.lt.s32.totalorder %s4324_s23, %s5051_s7 }
  0x5f   : > { %p3945_p9 = scmp.ne.s32.totalorder %s4324_s23, %s3944_s3  ;;  %p3951_p0 = scmp.lt.s32.totalorder %s3949_s22, %s3944_s3 }
  0x61   : > { %p3947_p11 = pnand %p3946_p10, %p3945_p9  ;;  %p3952_p2 = por %p3951_p0, %p3950_p12 }
  0x63   : > { %p3948_p13 = pneg %p3947_p11 }
  0x65   : > { %p3953_p4 = pnand %p3952_p2, %p3948_p13 }
  0x67   : > { %3956 = shalt.err (!%p3953_p4)
}
  0x68   : > { %s3957_s24 = scalar_lea.vmem %s4326_s0, 128  ;;  %s4086_s5 = smov [#allocation2]  }
  0x69   : > { %p3958_p1 = scmp.ne.s32.totalorder %s4326_s0, %s3957_s24  ;;  %s3962_s9 = sshll.u32 %s4086_s5, 4  ;;  %s3963_s9 = int_to_ptr.vmem [resolvable:$false] %s3962_s9 }
  0x6a   : > { %s3964_s19 = scalar_lea.vmem %s3963_s9, 256  ;;  %p3965_p8 = scmp.lt.s32.totalorder %s4326_s0, %s3963_s9 }
  0x6b   : > { %p3960_p9 = pnand %p3958_p1, %p3946_p10  ;;  %p3966_p5 = scmp.lt.s32.totalorder %s3964_s19, %s3957_s24 }
  0x6d   : > { %p3961_p11 = pneg %p3960_p9  ;;  %p3967_p6 = por %p3966_p5, %p3965_p8 }
  0x6f   : > { %p3968_p12 = pnand %p3967_p6, %p3961_p11 }
  0x71   : > { %3971 = shalt.err (!%p3968_p12)
}
  0x72   : > { %3729 = dma.hbm_to_vmem [thread:$0]  (!%p4330_p7), %s4324_s23, 128, %s4326_s0, %s552_s27  }
  0x73   : > { %s3200_s3 = sshll.u32 %s4080_s30, 6  ;;  %s5053_s25 = sld [smem:[#allocation27_spill]] }
  0x74   : > { %s5054_s9 = sshll.u32 %s4309_s18, 2  ;;  %s5055_s7 = sand.u32 1, %s4080_s30  }
  0x75   : > { %s573_s24 = scalar_lea.vmem [#allocation5], %s5054_s9  ;;  %s570_s21 = scalar_lea.sflag [#allocation6], %s5055_s7 }
  0x76   : > { %s580_s19 = sshll.u32 %s573_s24, 4  ;;  %s581_s19 = int_to_ptr.vmem [resolvable:$true] %s580_s19 }
  0x79   : > { %s4365_s5 = scalar_lea.hbm %s5053_s25, %s3200_s3  ;;  %s3977_s23 = scalar_lea.hbm %s5053_s25, 128 }
  0x7a   : > { %s3972_s17 = scalar_lea.hbm %s4365_s5, 64  ;;  %p3978_p5 = scmp.lt.s32.totalorder %s4365_s5, %s5053_s25 }
  0x7b   : > { %p3973_p1 = scmp.ne.s32.totalorder %s4365_s5, %s3972_s17  ;;  %p3979_p8 = scmp.lt.s32.totalorder %s3977_s23, %s3972_s17 }
  0x7d   : > { %p3975_p4 = pnand %p3973_p1, %p3946_p10  ;;  %p3980_p13 = por %p3979_p8, %p3978_p5 }
  0x7f   : > { %p3976_p6 = pneg %p3975_p4 }
  0x81   : > { %p3981_p0 = pnand %p3980_p13, %p3976_p6 }
  0x83   : > { %3984 = shalt.err (!%p3981_p0)
}
  0x84   : > { %s3985_s22 = scalar_lea.vmem %s581_s19, 64  ;;  %s4087_s7 = smov [#allocation5]  }
  0x85   : > { %p3986_p2 = scmp.ne.s32.totalorder %s581_s19, %s3985_s22  ;;  %s3990_s2 = sshll.u32 %s4087_s7, 4  ;;  %s3991_s2 = int_to_ptr.vmem [resolvable:$false] %s3990_s2 }
  0x86   : > { %s3992_s9 = scalar_lea.vmem %s3991_s2, 128  ;;  %p3993_p12 = scmp.lt.s32.totalorder %s581_s19, %s3991_s2 }
  0x87   : > { %p3988_p9 = pnand %p3986_p2, %p3946_p10  ;;  %p3994_p1 = scmp.lt.s32.totalorder %s3992_s9, %s3985_s22 }
  0x89   : > { %p3989_p11 = pneg %p3988_p9  ;;  %p3995_p4 = por %p3994_p1, %p3993_p12 }
  0x8b   : > { %p3996_p3 = pnand %p3995_p4, %p3989_p11 }
  0x8d   : > { %3999 = shalt.err (!%p3996_p3)
}
  0x8e   : > { %3732 = dma.hbm_to_vmem [thread:$0]  (!%p4330_p7), %s4365_s5, 64, %s581_s19, %s570_s21  }
  0x8f   : > { %p5056_p6 = scmp.ne.s32.totalorder %s5037_s20, 0 }
  0x90   : > { %s4392_s17 = sand.u32 (!%p5056_p6), 1, %s4072_s28   ;;  %p5057_p10 = scmp.ne.s32.totalorder (!%p5056_p6), %s5046_s26, 0 }
  0x91   : > { %589 = sbr.rel (%p5056_p6) target bundleno = 6596 (0x19c4), region = 92  ;;  %s3202_s24 = sshll.u32 (!%p5056_p6), %s4392_s17, 3 }
  0x92   : > { %s592_s27 = scalar_lea.sflag (!%p5056_p6), [#allocation3], %s4392_s17  ;;  %s595_s0 = scalar_lea.vmem (!%p5056_p6), [#allocation2], %s3202_s24 }
  0x96   : > { %4043 = dma.done.wait (%p5057_p10), %s592_s27, 128  }
  0x97   : > { %4045 = vsyncadd (%p5057_p10), %s592_s27, 4294967168  ;;  %s600_s29 = sand.u32 1, %s4210_s1   ;;  %s3203_s20 = sshll.u32 %s4392_s17, 2 }
  0x98   : > { %s601_s21 = scalar_lea.sflag [#allocation6], %s600_s29  ;;  %s4404_s5 = scalar_lea.vmem [#allocation5], %s3203_s20 }
  0x99   : > { %4047 = dma.done.wait (%p5057_p10), %s601_s21, 64  }
  0x9a   : > { %4049 = vsyncadd (%p5057_p10), %s601_s21, 4294967232  ;;  %p5058_p3 = scmp.eq.s32.totalorder %s4210_s1, 0 }
  0x9c   : > { %4051 = dma.done.wait (%p5058_p3), [#allocation6], 16   ;;  %p5059_p7 = pmov %p5058_p3 }
  0x9d   : > { %p5060_p5 = pmov %p5058_p3 }
  0x9e   : > { %4053 = vsyncadd (%p5059_p7), [#allocation6], 4294967280 }
  0x9f   : > { %4055 = dma.done.wait (%p5060_p5), [#allocation9], 32   ;;  %p5061_p8 = pmov %p5058_p3 }
  0xa0   : > { %p5062_p13 = pmov %p5058_p3 }
  0xa1   : > { %4057 = vsyncadd (%p5061_p8), [#allocation9], 4294967264 }
  0xa2   : > { %4059 = dma.done.wait (%p5062_p13), [#allocation12], 16   ;;  %p5063_p0 = pmov %p5058_p3 }
  0xa3   : > { %v4088_v0 = vmov 0.0   ;;  %vm4089_vm0 = vmmov 0   ;;  %v4431_v1 = vld [vmem:[%s4995_s4 + $0x8] sm:$0xff]   ;;  %s5064_s18 = sld [smem:[#allocation28_spill]]  ;;  %v4442_v3 = vld [vmem:[%s4995_s4] sm:$0xff]   ;;  %vm712_vm1 = vcmask 261120  }
  0xa4   : > { %4061 = vsyncadd (%p5063_p0), [#allocation12], 4294967280  ;;  %3395 = vmatprep.subr.bf16.mxu1 %v4088_v0  ;;  %3387 = vmatprep.subr.bf16.mxu0 %v4088_v0  ;;  %v4452_v5 = vld [vmem:[%s595_s0] sm:$0xff]  ;;  %v4470_v7 = vld [vmem:[#allocation8] ss:$0 sm:$0xff]  ;;  %vm885_vm2 = vcmask 64512  }
  0xa5   : > { %3399 = vmatprep.mubr.msk.bf16.mxu1 %vm4089_vm0, %v4088_v0  ;;  %3391 = vmatprep.mubr.msk.bf16.mxu0 %vm4089_vm0, %v4088_v0  ;;  %v4456_v6 = vpack.c.bf16 %v4452_v5, %v4452_v5  ;;  %v4472_v8 = vld [vmem:[#allocation7] ss:$0 sm:$0xff]  ;;  %v4477_v10 = vld [vmem:[%s4997_s6 + $0x8] sm:$0xff]   ;;  %v4485_v15 = vld [vmem:[%s4997_s6] sm:$0xff]   ;;  %s4090_s21 = smov 120   ;;  %vm945_vm3 = vcmask 1043456  }
  0xa6   : > { %3396 = vmatpush3.bf16.msra.mxu1 %v4431_v1  ;;  %v680_v27 = vld [vmem:[%s4404_s5] sm:$0xf]  ;;  %v4511_v35 = vld [vmem:[#allocation10] ss:$0 sm:$0xff]  ;;  %s4091_s5 = smov 112   ;;  %s5065_s9 = sld [smem:[#allocation33_spill]] }
  0xa7   : > { %3397 = vmatprep.subr.bf16.mxu1 %v4088_v0  ;;  %v4507_v28 = vunpack.c.l.bf16 %v680_v27  ;;  %v992_v60 = vld [vmem:[%s4999_s8] sm:$0xf]  ;;  %s3276_s27 = sshll.u32 %s4210_s1, 7  ;;  %s677_s0 = scalar_lea.vmem [#allocation13], %s3202_s24 }
  0xa8   : > { %s3059_s29 = sshll.u32 %s677_s0, 4  ;;  %s5067_s26 = sld [smem:[#allocation34_spill]]  ;;  %s3060_s29 = int_to_ptr.vmem [resolvable:$true] %s3059_s29 }
  0xa9   : > { %v4436_v2 = vld [vmem:[%s5064_s18 + $0x8] sm:$0xff]   ;;  %v4449_v4 = vld [vmem:[%s5064_s18] sm:$0xff]   ;;  %s3046_s23 = scalar_lea.sflag [#allocation4], %s4392_s17  ;;  %s4000_s3 = scalar_lea.vmem %s3060_s29, 128 }
  0xaa   : > { %3388 = vmatpush3.bf16.msra.mxu0 %v4436_v2  ;;  %3398 = vmatpush3.bf16.msra.mxu1 %v4442_v3  ;;  %p4001_p2 = scmp.ne.s32.totalorder %s3060_s29, %s4000_s3  ;;  %s4093_s1 = smov [#allocation13]  }
  0xab   : > { %3389 = vmatprep.subr.bf16.mxu0 %v4088_v0  ;;  %3411 = vmatprep.subr.bf16.mxu1 %v4088_v0  ;;  %s4004_s24 = sshll.u32 %s4093_s1, 4  ;;  %s4005_s24 = int_to_ptr.vmem [resolvable:$false] %s4004_s24 }
  0xac   : > { %s4006_s22 = scalar_lea.vmem %s4005_s24, 256  ;;  %p4007_p1 = scmp.lt.s32.totalorder %s3060_s29, %s4005_s24 }
  0xad   : > { %3400 = vmatmul.mubr.msk.bf16.vlgmr.msra.gmra.mxu1 %vm712_vm1, %v4456_v6  ;;  %p4008_p4 = scmp.lt.s32.totalorder %s4006_s22, %s4000_s3 }
  0xae   : > { %3390 = vmatpush3.bf16.msra.mxu0 %v4449_v4  ;;  %3413 = vmatprep.mubr.msk.bf16.mxu1 %vm4089_vm0, %v4088_v0  ;;  %s3057_s19 = scalar_lea.hbm %s5067_s26, %s3276_s27 }
  0xaf   : > { %3403 = vmatprep.subr.bf16.mxu0 %v4088_v0  ;;  %p4009_p6 = por %p4008_p4, %p4007_p1 }
  0xb1   : > { %3392 = vmatmul.mubr.msk.bf16.vlgmr.msra.gmra.mxu0 %vm712_vm1, %v4456_v6 }
  0xb2   : > { %3407 = vmatprep.mubr.msk.bf16.mxu0 %vm4089_vm0, %v4088_v0  ;;  %3404 = vmatpush3.bf16.msra.mxu0 %v4477_v10 }
  0xb3   : > { %3405 = vmatprep.subr.bf16.mxu0 %v4088_v0 }
  0xb6   : > { %3406 = vmatpush3.bf16.msra.mxu0 %v4485_v15 }
  0xb7   : > { %3417 = vmatprep.subr.bf16.mxu0 %v4088_v0 }
  0xb9   : > { %3408 = vmatmul.mubr.msk.bf16.vlgmr.msra.gmra.mxu0 %vm712_vm1, %v4456_v6 }
  0xba   : > { %3419 = vmatprep.mubr.msk.bf16.mxu0 %vm4089_vm0, %v4088_v0 }
 0x16d   : > { %v814_v9 = vpop.f32.mrf.mxu1 }
 0x16e   : > { %v815_v11 = vadd.f32 %v4470_v7, %v814_v9  ;;  %v4537_v9 = vsel %vm945_vm3, %v992_v60, 0 }
 0x16f   : > { %v3401_v14 = vpop.f32.mrf.mxu1 }
 0x170   : > { %v820_v16 = vpack.c.bf16 %v815_v11, %v815_v11  ;;  %v1107_v11 = vld [vmem:[%s4999_s8 + $0x4] sm:$0xf] }
 0x171   : > { %v750_v12 = vpop.f32.mrf.mxu0  ;;  %v817_v18 = vpop.f32.mrf.mxu1 }
 0x172   : > { %v751_v13 = vadd.f32 %v4472_v8, %v750_v12  ;;  %v890_v19 = vsel %vm885_vm2, %v820_v16, 0  ;;  %997 = vrot.lane.b32.xlu0 %v820_v16, %s4090_s21  ;;  %v4548_v12 = vsel %vm945_vm3, %v1107_v11, 0 }
 0x173   : > { %v3393_v17 = vpop.f32.mrf.mxu0  ;;  %v3402_v22 = vpop.f32.mrf.mxu1  ;;  %3412 = vmatpush3.bf16.xpose.msra.mxu1 %v890_v19 }
 0x174   : > { %v756_v20 = vpack.c.bf16 %v751_v13, %v751_v13  ;;  %3423 = vmatprep.subr.bf16.mxu1 %v4088_v0 }
 0x175   : > { %v753_v21 = vpop.f32.mrf.mxu0 }
 0x176   : > { %994 = vrot.lane.b32.xlu0 %v756_v20, %s4090_s21 }
 0x177   : > { %v3394_v23 = vpop.f32.mrf.mxu0 }
 0x179   : > { %v878_v36 = vpop.f32.mrf.mxu0 }
 0x17a   : > { %3414 = vmatmul.mubr.msk.bf16.vlgmr.msra.gmra.mxu1 %vm885_vm2, %v756_v20  ;;  %v879_v37 = vadd.f32 %v4511_v35, %v878_v36 }
 0x17b   : > { %3425 = vmatprep.mubr.msk.bf16.mxu1 %vm4089_vm0, %v4088_v0  ;;  %v3409_v38 = vpop.f32.mrf.mxu0 }
 0x17c   : > { %v884_v39 = vpack.c.bf16 %v879_v37, %v879_v37 }
 0x17d   : > { %v881_v40 = vpop.f32.mrf.mxu0 }
 0x17e   : > { %v947_v41 = vsel %vm945_vm3, %v884_v39, 0  ;;  %1056 = vrot.lane.b32.xlu0 %v884_v39, %s4090_s21 }
 0x17f   : > { %v3410_v42 = vpop.f32.mrf.mxu0  ;;  %3418 = vmatpush3.bf16.msra.mxu0 %v947_v41 }
 0x180   : > { %3429 = vmatprep.subr.bf16.mxu0 %v4088_v0 }
 0x1e4   : > { %v998_v24 = vpop.permute.xlu0 %997 }
 0x1e5   : > { %v1003_v25 = vsel %vm885_vm2, %v998_v24, 0 }
 0x1e6   : > { %3424 = vmatpush3.bf16.xpose.msra.mxu1 %v1003_v25 }
 0x1e7   : > { %3435 = vmatprep.subr.bf16.mxu1 %v4088_v0 }
 0x1e8   : > { %v995_v26 = vpop.permute.xlu0 %994 }
 0x1ed   : > { %3426 = vmatmul.mubr.msk.bf16.vlgmr.msra.gmra.mxu1 %vm885_vm2, %v995_v26 }
 0x1ee   : > { %3437 = vmatprep.mubr.msk.bf16.mxu1 %vm4089_vm0, %v4088_v0  ;;  %3436 = vmatpush3.bf16.msra.mxu1 %v4548_v12 }
 0x1ef   : > { %3447 = vmatprep.subr.bf16.mxu1 %v4088_v0 }
 0x1f0   : > { %v1057_v52 = vpop.permute.xlu0 %1056 }
 0x1f1   : > { %v1062_v56 = vsel %vm945_vm3, %v1057_v52, 0 }
 0x23a   : > { %v926_v29 = vpop.f32.mrf.mxu1 }
 0x23b   : > { %v927_v30 = vadd.f32 %v926_v29, %v4507_v28 }
 0x23c   : > { %v3415_v31 = vpop.f32.mrf.mxu1 }
 0x23d   : > { %v932_v32 = vsel %vm885_vm2, %v927_v30, -inf }
 0x23e   : > { %933 = vmax.xlane.f32.xlu1 %v932_v32  ;;  %v929_v33 = vpop.f32.mrf.mxu1 }
 0x240   : > { %v3416_v34 = vpop.f32.mrf.mxu1 }
 0x2ad   : > { %v1039_v43 = vpop.f32.mrf.mxu1 }
 0x2ae   : > { %v1040_v44 = vadd.f32 %v1039_v43, %v4507_v28 }
 0x2af   : > { %v3427_v45 = vpop.f32.mrf.mxu1 }
 0x2b0   : > { %v1045_v46 = vsel %vm885_vm2, %v1040_v44, -inf }
 0x2b1   : > { %1046 = vmax.xlane.f32.xlu1 %v1045_v46  ;;  %v1042_v47 = vpop.f32.mrf.mxu1 }
 0x2b3   : > { %v3428_v48 = vpop.f32.mrf.mxu1 }
 0x2c7   : > { %v934_v49 = vpop.xlane.xlu1 %933 }
 0x2c8   : > { %v935_v50 = vsub.f32 %v927_v30, %v934_v49 }
 0x2ca   : > { %v936_v51 = vmul.f32 1.442695, %v935_v50 }
 0x2cc   : > { %3800 = vpow2.f32 %v936_v51 }
 0x2d9   : > { %v3801_v53 = vpop.eup %3800 }
 0x2da   : > { %v938_v54 = vsel %vm885_vm2, %v3801_v53, 0.0  ;;  %v941_v55 = vpack.c.bf16 %v3801_v53, %v3801_v53 }
 0x2db   : > { %939 = vadd.xlane.f32.xlu1 %v938_v54 }
 0x2dc   : > { %3420 = vmatmul.mubr.msk.bf16.vlgmr.msra.gmra.mxu0 %vm885_vm2, %v941_v55 }
 0x2dd   : > { %3430 = vmatpush3.bf16.msra.mxu0 %v1062_v56  ;;  %3431 = vmatprep.mubr.msk.bf16.mxu0 %vm4089_vm0, %v4088_v0 }
 0x2de   : > { %3441 = vmatprep.subr.bf16.mxu0 %v4088_v0 }
 0x2ec   : > { %1252 = vrot.lane.b32.xlu1 %v4431_v1, %s4091_s5 }
 0x2f0   : > { %1250 = vrot.lane.b32.xlu1 %v4442_v3, %s4091_s5 }
 0x2f4   : > { %1202 = vrot.lane.b32.xlu1 %v4436_v2, %s4091_s5 }
 0x2f8   : > { %1200 = vrot.lane.b32.xlu1 %v4449_v4, %s4091_s5 }
 0x2fc   : > { %1256 = vrot.lane.b32.xlu1 %v4470_v7, %s4091_s5 }
 0x300   : > { %1302 = vrot.lane.b32.xlu1 %v4477_v10, %s4091_s5 }
 0x304   : > { %1300 = vrot.lane.b32.xlu1 %v4485_v15, %s4091_s5 }
 0x33a   : > { %v1047_v57 = vpop.xlane.xlu1 %1046 }
 0x33b   : > { %v1048_v58 = vsub.f32 %v1040_v44, %v1047_v57 }
 0x33d   : > { %v1049_v59 = vmul.f32 1.442695, %v1048_v58 }
 0x33f   : > { %3802 = vpow2.f32 %v1049_v59 }
 0x34c   : > { %v3803_v61 = vpop.eup %3802 }
 0x34d   : > { %v1051_v62 = vsel %vm885_vm2, %v3803_v61, 0.0  ;;  %v1054_v63 = vpack.c.bf16 %v3803_v61, %v3803_v61 }
 0x34e   : > { %1052 = vadd.xlane.f32.xlu0 %v1051_v62 }
 0x34f   : > { %3432 = vmatmul.mubr.msk.bf16.vlgmr.msra.gmra.mxu0 %vm885_vm2, %v1054_v63 }
 0x350   : > { %3442 = vmatpush3.bf16.msra.mxu0 %v4537_v9  ;;  %3443 = vmatprep.mubr.msk.bf16.mxu0 %vm4089_vm0, %v4088_v0 }
 0x351   : > { %3455 = vmatprep.subr.bf16.mxu0 %v4088_v0 }
 0x364   : > { %1206 = vrot.lane.b32.xlu0 %v4472_v8, %s4091_s5  ;;  %v940_v13 = vpop.xlane.xlu1 %939 }
 0x365   : > { %3804 = vrcp.f32 %v940_v13 }
 0x368   : > { %1306 = vrot.lane.b32.xlu0 %v4511_v35, %s4091_s5  ;;  %v4554_v18 = vpop.permute.xlu1 %1252  ;;  %s4092_s5 = smov 96  }
 0x36c   : > { %v4560_v23 = vpop.permute.xlu1 %1250 }
 0x370   : > { %v4569_v29 = vpop.permute.xlu1 %1202 }
 0x372   : > { %v3805_v14 = vpop.eup %3804 }
 0x374   : > { %v4575_v34 = vpop.permute.xlu1 %1200 }
 0x378   : > { %v4586_v40 = vpop.permute.xlu1 %1256 }
 0x37c   : > { %v4592_v48 = vpop.permute.xlu1 %1302 }
 0x380   : > { %v4598_v51 = vpop.permute.xlu1 %1300 }
 0x39c   : > { %v983_v16 = vpop.f32.mrf.mxu0 }
 0x39d   : > { %v990_v17 = vmul.f32 %v3805_v14, %v983_v16 }
 0x39e   : > { %v3421_v19 = vpop.f32.mrf.mxu0 }
 0x39f   : > { %v991_v20 = vpack.c.bf16 %v990_v17, %v990_v17 }
 0x3a0   : > { %v986_v21 = vpop.f32.mrf.mxu0 }
 0x3a1   : > { %3444 = vmatmul.mubr.msk.bf16.vlgmr.msra.gmra.mxu0 %vm885_vm2, %v991_v20 }
 0x3a2   : > { %v3422_v22 = vpop.f32.mrf.mxu0  ;;  %3456 = vmatpush3.bf16.msra.mxu0 %v4554_v18  ;;  %3459 = vmatprep.mubr.msk.bf16.mxu0 %vm4089_vm0, %v4088_v0 }
 0x3a3   : > { %3457 = vmatprep.subr.bf16.mxu0 %v4088_v0 }
 0x3a6   : > { %3458 = vmatpush3.bf16.msra.mxu0 %v4560_v23 }
 0x3a7   : > { %3471 = vmatprep.subr.bf16.mxu0 %v4088_v0 }
 0x3a9   : > { %3460 = vmatmul.mubr.msk.bf16.vlgmr.msra.gmra.mxu0 %vm712_vm1, %v4456_v6 }
 0x3aa   : > { %3473 = vmatprep.mubr.msk.bf16.mxu0 %vm4089_vm0, %v4088_v0 }
 0x3d7   : > { %v1053_v24 = vpop.xlane.xlu0 %1052 }
 0x3d8   : > { %3806 = vrcp.f32 %v1053_v24 }
 0x3db   : > { %v4602_v54 = vpop.permute.xlu0 %1206 }
 0x3df   : > { %v4615_v14 = vpop.permute.xlu0 %1306 }
 0x3e5   : > { %v3807_v25 = vpop.eup %3806 }
 0x40f   : > { %v1098_v26 = vpop.f32.mrf.mxu0 }
 0x410   : > { %v1105_v27 = vmul.f32 %v3807_v25, %v1098_v26 }
 0x411   : > { %v3433_v30 = vpop.f32.mrf.mxu0 }
 0x412   : > { %v1106_v31 = vpack.c.bf16 %v1105_v27, %v1105_v27 }
 0x413   : > { %v1101_v32 = vpop.f32.mrf.mxu0 }
 0x414   : > { %3438 = vmatmul.mubr.msk.bf16.vlgmr.msra.gmra.mxu1 %vm885_vm2, %v1106_v31 }
 0x415   : > { %v3434_v33 = vpop.f32.mrf.mxu0  ;;  %3448 = vmatpush3.bf16.msra.mxu1 %v4569_v29  ;;  %3451 = vmatprep.mubr.msk.bf16.mxu1 %vm4089_vm0, %v4088_v0 }
 0x416   : > { %3449 = vmatprep.subr.bf16.mxu1 %v4088_v0 }
 0x419   : > { %3450 = vmatpush3.bf16.msra.mxu1 %v4575_v34 }
 0x41a   : > { %3463 = vmatprep.subr.bf16.mxu1 %v4088_v0 }
 0x41c   : > { %3452 = vmatmul.mubr.msk.bf16.vlgmr.msra.gmra.mxu1 %vm712_vm1, %v4456_v6 }
 0x41d   : > { %3467 = vmatprep.mubr.msk.bf16.mxu1 %vm4089_vm0, %v4088_v0  ;;  %3464 = vmatpush3.bf16.msra.mxu1 %v4592_v48 }
 0x41e   : > { %3465 = vmatprep.subr.bf16.mxu1 %v4088_v0 }
 0x421   : > { %3466 = vmatpush3.bf16.msra.mxu1 %v4598_v51 }
 0x422   : > { %3477 = vmatprep.subr.bf16.mxu1 %v4088_v0 }
 0x424   : > { %3468 = vmatmul.mubr.msk.bf16.vlgmr.msra.gmra.mxu1 %vm712_vm1, %v4456_v6 }
 0x425   : > { %3479 = vmatprep.mubr.msk.bf16.mxu1 %vm4089_vm0, %v4088_v0 }
 0x461   : > { %v4584_v36 = vpop.f32.mrf.mxu0 }
 0x463   : > { %v3445_v37 = vpop.f32.mrf.mxu0 }
 0x465   : > { %v1197_v38 = vpop.f32.mrf.mxu0 }
 0x467   : > { %v3446_v39 = vpop.f32.mrf.mxu0 }
 0x468   : > { %v1455_v39 = vld [vmem:[%s4999_s8 + $0x8] sm:$0xf] }
 0x469   : > { %v1293_v41 = vpop.f32.mrf.mxu0 }
 0x46a   : > { %v1294_v42 = vadd.f32 %v1293_v41, %v4586_v40  ;;  %v4633_v41 = vsel %vm945_vm3, %v1455_v39, 0 }
 0x46b   : > { %v3461_v43 = vpop.f32.mrf.mxu0 }
 0x46c   : > { %v1299_v44 = vpack.c.bf16 %v1294_v42, %v1294_v42 }
 0x46d   : > { %v1296_v45 = vpop.f32.mrf.mxu0 }
 0x46e   : > { %1507 = vrot.lane.b32.xlu0 %v1299_v44, %s4090_s21  ;;  %v1354_v46 = vsel %vm885_vm2, %v1299_v44, 0 }
 0x46f   : > { %v3462_v47 = vpop.f32.mrf.mxu0  ;;  %3472 = vmatpush3.bf16.xpose.msra.mxu0 %v1354_v46 }
 0x470   : > { %3483 = vmatprep.subr.bf16.mxu0 %v4088_v0 }
 0x4d4   : > { %v4594_v49 = vpop.f32.mrf.mxu1 }
 0x4d6   : > { %v3439_v50 = vpop.f32.mrf.mxu1 }
 0x4d8   : > { %v1151_v52 = vpop.f32.mrf.mxu1 }
 0x4da   : > { %v3440_v53 = vpop.f32.mrf.mxu1 }
 0x4dc   : > { %v1243_v55 = vpop.f32.mrf.mxu1 }
 0x4dd   : > { %v1244_v56 = vadd.f32 %v1243_v55, %v4602_v54 }
 0x4de   : > { %v3453_v57 = vpop.f32.mrf.mxu1 }
 0x4df   : > { %v1249_v58 = vpack.c.bf16 %v1244_v56, %v1244_v56 }
 0x4e0   : > { %v1246_v59 = vpop.f32.mrf.mxu1  ;;  %v1508_v31 = vpop.permute.xlu0 %1507 }
 0x4e1   : > { %1504 = vrot.lane.b32.xlu0 %v1249_v58, %s4090_s21  ;;  %3474 = vmatmul.mubr.msk.bf16.vlgmr.msra.gmra.mxu0 %vm885_vm2, %v1249_v58  ;;  %v1513_v37 = vsel %vm885_vm2, %v1508_v31, 0 }
 0x4e2   : > { %v3454_v60 = vpop.f32.mrf.mxu1  ;;  %3485 = vmatprep.mubr.msk.bf16.mxu0 %vm4089_vm0, %v4088_v0  ;;  %3484 = vmatpush3.bf16.msra.mxu0 %v4633_v41 }
 0x4e3   : > { %3495 = vmatprep.subr.bf16.mxu0 %v4088_v0 }
 0x4e4   : > { %v1343_v16 = vpop.f32.mrf.mxu1 }
 0x4e5   : > { %v1344_v17 = vadd.f32 %v1343_v16, %v4615_v14 }
 0x4e6   : > { %v3469_v19 = vpop.f32.mrf.mxu1 }
 0x4e7   : > { %v1349_v20 = vpack.c.bf16 %v1344_v17, %v1344_v17  ;;  %v1617_v17 = vld [vmem:[%s4999_s8 + $0xc] sm:$0xf] }
 0x4e8   : > { %v1346_v21 = vpop.f32.mrf.mxu1  ;;  %v4653_v19 = vsel %vm945_vm3, %v1617_v17, 0  ;;  %v4706_v17 = vld [vmem:[%s5002_s11] ss:$0 sm:$0xff] }
 0x4e9   : > { %v1410_v22 = vsel %vm945_vm3, %v1349_v20, 0 }
 0x4ea   : > { %v3470_v24 = vpop.f32.mrf.mxu1  ;;  %3478 = vmatpush3.bf16.msra.mxu1 %v1410_v22 }
 0x4eb   : > { %3489 = vmatprep.subr.bf16.mxu1 %v4088_v0 }
 0x553   : > { %v1505_v38 = vpop.permute.xlu0 %1504 }
 0x5a1   : > { %v1390_v61 = vpop.f32.mrf.mxu0 }
 0x5a2   : > { %v1391_v6 = vadd.f32 %v1390_v61, %v4507_v28 }
 0x5a3   : > { %v3475_v62 = vpop.f32.mrf.mxu0 }
 0x5a4   : > { %v1396_v63 = vsel %vm885_vm2, %v1391_v6, -inf }
 0x5a5   : > { %1397 = vmax.xlane.f32.xlu1 %v1396_v63  ;;  %v1393_v11 = vpop.f32.mrf.mxu0 }
 0x5a7   : > { %v3476_v13 = vpop.f32.mrf.mxu0 }
 0x62e   : > { %v1398_v25 = vpop.xlane.xlu1 %1397 }
 0x62f   : > { %v1399_v26 = vsub.f32 %v1391_v6, %v1398_v25 }
 0x631   : > { %v1400_v27 = vmul.f32 1.442695, %v1399_v26 }
 0x633   : > { %3808 = vpow2.f32 %v1400_v27 }
 0x640   : > { %v3809_v30 = vpop.eup %3808 }
 0x641   : > { %v1402_v32 = vsel %vm885_vm2, %v3809_v30, 0.0  ;;  %v1405_v33 = vpack.c.bf16 %v3809_v30, %v3809_v30 }
 0x642   : > { %1403 = vadd.xlane.f32.xlu0 %v1402_v32 }
 0x643   : > { %3480 = vmatmul.mubr.msk.bf16.vlgmr.msra.gmra.mxu1 %vm885_vm2, %v1405_v33 }
 0x644   : > { %3490 = vmatpush3.bf16.xpose.msra.mxu1 %v1513_v37  ;;  %3491 = vmatprep.mubr.msk.bf16.mxu1 %vm4089_vm0, %v4088_v0 }
 0x645   : > { %3501 = vmatprep.subr.bf16.mxu1 %v4088_v0 }
 0x64b   : > { %3492 = vmatmul.mubr.msk.bf16.vlgmr.msra.gmra.mxu1 %vm885_vm2, %v1505_v38 }
 0x64c   : > { %3503 = vmatprep.mubr.msk.bf16.mxu1 %vm4089_vm0, %v4088_v0  ;;  %3502 = vmatpush3.bf16.msra.mxu1 %v4653_v19 }
 0x64d   : > { %3515 = vmatprep.subr.bf16.mxu1 %v4088_v0 }
 0x6cb   : > { %v1404_v42 = vpop.xlane.xlu0 %1403 }
 0x6cc   : > { %3810 = vrcp.f32 %v1404_v42 }
 0x6d9   : > { %v3811_v43 = vpop.eup %3810 }
 0x703   : > { %v1446_v44 = vpop.f32.mrf.mxu1 }
 0x704   : > { %v1453_v45 = vmul.f32 %v3811_v43, %v1446_v44  ;;  %v4662_v43 = vld [vmem:[#allocation11] ss:$0 sm:$0xff] }
 0x705   : > { %v3481_v46 = vpop.f32.mrf.mxu1 }
 0x706   : > { %v1454_v47 = vpack.c.bf16 %v1453_v45, %v1453_v45 }
 0x707   : > { %v1449_v50 = vpop.f32.mrf.mxu1 }
 0x708   : > { %3486 = vmatmul.mubr.msk.bf16.vlgmr.msra.gmra.mxu0 %vm885_vm2, %v1454_v47 }
 0x709   : > { %v3482_v52 = vpop.f32.mrf.mxu1  ;;  %3497 = vmatprep.mubr.msk.bf16.mxu0 %vm4089_vm0, %v4088_v0 }
 0x70a   : > { %v4670_v52 = vld [vmem:[%s5003_s12 + $0x8] sm:$0xff]  }
 0x70b   : > { %v1549_v53 = vpop.f32.mrf.mxu1 }
 0x70c   : > { %v1550_v55 = vadd.f32 %v1549_v53, %v4507_v28 }
 0x70d   : > { %v3493_v56 = vpop.f32.mrf.mxu1 }
 0x70e   : > { %v1555_v57 = vsel %vm885_vm2, %v1550_v55, -inf }
 0x70f   : > { %1556 = vmax.xlane.f32.xlu1 %v1555_v57  ;;  %v1552_v58 = vpop.f32.mrf.mxu1 }
 0x711   : > { %v3494_v59 = vpop.f32.mrf.mxu1 }
 0x712   : > { %v4687_v59 = vld [vmem:[%s5004_s13] ss:$0 sm:$0xff] }
 0x720   : > { %1566 = vrot.lane.b32.xlu1 %v1349_v20, %s4090_s21  ;;  %v1195_v20 = vadd.f32 %v4584_v36, %v4594_v49 }
 0x798   : > { %v1557_v60 = vpop.xlane.xlu1 %1556 }
 0x799   : > { %v1558_v61 = vsub.f32 %v1550_v55, %v1557_v60 }
 0x79b   : > { %v1559_v6 = vmul.f32 1.442695, %v1558_v61 }
 0x79c   : > { %v1567_v62 = vpop.permute.xlu1 %1566 }
 0x79d   : > { %3812 = vpow2.f32 %v1559_v6  ;;  %v1572_v63 = vsel %vm945_vm3, %v1567_v62, 0 }
 0x79e   : > { %3496 = vmatpush3.bf16.msra.mxu0 %v1572_v63 }
 0x79f   : > { %3507 = vmatprep.subr.bf16.mxu0 %v4088_v0 }
 0x7aa   : > { %v3813_v11 = vpop.eup %3812 }
 0x7ab   : > { %v1561_v13 = vsel %vm885_vm2, %v3813_v11, 0.0  ;;  %v1564_v16 = vpack.c.bf16 %v3813_v11, %v3813_v11 }
 0x7ac   : > { %1562 = vadd.xlane.f32.xlu0 %v1561_v13  ;;  %v4701_v13 = vld [vmem:[%s5001_s10] ss:$0 sm:$0xff] }
 0x7ad   : > { %3498 = vmatmul.mubr.msk.bf16.vlgmr.msra.gmra.mxu0 %vm885_vm2, %v1564_v16 }
 0x7ae   : > { %3511 = vmatprep.mubr.msk.bf16.mxu0 %vm4089_vm0, %v4088_v0  ;;  %3508 = vmatpush3.bf16.msra.mxu0 %v4670_v52 }
 0x7af   : > { %3509 = vmatprep.subr.bf16.mxu0 %v4088_v0 }
 0x7c8   : > { %v1496_v21 = vpop.f32.mrf.mxu0 }
 0x7c9   : > { %v1502_v22 = vadd.f32 %v1496_v21, %v1195_v20 }
 0x7ca   : > { %v3487_v24 = vpop.f32.mrf.mxu0 }
 0x7cb   : > { %v4718_v24 = vld [vmem:[%s5005_s14 + $0x8] sm:$0xff]  }
 0x7cc   : > { %v1499_v25 = vpop.f32.mrf.mxu0 }
 0x7ce   : > { %v3488_v26 = vpop.f32.mrf.mxu0 }
 0x7cf   : > { %v4733_v26 = vld [vmem:[%s5005_s14 + $0x10] sm:$0xff]  }
 0x835   : > { %v1563_v27 = vpop.xlane.xlu0 %1562 }
 0x836   : > { %3814 = vrcp.f32 %v1563_v27  ;;  %v4738_v27 = vld [vmem:[%s5005_s14] sm:$0xff]  }
 0x843   : > { %v3815_v30 = vpop.eup %3814 }
 0x86d   : > { %v1608_v31 = vpop.f32.mrf.mxu0 }
 0x86e   : > { %v1615_v32 = vmul.f32 %v3815_v30, %v1608_v31 }
 0x86f   : > { %v3499_v33 = vpop.f32.mrf.mxu0 }
 0x870   : > { %v1616_v37 = vpack.c.bf16 %v1615_v32, %v1615_v32 }
 0x871   : > { %v1611_v38 = vpop.f32.mrf.mxu0 }
 0x872   : > { %3504 = vmatmul.mubr.msk.bf16.vlgmr.msra.gmra.mxu1 %vm885_vm2, %v1616_v37 }
 0x873   : > { %v3500_v39 = vpop.f32.mrf.mxu0  ;;  %3519 = vmatprep.mubr.msk.bf16.mxu1 %vm4089_vm0, %v4088_v0 }
 0x932   : > { %v1658_v36 = vpop.f32.mrf.mxu1 }
 0x933   : > { %v1664_v49 = vadd.f32 %v1658_v36, %v1502_v22  ;;  %v4713_v22 = vld [vmem:[%s5005_s14 + $0x18] sm:$0xff]  }
 0x934   : > { %v3505_v42 = vpop.f32.mrf.mxu1 }
 0x935   : > { %v1665_v44 = vadd.f32 %v1664_v49, %v4452_v5  ;;  %v4677_v5 = vld [vmem:[%s5003_s12] sm:$0xff]  }
 0x936   : > { %v1661_v45 = vpop.f32.mrf.mxu1  ;;  %3510 = vmatpush3.bf16.msra.mxu0 %v4677_v5 }
 0x937   : > { %v1672_v46 = vadd.f32 %v4662_v43, %v1665_v44  ;;  %3523 = vmatprep.subr.bf16.mxu0 %v4088_v0 }
 0x938   : > { %v3506_v47 = vpop.f32.mrf.mxu1 }
 0x939   : > { %v1673_v50 = vsel %vm712_vm1, %v1672_v46, 0.0 }
 0x93a   : > { %1674 = vadd.xlane.f32.xlu1 %v1673_v50 }
 0x9c3   : > { %v1675_v53 = vpop.xlane.xlu1 %1674 }
 0x9c4   : > { %v1677_v55 = vmul.f32 0.03125, %v1675_v53 }
 0x9c6   : > { %v1678_v56 = vsub.f32 %v1672_v46, %v1677_v55 }
 0x9c8   : > { %v1679_v57 = vmul.f32 %v1678_v56, %v1678_v56 }
 0x9ca   : > { %v1680_v58 = vsel %vm712_vm1, %v1679_v57, 0.0  ;;  %v4765_v57 = vld [vmem:[%s5006_s15] ss:$0 sm:$0xff] }
 0x9cb   : > { %1681 = vadd.xlane.f32.xlu0 %v1680_v58 }
 0x9e1   : > { %1776 = vrot.lane.b32.xlu0 %v4670_v52, %s4092_s5 }
 0x9e5   : > { %1774 = vrot.lane.b32.xlu0 %v4677_v5, %s4092_s5 }
 0x9e9   : > { %1780 = vrot.lane.b32.xlu0 %v4687_v59, %s4092_s5 }
 0xa54   : > { %v1682_v60 = vpop.xlane.xlu0 %1681 }
 0xa55   : > { %v1683_v61 = vmul.f32 0.03125, %v1682_v60 }
 0xa57   : > { %v1684_v6 = vadd.f32 1e-05, %v1683_v61 }
 0xa58   : > { %v4690_v62 = vpop.permute.xlu0 %1776 }
 0xa59   : > { %3816 = vrsqrt.f32 %v1684_v6  ;;  %3516 = vmatpush3.bf16.msra.mxu1 %v4690_v62 }
 0xa5a   : > { %3517 = vmatprep.subr.bf16.mxu1 %v4088_v0 }
 0xa5c   : > { %v4694_v63 = vpop.permute.xlu0 %1774 }
 0xa5d   : > { %3518 = vmatpush3.bf16.msra.mxu1 %v4694_v63 }
 0xa5e   : > { %3531 = vmatprep.subr.bf16.mxu1 %v4088_v0 }
 0xa60   : > { %v4744_v30 = vpop.permute.xlu0 %1780 }
 0xa66   : > { %v3817_v11 = vpop.eup %3816 }
 0xa67   : > { %v1686_v16 = vmul.f32 %v3817_v11, %v1678_v56 }
 0xa69   : > { %v1693_v20 = vmul.f32 %v4701_v13, %v1686_v16 }
 0xa6b   : > { %v1700_v21 = vadd.f32 %v4706_v17, %v1693_v20 }
 0xa6d   : > { %v1701_v25 = vpack.c.bf16 %v1700_v21, %v1700_v21 }
 0xa6f   : > { %3512 = vmatmul.mubr.msk.bf16.vlgmr.msra.gmra.mxu0 %vm712_vm1, %v1701_v25  ;;  %3520 = vmatmul.mubr.msk.bf16.vlgmr.msra.gmra.mxu1 %vm712_vm1, %v1701_v25 }
 0xa70   : > { %3524 = vmatpush3.bf16.msra.mxu0 %v4713_v22  ;;  %3532 = vmatpush3.bf16.msra.mxu1 %v4718_v24 }
 0xa71   : > { %3525 = vmatprep.subr.bf16.mxu0 %v4088_v0  ;;  %3533 = vmatprep.subr.bf16.mxu1 %v4088_v0 }
 0xa72   : > { %3527 = vmatprep.mubr.msk.bf16.mxu0 %vm4089_vm0, %v4088_v0  ;;  %3535 = vmatprep.mubr.msk.bf16.mxu1 %vm4089_vm0, %v4088_v0 }
 0xa74   : > { %3526 = vmatpush3.bf16.msra.mxu0 %v4733_v26  ;;  %3534 = vmatpush3.bf16.msra.mxu1 %v4738_v27 }
 0xa75   : > { %3539 = vmatprep.subr.bf16.mxu0 %v4088_v0  ;;  %3547 = vmatprep.subr.bf16.mxu1 %v4088_v0 }
 0xb2f   : > { %v1762_v31 = vpop.f32.mrf.mxu0  ;;  %v1817_v32 = vpop.f32.mrf.mxu1 }
 0xb30   : > { %v1763_v33 = vadd.f32 %v4687_v59, %v1762_v31  ;;  %v1818_v37 = vadd.f32 %v1817_v32, %v4744_v30 }
 0xb31   : > { %v3513_v38 = vpop.f32.mrf.mxu0  ;;  %v3521_v39 = vpop.f32.mrf.mxu1 }
 0xb32   : > { %v1768_v36 = vmax.f32 %v1763_v33, 0.0  ;;  %v1823_v49 = vmax.f32 %v1818_v37, 0.0  ;;  %v4773_v39 = vld [vmem:[%s5007_s16] ss:$0 sm:$0xff] }
 0xb33   : > { %v1765_v42 = vpop.f32.mrf.mxu0  ;;  %v1820_v44 = vpop.f32.mrf.mxu1 }
 0xb34   : > { %v1769_v45 = vpack.c.bf16 %v1768_v36, %v1768_v36  ;;  %v1824_v46 = vpack.c.bf16 %v1823_v49, %v1823_v49  ;;  %v4778_v49 = vld [vmem:[%s5065_s9] ss:$0 sm:$0xff] }
 0xb35   : > { %v3514_v47 = vpop.f32.mrf.mxu0  ;;  %v3522_v50 = vpop.f32.mrf.mxu1 }
 0xb36   : > { %3528 = vmatmul.mubr.msk.bf16.vlgmr.msra.gmra.mxu0 %vm712_vm1, %v1824_v46  ;;  %3536 = vmatmul.mubr.msk.bf16.vlgmr.msra.gmra.mxu1 %vm712_vm1, %v1769_v45 }
 0xb37   : > { %3540 = vmatpush3.bf16.msra.mxu0 %v4436_v2  ;;  %3548 = vmatpush3.bf16.msra.mxu1 %v4431_v1 }
 0xb38   : > { %3541 = vmatprep.subr.bf16.mxu0 %v4088_v0  ;;  %3549 = vmatprep.subr.bf16.mxu1 %v4088_v0 }
 0xb39   : > { %3543 = vmatprep.mubr.msk.bf16.mxu0 %vm4089_vm0, %v4088_v0  ;;  %3551 = vmatprep.mubr.msk.bf16.mxu1 %vm4089_vm0, %v4088_v0 }
 0xb3b   : > { %3542 = vmatpush3.bf16.msra.mxu0 %v4449_v4  ;;  %3550 = vmatpush3.bf16.msra.mxu1 %v4442_v3 }
 0xb3c   : > { %3555 = vmatprep.subr.bf16.mxu0 %v4088_v0  ;;  %3563 = vmatprep.subr.bf16.mxu1 %v4088_v0 }
 0xbf6   : > { %v1878_v2 = vpop.f32.mrf.mxu0  ;;  %v1933_v1 = vpop.f32.mrf.mxu1 }
 0xbf7   : > { %v1934_v53 = vadd.f32 %v1933_v1, %v1878_v2 }
 0xbf8   : > { %v3529_v55 = vpop.f32.mrf.mxu0  ;;  %v3537_v56 = vpop.f32.mrf.mxu1 }
 0xbf9   : > { %v1939_v58 = vadd.f32 %v1934_v53, %v1700_v21 }
 0xbfa   : > { %v1881_v60 = vpop.f32.mrf.mxu0  ;;  %v1936_v61 = vpop.f32.mrf.mxu1 }
 0xbfb   : > { %v1946_v4 = vadd.f32 %v4765_v57, %v1939_v58 }
 0xbfc   : > { %v3530_v3 = vpop.f32.mrf.mxu0  ;;  %v3538_v6 = vpop.f32.mrf.mxu1 }
 0xbfd   : > { %v1947_v11 = vsel %vm712_vm1, %v1946_v4, 0.0 }
 0xbfe   : > { %1948 = vadd.xlane.f32.xlu0 %v1947_v11 }
 0xc87   : > { %v1949_v16 = vpop.xlane.xlu0 %1948 }
 0xc88   : > { %v1950_v20 = vmul.f32 0.03125, %v1949_v16 }
 0xc8a   : > { %v1951_v25 = vsub.f32 %v1946_v4, %v1950_v20 }
 0xc8c   : > { %v1952_v31 = vmul.f32 %v1951_v25, %v1951_v25 }
 0xc8e   : > { %v1953_v32 = vsel %vm712_vm1, %v1952_v31, 0.0 }
 0xc8f   : > { %1954 = vadd.xlane.f32.xlu1 %v1953_v32 }
 0xd18   : > { %v1955_v33 = vpop.xlane.xlu1 %1954 }
 0xd19   : > { %v1956_v37 = vmul.f32 0.03125, %v1955_v33 }
 0xd1b   : > { %v1957_v38 = vadd.f32 1e-05, %v1956_v37 }
 0xd1d   : > { %3818 = vrsqrt.f32 %v1957_v38 }
 0xd2a   : > { %v3819_v21 = vpop.eup %3818 }
 0xd2b   : > { %v1959_v36 = vmul.f32 %v3819_v21, %v1951_v25 }
 0xd2d   : > { %v1966_v42 = vmul.f32 %v4773_v39, %v1959_v36 }
 0xd2f   : > { %v4782_v44 = vadd.f32 %v4778_v49, %v1966_v42 }
 0xd31   : > { %v4786_v45 = vpack.c.bf16 %v4782_v44, %v4782_v44 }
 0xd33   : > { %3544 = vmatmul.mubr.msk.bf16.vlgmr.msra.gmra.mxu0 %vm712_vm1, %v4786_v45  ;;  %3552 = vmatmul.mubr.msk.bf16.vlgmr.msra.gmra.mxu1 %vm712_vm1, %v4786_v45 }
 0xd34   : > { %3556 = vmatpush3.bf16.msra.mxu0 %v4477_v10  ;;  %3559 = vmatprep.mubr.msk.bf16.mxu0 %vm4089_vm0, %v4088_v0 }
 0xd35   : > { %3557 = vmatprep.subr.bf16.mxu0 %v4088_v0  ;;  %3565 = vmatprep.mubr.msk.bf16.mxu1 %vm4089_vm0, %v4088_v0 }
 0xd38   : > { %3558 = vmatpush3.bf16.msra.mxu0 %v4485_v15 }
 0xd39   : > { %3569 = vmatprep.subr.bf16.mxu0 %v4088_v0 }
 0xd3b   : > { %3560 = vmatmul.mubr.msk.bf16.vlgmr.msra.gmra.mxu0 %vm712_vm1, %v4786_v45 }
 0xd3c   : > { %3571 = vmatprep.mubr.msk.bf16.mxu0 %vm4089_vm0, %v4088_v0 }
 0xdf3   : > { %v2012_v46 = vpop.f32.mrf.mxu0  ;;  %v2053_v10 = vpop.f32.mrf.mxu1 }
 0xdf4   : > { %v2054_v47 = vadd.f32 %v4470_v7, %v2053_v10  ;;  %v2013_v1 = vadd.f32 %v4472_v8, %v2012_v46 }
 0xdf5   : > { %v3545_v50 = vpop.f32.mrf.mxu0  ;;  %v3553_v2 = vpop.f32.mrf.mxu1 }
 0xdf6   : > { %v2059_v53 = vpack.c.bf16 %v2054_v47, %v2054_v47  ;;  %v2018_v61 = vpack.c.bf16 %v2013_v1, %v2013_v1 }
 0xdf7   : > { %v2015_v55 = vpop.f32.mrf.mxu0  ;;  %v2056_v56 = vpop.f32.mrf.mxu1 }
 0xdf8   : > { %v2105_v15 = vsel %vm885_vm2, %v2059_v53, 0  ;;  %2210 = vrot.lane.b32.xlu1 %v2059_v53, %s4090_s21 }
 0xdf9   : > { %v3546_v58 = vpop.f32.mrf.mxu0  ;;  %v3554_v60 = vpop.f32.mrf.mxu1  ;;  %3564 = vmatpush3.bf16.xpose.msra.mxu1 %v2105_v15 }
 0xdfa   : > { %3575 = vmatprep.subr.bf16.mxu1 %v4088_v0 }
 0xdfb   : > { %v2094_v4 = vpop.f32.mrf.mxu0 }
 0xdfc   : > { %v2095_v7 = vadd.f32 %v4511_v35, %v2094_v4  ;;  %2207 = vrot.lane.b32.xlu1 %v2018_v61, %s4090_s21 }
 0xdfd   : > { %v3561_v3 = vpop.f32.mrf.mxu0 }
 0xdfe   : > { %v2100_v8 = vpack.c.bf16 %v2095_v7, %v2095_v7 }
 0xdff   : > { %v2097_v6 = vpop.f32.mrf.mxu0 }
 0xe00   : > { %v2161_v11 = vsel %vm945_vm3, %v2100_v8, 0  ;;  %3566 = vmatmul.mubr.msk.bf16.vlgmr.msra.gmra.mxu1 %vm885_vm2, %v2018_v61 }
 0xe01   : > { %v3562_v16 = vpop.f32.mrf.mxu0  ;;  %3570 = vmatpush3.bf16.msra.mxu0 %v2161_v11  ;;  %3577 = vmatprep.mubr.msk.bf16.mxu1 %vm4089_vm0, %v4088_v0 }
 0xe02   : > { %3581 = vmatprep.subr.bf16.mxu0 %v4088_v0 }
 0xe6a   : > { %v2211_v20 = vpop.permute.xlu1 %2210 }
 0xe6b   : > { %v2216_v25 = vsel %vm885_vm2, %v2211_v20, 0 }
 0xe6c   : > { %3576 = vmatpush3.bf16.xpose.msra.mxu1 %v2216_v25 }
 0xe6d   : > { %3587 = vmatprep.subr.bf16.mxu1 %v4088_v0 }
 0xe6e   : > { %v2208_v35 = vpop.permute.xlu1 %2207 }
 0xe73   : > { %3578 = vmatmul.mubr.msk.bf16.vlgmr.msra.gmra.mxu1 %vm885_vm2, %v2208_v35 }
 0xe74   : > { %3588 = vmatpush3.bf16.msra.mxu1 %v4548_v12  ;;  %3589 = vmatprep.mubr.msk.bf16.mxu1 %vm4089_vm0, %v4088_v0 }
 0xe75   : > { %3599 = vmatprep.subr.bf16.mxu1 %v4088_v0 }
 0xec0   : > { %v2141_v31 = vpop.f32.mrf.mxu1 }
 0xec1   : > { %v2142_v32 = vadd.f32 %v2141_v31, %v4507_v28 }
 0xec2   : > { %v3567_v33 = vpop.f32.mrf.mxu1 }
 0xec3   : > { %v2147_v37 = vsel %vm885_vm2, %v2142_v32, -inf }
 0xec4   : > { %2148 = vmax.xlane.f32.xlu1 %v2147_v37  ;;  %v2144_v38 = vpop.f32.mrf.mxu1 }
 0xec6   : > { %v3568_v21 = vpop.f32.mrf.mxu1 }
 0xf33   : > { %v2252_v36 = vpop.f32.mrf.mxu1 }
 0xf34   : > { %v2253_v42 = vadd.f32 %v2252_v36, %v4507_v28 }
 0xf35   : > { %v3579_v46 = vpop.f32.mrf.mxu1 }
 0xf36   : > { %v2258_v12 = vsel %vm885_vm2, %v2253_v42, -inf }
 0xf37   : > { %2259 = vmax.xlane.f32.xlu0 %v2258_v12  ;;  %v2255_v10 = vpop.f32.mrf.mxu1 }
 0xf39   : > { %v3580_v47 = vpop.f32.mrf.mxu1 }
 0xf4d   : > { %v2149_v50 = vpop.xlane.xlu1 %2148  ;;  %2269 = vrot.lane.b32.xlu0 %v2100_v8, %s4090_s21 }
 0xf4e   : > { %v2150_v2 = vsub.f32 %v2142_v32, %v2149_v50 }
 0xf50   : > { %v2151_v1 = vmul.f32 1.442695, %v2150_v2 }
 0xf52   : > { %3820 = vpow2.f32 %v2151_v1 }
 0xf5f   : > { %v3821_v53 = vpop.eup %3820 }
 0xf60   : > { %v2156_v55 = vpack.c.bf16 %v3821_v53, %v3821_v53  ;;  %v2153_v56 = vsel %vm885_vm2, %v3821_v53, 0.0 }
 0xf62   : > { %3572 = vmatmul.mubr.msk.bf16.vlgmr.msra.gmra.mxu0 %vm885_vm2, %v2156_v55 }
 0xf63   : > { %3583 = vmatprep.mubr.msk.bf16.mxu0 %vm4089_vm0, %v4088_v0 }
 0xf6c   : > { %2154 = vadd.xlane.f32.xlu0 %v2153_v56 }
 0xfc0   : > { %v2260_v15 = vpop.xlane.xlu0 %2259 }
 0xfc1   : > { %v2261_v58 = vsub.f32 %v2253_v42, %v2260_v15 }
 0xfc3   : > { %v2262_v60 = vmul.f32 1.442695, %v2261_v58 }
 0xfc4   : > { %v2270_v61 = vpop.permute.xlu0 %2269 }
 0xfc5   : > { %3822 = vpow2.f32 %v2262_v60  ;;  %v2275_v4 = vsel %vm945_vm3, %v2270_v61, 0 }
 0xfc6   : > { %3582 = vmatpush3.bf16.msra.mxu0 %v2275_v4 }
 0xfc7   : > { %3593 = vmatprep.subr.bf16.mxu0 %v4088_v0 }
 0xfd2   : > { %v3823_v7 = vpop.eup %3822 }
 0xfd3   : > { %v2264_v3 = vsel %vm885_vm2, %v3823_v7, 0.0  ;;  %v2267_v8 = vpack.c.bf16 %v3823_v7, %v3823_v7 }
 0xfd4   : > { %2265 = vadd.xlane.f32.xlu1 %v2264_v3 }
 0xfd5   : > { %3584 = vmatmul.mubr.msk.bf16.vlgmr.msra.gmra.mxu0 %vm885_vm2, %v2267_v8 }
 0xfd6   : > { %3594 = vmatpush3.bf16.msra.mxu0 %v4537_v9  ;;  %3595 = vmatprep.mubr.msk.bf16.mxu0 %vm4089_vm0, %v4088_v0 }
 0xfd7   : > { %3607 = vmatprep.subr.bf16.mxu0 %v4088_v0 }
 0xff5   : > { %v2155_v6 = vpop.xlane.xlu0 %2154 }
 0xff6   : > { %3824 = vrcp.f32 %v2155_v6 }
0x1003   : > { %v3825_v11 = vpop.eup %3824 }
0x1022   : > { %v2197_v16 = vpop.f32.mrf.mxu0 }
0x1023   : > { %v2204_v20 = vmul.f32 %v3825_v11, %v2197_v16 }
0x1024   : > { %v3573_v25 = vpop.f32.mrf.mxu0 }
0x1025   : > { %v2205_v35 = vpack.c.bf16 %v2204_v20, %v2204_v20 }
0x1026   : > { %v2200_v31 = vpop.f32.mrf.mxu0 }
0x1027   : > { %3596 = vmatmul.mubr.msk.bf16.vlgmr.msra.gmra.mxu0 %vm885_vm2, %v2205_v35 }
0x1028   : > { %3608 = vmatpush3.bf16.msra.mxu0 %v4554_v18  ;;  %v3574_v32 = vpop.f32.mrf.mxu0  ;;  %3611 = vmatprep.mubr.msk.bf16.mxu0 %vm4089_vm0, %v4088_v0 }
0x1029   : > { %3609 = vmatprep.subr.bf16.mxu0 %v4088_v0 }
0x102c   : > { %3610 = vmatpush3.bf16.msra.mxu0 %v4560_v23 }
0x102d   : > { %3623 = vmatprep.subr.bf16.mxu0 %v4088_v0 }
0x102f   : > { %3612 = vmatmul.mubr.msk.bf16.vlgmr.msra.gmra.mxu0 %vm712_vm1, %v4786_v45 }
0x1030   : > { %3625 = vmatprep.mubr.msk.bf16.mxu0 %vm4089_vm0, %v4088_v0 }
0x105d   : > { %v2266_v9 = vpop.xlane.xlu1 %2265 }
0x105e   : > { %3826 = vrcp.f32 %v2266_v9 }
0x106b   : > { %v3827_v33 = vpop.eup %3826 }
0x1095   : > { %v2311_v18 = vpop.f32.mrf.mxu0 }
0x1096   : > { %v2318_v37 = vmul.f32 %v3827_v33, %v2311_v18 }
0x1097   : > { %v3585_v38 = vpop.f32.mrf.mxu0 }
0x1098   : > { %v2319_v21 = vpack.c.bf16 %v2318_v37, %v2318_v37 }
0x1099   : > { %v2314_v36 = vpop.f32.mrf.mxu0 }
0x109a   : > { %3590 = vmatmul.mubr.msk.bf16.vlgmr.msra.gmra.mxu1 %vm885_vm2, %v2319_v21 }
0x109b   : > { %3600 = vmatpush3.bf16.msra.mxu1 %v4569_v29  ;;  %v3586_v23 = vpop.f32.mrf.mxu0  ;;  %3603 = vmatprep.mubr.msk.bf16.mxu1 %vm4089_vm0, %v4088_v0 }
0x109c   : > { %3601 = vmatprep.subr.bf16.mxu1 %v4088_v0 }
0x109f   : > { %3602 = vmatpush3.bf16.msra.mxu1 %v4575_v34 }
0x10a0   : > { %3615 = vmatprep.subr.bf16.mxu1 %v4088_v0 }
0x10a2   : > { %3604 = vmatmul.mubr.msk.bf16.vlgmr.msra.gmra.mxu1 %vm712_vm1, %v4786_v45 }
0x10a3   : > { %3616 = vmatpush3.bf16.msra.mxu1 %v4592_v48  ;;  %3619 = vmatprep.mubr.msk.bf16.mxu1 %vm4089_vm0, %v4088_v0 }
0x10a4   : > { %3617 = vmatprep.subr.bf16.mxu1 %v4088_v0 }
0x10a7   : > { %3618 = vmatpush3.bf16.msra.mxu1 %v4598_v51 }
0x10a8   : > { %3629 = vmatprep.subr.bf16.mxu1 %v4088_v0 }
0x10aa   : > { %3620 = vmatmul.mubr.msk.bf16.vlgmr.msra.gmra.mxu1 %vm712_vm1, %v4786_v45 }
0x10ab   : > { %3631 = vmatprep.mubr.msk.bf16.mxu1 %vm4089_vm0, %v4088_v0 }
0x10e7   : > { %v4870_v29 = vpop.f32.mrf.mxu0 }
0x10e9   : > { %v3597_v34 = vpop.f32.mrf.mxu0 }
0x10eb   : > { %v2403_v42 = vpop.f32.mrf.mxu0 }
0x10ed   : > { %v3598_v48 = vpop.f32.mrf.mxu0 }
0x10ef   : > { %v2481_v46 = vpop.f32.mrf.mxu0 }
0x10f0   : > { %v2482_v12 = vadd.f32 %v2481_v46, %v4586_v40 }
0x10f1   : > { %v3613_v10 = vpop.f32.mrf.mxu0 }
0x10f2   : > { %v2487_v47 = vpack.c.bf16 %v2482_v12, %v2482_v12 }
0x10f3   : > { %v2484_v50 = vpop.f32.mrf.mxu0 }
0x10f4   : > { %v2533_v51 = vsel %vm885_vm2, %v2487_v47, 0 }
0x10f5   : > { %v3614_v2 = vpop.f32.mrf.mxu0  ;;  %3624 = vmatpush3.bf16.xpose.msra.mxu0 %v2533_v51 }
0x10f6   : > { %3635 = vmatprep.subr.bf16.mxu0 %v4088_v0 }
0x115a   : > { %v4875_v45 = vpop.f32.mrf.mxu1 }
0x115c   : > { %v3591_v1 = vpop.f32.mrf.mxu1 }
0x115e   : > { %v2360_v53 = vpop.f32.mrf.mxu1 }
0x1160   : > { %v3592_v55 = vpop.f32.mrf.mxu1 }
0x1162   : > { %v2440_v56 = vpop.f32.mrf.mxu1 }
0x1163   : > { %v2441_v15 = vadd.f32 %v2440_v56, %v4602_v54 }
0x1164   : > { %v3605_v58 = vpop.f32.mrf.mxu1 }
0x1165   : > { %v2446_v60 = vpack.c.bf16 %v2441_v15, %v2441_v15 }
0x1166   : > { %v2443_v40 = vpop.f32.mrf.mxu1 }
0x1167   : > { %3626 = vmatmul.mubr.msk.bf16.vlgmr.msra.gmra.mxu0 %vm885_vm2, %v2446_v60 }
0x1168   : > { %v3606_v61 = vpop.f32.mrf.mxu1  ;;  %3636 = vmatpush3.bf16.msra.mxu0 %v4633_v41  ;;  %3637 = vmatprep.mubr.msk.bf16.mxu0 %vm4089_vm0, %v4088_v0 }
0x1169   : > { %3647 = vmatprep.subr.bf16.mxu0 %v4088_v0 }
0x116a   : > { %v2522_v4 = vpop.f32.mrf.mxu1 }
0x116b   : > { %v2523_v7 = vadd.f32 %v2522_v4, %v4615_v14 }
0x116c   : > { %v3621_v3 = vpop.f32.mrf.mxu1 }
0x116d   : > { %v2528_v8 = vpack.c.bf16 %v2523_v7, %v2523_v7 }
0x116e   : > { %v2525_v6 = vpop.f32.mrf.mxu1 }
0x116f   : > { %v2589_v54 = vsel %vm945_vm3, %v2528_v8, 0 }
0x1170   : > { %v3622_v11 = vpop.f32.mrf.mxu1  ;;  %3630 = vmatpush3.bf16.msra.mxu1 %v2589_v54 }
0x1171   : > { %3641 = vmatprep.subr.bf16.mxu1 %v4088_v0 }
0x1227   : > { %v2569_v16 = vpop.f32.mrf.mxu0 }
0x1228   : > { %v2570_v41 = vadd.f32 %v2569_v16, %v4507_v28 }
0x1229   : > { %v3627_v20 = vpop.f32.mrf.mxu0 }
0x122a   : > { %v2575_v25 = vsel %vm885_vm2, %v2570_v41, -inf }
0x122b   : > { %2576 = vmax.xlane.f32.xlu1 %v2575_v25  ;;  %v2572_v35 = vpop.f32.mrf.mxu0 }
0x122d   : > { %v3628_v31 = vpop.f32.mrf.mxu0 }
0x123c   : > { %2682 = vrot.lane.b32.xlu1 %v2487_v47, %s4090_s21 }
0x1240   : > { %2679 = vrot.lane.b32.xlu1 %v2446_v60, %s4090_s21 }
0x12b4   : > { %v2577_v14 = vpop.xlane.xlu1 %2576 }
0x12b5   : > { %v2578_v32 = vsub.f32 %v2570_v41, %v2577_v14 }
0x12b7   : > { %v2579_v9 = vmul.f32 1.442695, %v2578_v32 }
0x12b8   : > { %v2683_v18 = vpop.permute.xlu1 %2682 }
0x12b9   : > { %3828 = vpow2.f32 %v2579_v9  ;;  %v2688_v21 = vsel %vm885_vm2, %v2683_v18, 0 }
0x12bc   : > { %v2680_v36 = vpop.permute.xlu1 %2679 }
0x12c6   : > { %v3829_v33 = vpop.eup %3828 }
0x12c7   : > { %v2581_v37 = vsel %vm885_vm2, %v3829_v33, 0.0  ;;  %v2584_v38 = vpack.c.bf16 %v3829_v33, %v3829_v33 }
0x12c8   : > { %2582 = vadd.xlane.f32.xlu0 %v2581_v37 }
0x12c9   : > { %3632 = vmatmul.mubr.msk.bf16.vlgmr.msra.gmra.mxu1 %vm885_vm2, %v2584_v38 }
0x12ca   : > { %3642 = vmatpush3.bf16.xpose.msra.mxu1 %v2688_v21  ;;  %3643 = vmatprep.mubr.msk.bf16.mxu1 %vm4089_vm0, %v4088_v0 }
0x12cb   : > { %3653 = vmatprep.subr.bf16.mxu1 %v4088_v0 }
0x12d1   : > { %3644 = vmatmul.mubr.msk.bf16.vlgmr.msra.gmra.mxu1 %vm885_vm2, %v2680_v36 }
0x12d2   : > { %3654 = vmatpush3.bf16.msra.mxu1 %v4653_v19  ;;  %3655 = vmatprep.mubr.msk.bf16.mxu1 %vm4089_vm0, %v4088_v0 }
0x12d3   : > { %3667 = vmatprep.subr.bf16.mxu1 %v4088_v0 }
0x12de   : > { %2741 = vrot.lane.b32.xlu0 %v2528_v8, %s4090_s21  ;;  %s5066_s21 = sld [smem:[#allocation24_spill]] }
0x12e4   : > { %p5068_p9 = scmp.ne.s32.totalorder %s5066_s21, 0 }
0x12e6   : > { %p4002_p11 = pnand %p4001_p2, %p5068_p9 }
0x12e8   : > { %p4003_p12 = pneg %p4002_p11 }
0x12ea   : > { %p4010_p10 = pnand %p4009_p6, %p4003_p12 }
0x1351   : > { %v2583_v23 = vpop.xlane.xlu0 %2582 }
0x1352   : > { %3830 = vrcp.f32 %v2583_v23 }
0x1355   : > { %v2742_v46 = vpop.permute.xlu0 %2741 }
0x1356   : > { %v2747_v50 = vsel %vm945_vm3, %v2742_v46, 0 }
0x135f   : > { %v3831_v34 = vpop.eup %3830 }
0x1389   : > { %v2625_v42 = vpop.f32.mrf.mxu1 }
0x138a   : > { %v2632_v48 = vmul.f32 %v3831_v34, %v2625_v42 }
0x138b   : > { %v3633_v12 = vpop.f32.mrf.mxu1 }
0x138c   : > { %v2633_v10 = vpack.c.bf16 %v2632_v48, %v2632_v48 }
0x138d   : > { %v2628_v47 = vpop.f32.mrf.mxu1 }
0x138e   : > { %3638 = vmatmul.mubr.msk.bf16.vlgmr.msra.gmra.mxu0 %vm885_vm2, %v2633_v10 }
0x138f   : > { %3648 = vmatpush3.bf16.msra.mxu0 %v2747_v50  ;;  %v3634_v19 = vpop.f32.mrf.mxu1  ;;  %3649 = vmatprep.mubr.msk.bf16.mxu0 %vm4089_vm0, %v4088_v0 }
0x1390   : > { %3659 = vmatprep.subr.bf16.mxu0 %v4088_v0 }
0x1391   : > { %v2724_v51 = vpop.f32.mrf.mxu1 }
0x1392   : > { %v2725_v2 = vadd.f32 %v2724_v51, %v4507_v28  ;;  %v2401_v28 = vadd.f32 %v4870_v29, %v4875_v45 }
0x1393   : > { %v3645_v1 = vpop.f32.mrf.mxu1 }
0x1394   : > { %v2730_v53 = vsel %vm885_vm2, %v2725_v2, -inf }
0x1395   : > { %2731 = vmax.xlane.f32.xlu1 %v2730_v53  ;;  %v2727_v55 = vpop.f32.mrf.mxu1 }
0x1397   : > { %v3646_v56 = vpop.f32.mrf.mxu1 }
0x141e   : > { %v2732_v15 = vpop.xlane.xlu1 %2731 }
0x141f   : > { %v2733_v58 = vsub.f32 %v2725_v2, %v2732_v15 }
0x1421   : > { %v2734_v60 = vmul.f32 1.442695, %v2733_v58 }
0x1423   : > { %3832 = vpow2.f32 %v2734_v60 }
0x1430   : > { %v3833_v40 = vpop.eup %3832 }
0x1431   : > { %v2736_v61 = vsel %vm885_vm2, %v3833_v40, 0.0  ;;  %v2739_v4 = vpack.c.bf16 %v3833_v40, %v3833_v40 }
0x1432   : > { %2737 = vadd.xlane.f32.xlu0 %v2736_v61 }
0x1433   : > { %3650 = vmatmul.mubr.msk.bf16.vlgmr.msra.gmra.mxu0 %vm885_vm2, %v2739_v4 }
0x1434   : > { %3660 = vmatpush3.bf16.msra.mxu0 %v4670_v52  ;;  %3663 = vmatprep.mubr.msk.bf16.mxu0 %vm4089_vm0, %v4088_v0 }
0x1435   : > { %3661 = vmatprep.subr.bf16.mxu0 %v4088_v0 }
0x1438   : > { %3662 = vmatpush3.bf16.msra.mxu0 %v4677_v5 }
0x1439   : > { %3675 = vmatprep.subr.bf16.mxu0 %v4088_v0 }
0x144e   : > { %v2671_v7 = vpop.f32.mrf.mxu0 }
0x144f   : > { %v2677_v3 = vadd.f32 %v2671_v7, %v2401_v28 }
0x1450   : > { %v3639_v8 = vpop.f32.mrf.mxu0 }
0x1452   : > { %v2674_v6 = vpop.f32.mrf.mxu0 }
0x1454   : > { %v3640_v54 = vpop.f32.mrf.mxu0 }
0x14bb   : > { %v2738_v11 = vpop.xlane.xlu0 %2737 }
0x14bc   : > { %3834 = vrcp.f32 %v2738_v11 }
0x14c9   : > { %v3835_v52 = vpop.eup %3834 }
0x14f3   : > { %v2783_v16 = vpop.f32.mrf.mxu0 }
0x14f4   : > { %v2790_v41 = vmul.f32 %v3835_v52, %v2783_v16 }
0x14f5   : > { %v3651_v20 = vpop.f32.mrf.mxu0 }
0x14f6   : > { %v2791_v25 = vpack.c.bf16 %v2790_v41, %v2790_v41 }
0x14f7   : > { %v2786_v35 = vpop.f32.mrf.mxu0 }
0x14f8   : > { %3656 = vmatmul.mubr.msk.bf16.vlgmr.msra.gmra.mxu1 %vm885_vm2, %v2791_v25 }
0x14f9   : > { %3668 = vmatpush3.bf16.msra.mxu1 %v4690_v62  ;;  %v3652_v5 = vpop.f32.mrf.mxu0  ;;  %3671 = vmatprep.mubr.msk.bf16.mxu1 %vm4089_vm0, %v4088_v0 }
0x14fa   : > { %3669 = vmatprep.subr.bf16.mxu1 %v4088_v0 }
0x14fd   : > { %3670 = vmatpush3.bf16.msra.mxu1 %v4694_v63 }
0x14fe   : > { %3683 = vmatprep.subr.bf16.mxu1 %v4088_v0 }
0x15b8   : > { %v2829_v29 = vpop.f32.mrf.mxu1 }
0x15b9   : > { %v2835_v45 = vadd.f32 %v2829_v29, %v2677_v3 }
0x15ba   : > { %v3657_v31 = vpop.f32.mrf.mxu1 }
0x15bb   : > { %v2836_v14 = vadd.f32 %v2835_v45, %v4782_v44 }
0x15bc   : > { %v2832_v32 = vpop.f32.mrf.mxu1 }
0x15bd   : > { %v2837_v9 = vadd.f32 %v4662_v43, %v2836_v14 }
0x15be   : > { %v3658_v33 = vpop.f32.mrf.mxu1 }
0x15bf   : > { %v2838_v62 = vsel %vm712_vm1, %v2837_v9, 0.0 }
0x15c0   : > { %2839 = vadd.xlane.f32.xlu1 %v2838_v62 }
0x1649   : > { %v2840_v18 = vpop.xlane.xlu1 %2839 }
0x164a   : > { %v2841_v37 = vmul.f32 0.03125, %v2840_v18 }
0x164c   : > { %v2842_v38 = vsub.f32 %v2837_v9, %v2841_v37 }
0x164e   : > { %v2843_v21 = vmul.f32 %v2842_v38, %v2842_v38 }
0x1650   : > { %v2844_v63 = vsel %vm712_vm1, %v2843_v21, 0.0 }
0x1651   : > { %2845 = vadd.xlane.f32.xlu1 %v2844_v63 }
0x16da   : > { %v2846_v36 = vpop.xlane.xlu1 %2845 }
0x16db   : > { %v2847_v23 = vmul.f32 0.03125, %v2846_v36 }
0x16dd   : > { %v2848_v34 = vadd.f32 1e-05, %v2847_v23 }
0x16df   : > { %3836 = vrsqrt.f32 %v2848_v34 }
0x16ec   : > { %v3837_v42 = vpop.eup %3836 }
0x16ed   : > { %v2850_v44 = vmul.f32 %v3837_v42, %v2842_v38 }
0x16ef   : > { %v2851_v48 = vmul.f32 %v4701_v13, %v2850_v44 }
0x16f1   : > { %v2852_v43 = vadd.f32 %v4706_v17, %v2851_v48 }
0x16f3   : > { %v2853_v46 = vpack.c.bf16 %v2852_v43, %v2852_v43 }
0x16f5   : > { %3664 = vmatmul.mubr.msk.bf16.vlgmr.msra.gmra.mxu0 %vm712_vm1, %v2853_v46  ;;  %3672 = vmatmul.mubr.msk.bf16.vlgmr.msra.gmra.mxu1 %vm712_vm1, %v2853_v46 }
0x16f6   : > { %3676 = vmatpush3.bf16.msra.mxu0 %v4713_v22  ;;  %3684 = vmatpush3.bf16.msra.mxu1 %v4718_v24 }
0x16f7   : > { %3677 = vmatprep.subr.bf16.mxu0 %v4088_v0  ;;  %3685 = vmatprep.subr.bf16.mxu1 %v4088_v0 }
0x16f8   : > { %3679 = vmatprep.mubr.msk.bf16.mxu0 %vm4089_vm0, %v4088_v0  ;;  %3687 = vmatprep.mubr.msk.bf16.mxu1 %vm4089_vm0, %v4088_v0 }
0x16fa   : > { %3678 = vmatpush3.bf16.msra.mxu0 %v4733_v26  ;;  %3686 = vmatpush3.bf16.msra.mxu1 %v4738_v27 }
0x17b5   : > { %v2891_v13 = vpop.f32.mrf.mxu0  ;;  %v2933_v17 = vpop.f32.mrf.mxu1 }
0x17b6   : > { %v2892_v22 = vadd.f32 %v4687_v59, %v2891_v13  ;;  %v2934_v24 = vadd.f32 %v2933_v17, %v4744_v30 }
0x17b7   : > { %v3665_v12 = vpop.f32.mrf.mxu0  ;;  %v3673_v10 = vpop.f32.mrf.mxu1 }
0x17b8   : > { %v2897_v47 = vmax.f32 %v2892_v22, 0.0  ;;  %v2939_v50 = vmax.f32 %v2934_v24, 0.0 }
0x17b9   : > { %v2894_v19 = vpop.f32.mrf.mxu0  ;;  %v2936_v51 = vpop.f32.mrf.mxu1 }
0x17ba   : > { %v2898_v2 = vpack.c.bf16 %v2897_v47, %v2897_v47  ;;  %v2940_v1 = vpack.c.bf16 %v2939_v50, %v2939_v50 }
0x17bb   : > { %v3666_v53 = vpop.f32.mrf.mxu0  ;;  %v3674_v0 = vpop.f32.mrf.mxu1 }
0x17bc   : > { %3680 = vmatmul.mubr.msk.bf16.vlgmr.msra.gmra.mxu0 %vm712_vm1, %v2940_v1  ;;  %3688 = vmatmul.mubr.msk.bf16.vlgmr.msra.gmra.mxu1 %vm712_vm1, %v2898_v2 }
0x187c   : > { %v2978_v26 = vpop.f32.mrf.mxu0  ;;  %v3021_v27 = vpop.f32.mrf.mxu1 }
0x187d   : > { %v3022_v55 = vadd.f32 %v3021_v27, %v2978_v26 }
0x187e   : > { %v3681_v59 = vpop.f32.mrf.mxu0  ;;  %v3689_v56 = vpop.f32.mrf.mxu1 }
0x187f   : > { %v3027_v30 = vadd.f32 %v3022_v55, %v2852_v43 }
0x1880   : > { %v2981_v15 = vpop.f32.mrf.mxu0  ;;  %v3024_v58 = vpop.f32.mrf.mxu1 }
0x1881   : > { %v3028_v60 = vadd.f32 %v4765_v57, %v3027_v30 }
0x1882   : > { %v3682_v40 = vpop.f32.mrf.mxu0  ;;  %v3690_v61 = vpop.f32.mrf.mxu1 }
0x1883   : > { %v3029_v4 = vsel %vm712_vm1, %v3028_v60, 0.0 }
0x1884   : > { %3030 = vadd.xlane.f32.xlu1 %v3029_v4 }
0x190d   : > { %v3031_v28 = vpop.xlane.xlu1 %3030 }
0x190e   : > { %v3032_v7 = vmul.f32 0.03125, %v3031_v28 }
0x1910   : > { %v3033_v3 = vsub.f32 %v3028_v60, %v3032_v7 }
0x1912   : > { %v3034_v8 = vmul.f32 %v3033_v3, %v3033_v3 }
0x1914   : > { %v3035_v6 = vsel %vm712_vm1, %v3034_v8, 0.0 }
0x1915   : > { %3036 = vadd.xlane.f32.xlu1 %v3035_v6 }
0x199e   : > { %v3037_v54 = vpop.xlane.xlu1 %3036 }
0x199f   : > { %v3038_v11 = vmul.f32 0.03125, %v3037_v54 }
0x19a1   : > { %v3039_v52 = vadd.f32 1e-05, %v3038_v11 }
0x19a3   : > { %3838 = vrsqrt.f32 %v3039_v52 }
0x19b0   : > { %v3839_v57 = vpop.eup %3838 }
0x19b1   : > { %v3041_v16 = vmul.f32 %v3839_v57, %v3033_v3 }
0x19b3   : > { %v3042_v41 = vmul.f32 %v4773_v39, %v3041_v16 }
0x19b5   : > { %v3043_v20 = vadd.f32 %v4778_v49, %v3042_v41 }
0x19b7   : > { %3044 = vst.msk [vmem:[%s677_s0] sm:$0xff] %vm712_vm1, %v3043_v20 }
0x19b8   : > { %4013 = shalt.err (!%p4010_p10)
}
0x19b9   : > { %s4014_s7 = scalar_lea.hbm %s3057_s19, 128  ;;  %s4018_s9 = scalar_lea.hbm %s5067_s26, 256 }
0x19ba   : > { %p4015_p3 = scmp.ne.s32.totalorder %s3057_s19, %s4014_s7  ;;  %p4019_p8 = scmp.lt.s32.totalorder %s3057_s19, %s5067_s26 }
0x19bb   : > { %p4020_p13 = scmp.lt.s32.totalorder %s4018_s9, %s4014_s7 }
0x19bc   : > { %p4016_p7 = pnand %p4015_p3, %p5068_p9 }
0x19bd   : > { %p4021_p0 = por %p4020_p13, %p4019_p8 }
0x19be   : > { %p4017_p5 = pneg %p4016_p7 }
0x19c0   : > { %p4022_p2 = pnand %p4021_p0, %p4017_p5 }
0x19c2   : > { %4025 = shalt.err (!%p4022_p2)
}
0x19c3   : > { %3711 = dma.vmem_to_hbm [thread:$0]  (%p5068_p9), %s3060_s29, 128, %s3057_s19, %s3046_s23  }
0x19c4 PF: > { %s5069_s20 = sld [smem:[#allocation20_spill]]  ;;  %p5072_p12 = scmp.ge.s32.totalorder %s4080_s30, 2 }
0x19c5   : > { %s5070_s5 = sld [smem:[#allocation25_spill]] }
0x19ca   : > { %s3071_s3 = sand.u32 1, %s5069_s20  }
0x19cb   : > { %p5071_p11 = scmp.ne.s32.totalorder %s5070_s5, 0  ;;  %s3072_s1 = scalar_lea.sflag [#allocation4], %s3071_s3 }
0x19cd   : > { %p3734_p1 = pnand %p5072_p12, %p5071_p11 }
0x19cf   : > { %p3735_p4 = pneg %p3734_p1 }
0x19d1   : > { %4063 = dma.done.wait (%p3735_p4), %s3072_s1, 128  }
0x19d2   : > { %4065 = vsyncadd (%p3735_p4), %s3072_s1, 4294967168  ;;  %s5073_s30 = sld [smem:[#allocation22_spill]]  ;;  %s5076_s27 = smov %s4072_s28 }
0x19d3   : > { %s5074_s24 = sld [smem:[#allocation21_spill]] }
0x19d4   : > { %s5075_s29 = sld [smem:[#allocation23_spill]] }
0x19d8   : > { %p36_p6 = scmp.ge.s32.totalorder %s5073_s30, 4  }
0x19d9   : > { %s5077_s28 = smov %s5074_s24 }
0x19da   :  { %38 = sbr.rel (!%p36_p6) target bundleno = 19 (0x13), region = 166 }
0x19df   :  { %3077 = vsyncpa [#allocation3], 1 }
0x19e0   :  { %3079 = vsyncpa [#allocation3 + $0x1], 1 }
0x19e1   :  { %3080 = vsyncpa [#allocation6], 1 }
0x19e2   :  { %3082 = vsyncpa [#allocation6 + $0x1], 1 }
0x19e3   :  { %3083 = vsyncpa [#allocation9], 1 }
0x19e4   :  { %3084 = vsyncpa [#allocation12], 1 }
0x19e5   :  { %3085 = vsyncpa [#allocation4], 1 }
0x19e6   :  { %3087 = vsyncpa [#allocation4 + $0x1], 1 }

</bundles_post_ra>
